<compile_context>
chip_gen: v7x
topology: tpu7x:2x2x1
jax: 0.10.0
libtpu: 0.0.40
codegen_flags: <defaults>
</compile_context>

<pallas_src>
import functools
import math

import jax
import jax.numpy as jnp
from jax.experimental import pallas as pl
from jax.experimental.pallas import tpu as pltpu


# ----------------------------------------------------------------------------
# Kernel 1: relative-position bias meta-MLP, channel-major (lane-dense).
#   rel: (2, TN)   w1: (Hm, 2)  b1: (Hm, 1)  w2: (nh, Hm)  b2: (nh, 1)
#   out: (nh, TN)  -- TN (pixel-pairs) on the 128-lane axis.
# ----------------------------------------------------------------------------
def _meta_mlp_kernel(rel_ref, w1_ref, b1_ref, w2_ref, b2_ref, o_ref):
    h = jnp.dot(w1_ref[...], rel_ref[...],
                preferred_element_type=jnp.float32) + b1_ref[...]
    h = jnp.maximum(h, 0.0)                                   # ReLU
    o_ref[...] = (jnp.dot(w2_ref[...], h,
                          preferred_element_type=jnp.float32)
                  + b2_ref[...]).astype(o_ref.dtype)


def _pick_lane_tile(m, pref=2048):
    """Largest multiple-of-128 divisor of m that is <= pref, >=2 grid steps."""
    cap = min(pref, m // 2) if m >= 256 else m
    best = None
    for t in range(128, cap + 1, 128):
        if m % t == 0:
            best = t
    return best if best is not None else m


def relative_position_bias_pallas(window_size, meta_w1, meta_b1, meta_w2, meta_b2):
    n = window_size * window_size
    m = n * n
    coords = jnp.stack(jnp.meshgrid(jnp.arange(window_size),
                                    jnp.arange(window_size), indexing="ij"))
    cf = coords.reshape(2, n).astype(jnp.float32)             # (2, N)
    rel = cf[:, :, None] - cf[:, None, :]                     # (2, N, N)
    rel_cm = (jnp.sign(rel) * jnp.log1p(jnp.abs(rel))).reshape(2, m)

    hidden = meta_w1.shape[0]
    num_heads = meta_w2.shape[0]
    tile_n = _pick_lane_tile(m)

    bias_flat = pl.pallas_call(
        _meta_mlp_kernel,
        out_shape=jax.ShapeDtypeStruct((num_heads, m), jnp.float32),
        grid_spec=pltpu.PrefetchScalarGridSpec(
            num_scalar_prefetch=0,
            grid=(m // tile_n,),
            in_specs=[
                pl.BlockSpec((2, tile_n), lambda i: (0, i)),
                pl.BlockSpec((hidden, 2), lambda i: (0, 0)),
                pl.BlockSpec((hidden, 1), lambda i: (0, 0)),
                pl.BlockSpec((num_heads, hidden), lambda i: (0, 0)),
                pl.BlockSpec((num_heads, 1), lambda i: (0, 0)),
            ],
            out_specs=pl.BlockSpec((num_heads, tile_n), lambda i: (0, i)),
        ),
        compiler_params=pltpu.CompilerParams(dimension_semantics=("parallel",)),
    )(rel_cm, meta_w1, meta_b1.reshape(hidden, 1),
      meta_w2, meta_b2.reshape(num_heads, 1))
    return bias_flat.reshape(num_heads, n, n)


# ----------------------------------------------------------------------------
# Kernel 2: fused QKV 1x1 conv + windowed multi-head attention + output proj.
#   x:     (wb, N, dim)       block of wb windows
#   wqkv:  (dim, 3*dim)  bqkv: (1, 3*dim)
#   bias:  (num_heads, N, N)
#   wproj: (dim, dim)    bproj:(1, dim)
#   out:   (wb, N, dim)
# ----------------------------------------------------------------------------
def _window_attention_kernel(x_ref, wqkv_ref, bqkv_ref, bias_ref,
                             wproj_ref, bproj_ref, o_ref,
                             *, num_heads, scale, mxu_dtype):
    wb, n, dim = x_ref.shape
    hd = dim // num_heads

    # --- fused QK / V 1x1 conv: ONE matmul with collapsed M = wb*N ----------
    x2d = x_ref[...].reshape(wb * n, dim)            # leading-dim merge (free)
    wqkv = wqkv_ref[...]
    if mxu_dtype is not None:
        x2d, wqkv = x2d.astype(mxu_dtype), wqkv.astype(mxu_dtype)
    qkv = jnp.dot(x2d, wqkv, preferred_element_type=jnp.float32) + bqkv_ref[...]

    # --- fold heads into the batch axis (windows*heads) ---------------------
    # Per-head q/k/v are static lane slices; stacking along a new LEADING axis
    # keeps every reshape an 8-sublane-aligned leading-dim regroup (n = 64).
    q_p, k_p, v_p = [], [], []
    for h in range(num_heads):
        q_p.append(qkv[:, h * hd:(h + 1) * hd].reshape(wb, n, hd))
        k_p.append(qkv[:, dim + h * hd:dim + (h + 1) * hd].reshape(wb, n, hd))
        v_p.append(qkv[:, 2 * dim + h * hd:2 * dim + (h + 1) * hd].reshape(wb, n, hd))
    q = jnp.stack(q_p, axis=0).reshape(num_heads * wb, n, hd) * scale
    k = jnp.stack(k_p, axis=0).reshape(num_heads * wb, n, hd)
    v = jnp.stack(v_p, axis=0).reshape(num_heads * wb, n, hd)
    if mxu_dtype is not None:
        q, k, v = q.astype(mxu_dtype), k.astype(mxu_dtype), v.astype(mxu_dtype)

    # --- scores + relative-position bias + stable softmax -------------------
    s = jnp.einsum("bnd,bmd->bnm", q, k, preferred_element_type=jnp.float32)
    s = s.reshape(num_heads, wb, n, n) + bias_ref[...][:, None, :, :]
    s = s - jnp.max(s, axis=-1, keepdims=True)
    p = jnp.exp(s)
    # EUP reciprocal instead of an N*N per-element divide.
    inv_l = pl.reciprocal(jnp.sum(p, axis=-1, keepdims=True), approx=True)

    pv = p.reshape(num_heads * wb, n, n)
    if mxu_dtype is not None:
        pv = pv.astype(mxu_dtype)
    ctx = jnp.einsum("bnm,bmd->bnd", pv, v, preferred_element_type=jnp.float32)
    ctx = ctx.reshape(num_heads, wb, n, hd) * inv_l   # softmax normalisation
    ctx = ctx.reshape(num_heads, wb * n, hd)

    # --- fused output projection (heads stay on the batch axis) -------------
    wproj = wproj_ref[...]
    if mxu_dtype is not None:
        ctx, wproj = ctx.astype(mxu_dtype), wproj.astype(mxu_dtype)
    out2d = jnp.zeros((wb * n, dim), jnp.float32)
    for h in range(num_heads):
        out2d = out2d + jnp.dot(ctx[h], wproj[h * hd:(h + 1) * hd, :],
                                preferred_element_type=jnp.float32)
    out2d = out2d + bproj_ref[...]
    o_ref[...] = out2d.reshape(wb, n, dim).astype(o_ref.dtype)


def _pick_window_block(num_windows, n, dim, num_heads,
                       budget_bytes=16 * 1024 * 1024):
    """Largest divisor of num_windows whose per-step working set fits the VMEM
    budget, preferring >=4 (else >=2) grid steps so both v7x TensorCores get
    work, and wb*N a multiple of 256 (full MXU row tiles on v6e/v7x)."""
    per_win = 4 * (13 * n * dim) + 12 * num_heads * n * n
    cap = max(1, budget_bytes // per_win)
    divs = [d for d in range(1, num_windows + 1) if num_windows % d == 0]
    fits = [d for d in divs if d <= cap] or [1]
    for min_steps in (4, 2, 1):
        cands = [d for d in fits if num_windows // d >= min_steps]
        if cands:
            pref = [d for d in cands if (d * n) % 256 == 0]
            return max(pref) if pref else max(cands)
    return 1


def _attention_vmem_limit(wb, n, dim, num_heads):
    per_win = 4 * (13 * n * dim) + 12 * num_heads * n * n
    resident = 4 * (3 * dim * dim + 3 * dim + dim * dim + dim
                    + num_heads * n * n)
    need = 2 * wb * per_win + resident         # double-buffered blocks + temps
    return int(min(64 * 2 ** 20, max(32 * 2 ** 20, need)))


# ----------------------------------------------------------------------------
# Wrapper: Att.forward (use_attn=True, conv_type=None)
# ----------------------------------------------------------------------------
def att_forward_pallas(x, params, bias, *, dim, num_heads, window_size,
                       shift_size, mxu_dtype=None):
    B, C, H, W = x.shape
    ws = window_size

    # check_size (reflect pad).  The 1x1 V/QK convs are per-pixel, so padding X
    # first is exactly equivalent to padding QKV (as PyTorch does).
    mod_pad_h = (ws - H % ws) % ws
    mod_pad_w = (ws - W % ws) % ws
    if shift_size > 0:
        pad_h = (shift_size, (ws - shift_size + mod_pad_h) % ws)
        pad_w = (shift_size, (ws - shift_size + mod_pad_w) % ws)
    else:
        pad_h = (0, mod_pad_h)
        pad_w = (0, mod_pad_w)
    if any(pad_h) or any(pad_w):
        x = jnp.pad(x, ((0, 0), (0, 0), pad_h, pad_w), mode="reflect")
    Ht, Wt = x.shape[2], x.shape[3]
    nWh, nWw = Ht // ws, Wt // ws
    N = ws * ws
    num_windows = B * nWh * nWw

    # window partition: NCHW -> (num_windows, N, C)
    xw = jnp.transpose(x, (0, 2, 3, 1)).reshape(B, nWh, ws, nWw, ws, C)
    xw = jnp.transpose(xw, (0, 1, 3, 2, 4, 5)).reshape(num_windows, N, C)

    wb = _pick_window_block(num_windows, N, dim, num_heads)
    grid = (num_windows // wb,)
    hd = dim // num_heads
    scale = hd ** (-0.5)

    M = num_windows * N
    flops = int(2 * M * dim * 3 * dim                        # fused QKV conv
                + 4 * num_windows * num_heads * N * N * hd   # QK^T and PV
                + 2 * M * dim * dim)                         # output proj
    bytes_accessed = int(4 * (2 * M * dim + dim * 3 * dim + 3 * dim
                              + num_heads * N * N + dim * dim + dim))
    cost = pl.CostEstimate(flops=flops,
                           transcendentals=int(num_windows * num_heads * N * N),
                           bytes_accessed=bytes_accessed)

    kernel = functools.partial(_window_attention_kernel, num_heads=num_heads,
                               scale=scale, mxu_dtype=mxu_dtype)

    out_w = pl.pallas_call(
        kernel,
        out_shape=jax.ShapeDtypeStruct((num_windows, N, dim), x.dtype),
        grid_spec=pltpu.PrefetchScalarGridSpec(
            num_scalar_prefetch=0,
            grid=grid,
            in_specs=[
                pl.BlockSpec((wb, N, dim), lambda i: (i, 0, 0)),
                pl.BlockSpec((dim, 3 * dim), lambda i: (0, 0)),
                pl.BlockSpec((1, 3 * dim), lambda i: (0, 0)),
                pl.BlockSpec((num_heads, N, N), lambda i: (0, 0, 0)),
                pl.BlockSpec((dim, dim), lambda i: (0, 0)),
                pl.BlockSpec((1, dim), lambda i: (0, 0)),
            ],
            out_specs=pl.BlockSpec((wb, N, dim), lambda i: (i, 0, 0)),
        ),
        compiler_params=pltpu.CompilerParams(
            dimension_semantics=("parallel",),
            vmem_limit_bytes=_attention_vmem_limit(wb, N, dim, num_heads)),
        cost_estimate=cost,
    )(xw, params["w_qkv"], params["b_qkv"].reshape(1, 3 * dim), bias,
      params["w_proj"], params["b_proj"].reshape(1, dim))

    # window reverse + crop + back to NCHW (output projection already fused)
    out = out_w.reshape(B, nWh, nWw, ws, ws, dim)
    out = jnp.transpose(out, (0, 1, 3, 2, 4, 5)).reshape(B, Ht, Wt, dim)
    out = out[:, shift_size:shift_size + H, shift_size:shift_size + W, :]
    return jnp.transpose(out, (0, 3, 1, 2))


# ----------------------------------------------------------------------------
# Parameter init (matches Att._init_weights / torch defaults in spirit)
# ----------------------------------------------------------------------------
def _trunc_normal(key, shape, std):
    return std * jax.random.truncated_normal(key, -2.0, 2.0, shape, jnp.float32)


def init_att_params(key, network_depth, dim, num_heads, meta_hidden=256):
    gain = (8 * network_depth) ** (-0.25)
    k = jax.random.split(key, 7)

    std_qk = math.sqrt(2.0 / float(dim + 2 * dim))
    w_qk = _trunc_normal(k[0], (dim, 2 * dim), std_qk)       # (in, out)
    std_v = gain * math.sqrt(2.0 / float(dim + dim))
    w_v = _trunc_normal(k[1], (dim, dim), std_v)
    w_qkv = jnp.concatenate([w_qk, w_v], axis=1)             # QKV = cat([QK, V])
    b_qkv = jnp.zeros((3 * dim,), jnp.float32)

    std_p = gain * math.sqrt(2.0 / float(dim + dim))
    w_proj = _trunc_normal(k[2], (dim, dim), std_p)
    b_proj = jnp.zeros((dim,), jnp.float32)

    lim1 = 1.0 / math.sqrt(2.0)
    meta_w1 = jax.random.uniform(k[3], (meta_hidden, 2), jnp.float32, -lim1, lim1)
    meta_b1 = jax.random.uniform(k[4], (meta_hidden,), jnp.float32, -lim1, lim1)
    lim2 = 1.0 / math.sqrt(float(meta_hidden))
    meta_w2 = jax.random.uniform(k[5], (num_heads, meta_hidden), jnp.float32, -lim2, lim2)
    meta_b2 = jax.random.uniform(k[6], (num_heads,), jnp.float32, -lim2, lim2)

    return {"w_qkv": w_qkv, "b_qkv": b_qkv, "w_proj": w_proj, "b_proj": b_proj,
            "meta_w1": meta_w1, "meta_b1": meta_b1,
            "meta_w2": meta_w2, "meta_b2": meta_b2}


# ----------------------------------------------------------------------------
# Plain-JAX reference (mirrors the PyTorch forward step-by-step)
# ----------------------------------------------------------------------------
def att_reference(x, params, *, dim, num_heads, window_size, shift_size):
    PH = jax.lax.Precision.HIGHEST
    B, C, H, W = x.shape
    ws = window_size
    head_dim = dim // num_heads
    scale = head_dim ** (-0.5)

    xq = jnp.transpose(x, (0, 2, 3, 1))                       # NHWC
    qkv = jnp.einsum("bhwc,ce->bhwe", xq, params["w_qkv"],
                     precision=PH) + params["b_qkv"]

    mod_pad_h = (ws - H % ws) % ws
    mod_pad_w = (ws - W % ws) % ws
    if shift_size > 0:
        pad_h = (shift_size, (ws - shift_size + mod_pad_h) % ws)
        pad_w = (shift_size, (ws - shift_size + mod_pad_w) % ws)
    else:
        pad_h = (0, mod_pad_h)
        pad_w = (0, mod_pad_w)
    if any(pad_h) or any(pad_w):
        qkv = jnp.pad(qkv, ((0, 0), pad_h, pad_w, (0, 0)), mode="reflect")
    Ht, Wt = qkv.shape[1], qkv.shape[2]
    nWh, nWw = Ht // ws, Wt // ws
    N = ws * ws
    B_ = B * nWh * nWw

    win = qkv.reshape(B, nWh, ws, nWw, ws, 3 * dim)
    win = jnp.transpose(win, (0, 1, 3, 2, 4, 5)).reshape(B_, N, 3 * dim)

    qkv5 = jnp.transpose(win.reshape(B_, N, 3, num_heads, head_dim), (2, 0, 3, 1, 4))
    q, k, v = qkv5[0] * scale, qkv5[1], qkv5[2]               # (B_, nh, N, hd)

    coords = jnp.stack(jnp.meshgrid(jnp.arange(ws), jnp.arange(ws), indexing="ij"))
    cf = coords.reshape(2, N).astype(jnp.float32)
    rel = jnp.transpose(cf[:, :, None] - cf[:, None, :], (1, 2, 0))   # (N, N, 2)
    rel_log = jnp.sign(rel) * jnp.log1p(jnp.abs(rel))
    hid = jnp.maximum(jnp.einsum("nmk,hk->nmh", rel_log, params["meta_w1"],
                                 precision=PH) + params["meta_b1"], 0.0)
    bias = jnp.einsum("nmh,oh->nmo", hid, params["meta_w2"],
                      precision=PH) + params["meta_b2"]
    bias = jnp.transpose(bias, (2, 0, 1))                     # (nh, N, N)

    attn = jnp.einsum("bhnd,bhmd->bhnm", q, k, precision=PH) + bias[None]
    attn = jax.nn.softmax(attn, axis=-1)
    ctx = jnp.einsum("bhnm,bhmd->bhnd", attn, v, precision=PH)
    ctx = jnp.transpose(ctx, (0, 2, 1, 3)).reshape(B_, N, dim)

    out = ctx.reshape(B, nWh, nWw, ws, ws, dim)
    out = jnp.transpose(out, (0, 1, 3, 2, 4, 5)).reshape(B, Ht, Wt, dim)
    out = out[:, shift_size:shift_size + H, shift_size:shift_size + W, :]
    out = jnp.einsum("bhwc,cd->bhwd", out, params["w_proj"],
                     precision=PH) + params["b_proj"]
    return jnp.transpose(out, (0, 3, 1, 2))


if __name__ == "__main__":
    network_depth = 4
    dim = 8
    num_heads = 2
    window_size = 8
    shift_size = 0
    B, H, W = 2, 32, 30          # W=30 exercises the reflect mod-padding path

    key = jax.random.PRNGKey(0)
    kx, kp = jax.random.split(key)
    x = jax.random.normal(kx, (B, dim, H, W), jnp.float32)
    params = init_att_params(kp, network_depth, dim, num_heads)

    # Relative-position bias depends only on window_size + meta weights:
    # computed ONCE per layer (hoisted out of the per-step forward path).
    bias = jax.block_until_ready(
        jax.jit(relative_position_bias_pallas, static_argnums=(0,))(
            window_size, params["meta_w1"], params["meta_b1"],
            params["meta_w2"], params["meta_b2"]))

    fwd = jax.jit(functools.partial(att_forward_pallas, dim=dim,
                                    num_heads=num_heads,
                                    window_size=window_size,
                                    shift_size=shift_size))
    y = jax.block_until_ready(fwd(x, params, bias))

    ref = jax.block_until_ready(
        att_reference(x, params, dim=dim, num_heads=num_heads,
                      window_size=window_size, shift_size=shift_size))

    assert y.shape == (B, dim, H, W), y.shape
    err = float(jnp.max(jnp.abs(y - ref)))
    assert jnp.allclose(y, ref, atol=5e-3, rtol=5e-3), err

    # bf16-MXU-operand fast path (v6e/v7x); accumulation stays f32, so only a
    # looser tolerance is needed (per review guidance).
    fwd_bf16 = jax.jit(functools.partial(att_forward_pallas, dim=dim,
                                         num_heads=num_heads,
                                         window_size=window_size,
                                         shift_size=shift_size,
                                         mxu_dtype=jnp.bfloat16))
    y16 = jax.block_until_ready(fwd_bf16(x, params, bias))
    err16 = float(jnp.max(jnp.abs(y16 - ref)))
    assert jnp.allclose(y16, ref, atol=5e-2, rtol=5e-2), err16

    print("KERNEL_OK")
</pallas_src>

<mosaic_0001>
module attributes {stable_mosaic.version = 11 : i64} {
  func.func @_meta_mlp_kernel(%arg0: i32, %arg1: memref<2x2048xf32, #tpu.memory_space<vmem>>, %arg2: memref<256x2xf32, #tpu.memory_space<vmem>>, %arg3: memref<256x1xf32, #tpu.memory_space<vmem>>, %arg4: memref<2x256xf32, #tpu.memory_space<vmem>>, %arg5: memref<2x1xf32, #tpu.memory_space<vmem>>, %arg6: memref<2x2048xf32, #tpu.memory_space<vmem>>) attributes {dimension_semantics = [#tpu.dimension_semantics<parallel>], iteration_bounds = array<i64: 2>, scalar_prefetch = 0 : i64, scratch_operands = 0 : i64, tpu.core_type = #tpu.core_type<tc>, window_params = [{transform_indices = @transform_0, window_bounds = array<i64: 2, 2048>}, {pipeline_mode = #tpu.pipeline_mode<synchronous>, transform_indices = @transform_1, window_bounds = array<i64: 256, 2>}, {pipeline_mode = #tpu.pipeline_mode<synchronous>, transform_indices = @transform_2, window_bounds = array<i64: 256, 1>}, {pipeline_mode = #tpu.pipeline_mode<synchronous>, transform_indices = @transform_3, window_bounds = array<i64: 2, 256>}, {pipeline_mode = #tpu.pipeline_mode<synchronous>, transform_indices = @transform_4, window_bounds = array<i64: 2, 1>}, {transform_indices = @transform_5, window_bounds = array<i64: 2, 2048>}]} {
    %c0 = arith.constant 0 : index
    %c0_0 = arith.constant 0 : index
    %0 = vector.load %arg2[%c0, %c0_0] : memref<256x2xf32, #tpu.memory_space<vmem>>, vector<256x2xf32>
    %c0_1 = arith.constant 0 : index
    %c0_2 = arith.constant 0 : index
    %1 = vector.load %arg1[%c0_1, %c0_2] : memref<2x2048xf32, #tpu.memory_space<vmem>>, vector<2x2048xf32>
    %cst = arith.constant dense<0.000000e+00> : vector<256x2048xf32>
    %2 = tpu.matmul %0, %1, %cst {dimension_numbers = #tpu.dot_dimension_numbers<[1], [0], [0], [1], [0, 0, 1, 1], [], []>} : vector<256x2xf32>, vector<2x2048xf32>, vector<256x2048xf32> -> vector<256x2048xf32>
    %c0_3 = arith.constant 0 : index
    %c0_4 = arith.constant 0 : index
    %3 = vector.load %arg3[%c0_3, %c0_4] : memref<256x1xf32, #tpu.memory_space<vmem>>, vector<256x1xf32>
    %4 = vector.broadcast %3 : vector<256x1xf32> to vector<256x2048xf32>
    %5 = arith.addf %2, %4 : vector<256x2048xf32>
    %cst_5 = arith.constant 0.000000e+00 : f32
    %6 = vector.broadcast %cst_5 : f32 to vector<256x2048xf32>
    %7 = arith.maximumf %5, %6 : vector<256x2048xf32>
    %c0_6 = arith.constant 0 : index
    %c0_7 = arith.constant 0 : index
    %8 = vector.load %arg4[%c0_6, %c0_7] : memref<2x256xf32, #tpu.memory_space<vmem>>, vector<2x256xf32>
    %cst_8 = arith.constant dense<0.000000e+00> : vector<2x2048xf32>
    %9 = tpu.matmul %8, %7, %cst_8 {dimension_numbers = #tpu.dot_dimension_numbers<[1], [0], [0], [1], [0, 0, 1, 1], [], []>} : vector<2x256xf32>, vector<256x2048xf32>, vector<2x2048xf32> -> vector<2x2048xf32>
    %c0_9 = arith.constant 0 : index
    %c0_10 = arith.constant 0 : index
    %10 = vector.load %arg5[%c0_9, %c0_10] : memref<2x1xf32, #tpu.memory_space<vmem>>, vector<2x1xf32>
    %11 = vector.broadcast %10 : vector<2x1xf32> to vector<2x2048xf32>
    %12 = arith.addf %9, %11 : vector<2x2048xf32>
    %c0_11 = arith.constant 0 : index
    %c0_12 = arith.constant 0 : index
    %13 = vector.load %arg6[%c0_11, %c0_12] : memref<2x2048xf32, #tpu.memory_space<vmem>>, vector<2x2048xf32>
    tpu.vector_store %arg6[%c0_11, %c0_12], %12 {strides = array<i32>} : memref<2x2048xf32, #tpu.memory_space<vmem>>, vector<2x2048xf32>,
    return
  }
  func.func @transform_0(%arg0: i32) -> (i32, i32) {
    %c0_i32 = arith.constant 0 : i32
    %c0_i32_0 = arith.constant 0 : i32
    return %c0_i32, %arg0 : i32, i32
  }
  func.func @transform_1(%arg0: i32) -> (i32, i32) {
    %c0_i32 = arith.constant 0 : i32
    %c0_i32_0 = arith.constant 0 : i32
    %c0_i32_1 = arith.constant 0 : i32
    return %c0_i32, %c0_i32_0 : i32, i32
  }
  func.func @transform_2(%arg0: i32) -> (i32, i32) {
    %c0_i32 = arith.constant 0 : i32
    %c0_i32_0 = arith.constant 0 : i32
    %c0_i32_1 = arith.constant 0 : i32
    return %c0_i32, %c0_i32_0 : i32, i32
  }
  func.func @transform_3(%arg0: i32) -> (i32, i32) {
    %c0_i32 = arith.constant 0 : i32
    %c0_i32_0 = arith.constant 0 : i32
    %c0_i32_1 = arith.constant 0 : i32
    return %c0_i32, %c0_i32_0 : i32, i32
  }
  func.func @transform_4(%arg0: i32) -> (i32, i32) {
    %c0_i32 = arith.constant 0 : i32
    %c0_i32_0 = arith.constant 0 : i32
    %c0_i32_1 = arith.constant 0 : i32
    return %c0_i32, %c0_i32_0 : i32, i32
  }
  func.func @transform_5(%arg0: i32) -> (i32, i32) {
    %c0_i32 = arith.constant 0 : i32
    %c0_i32_0 = arith.constant 0 : i32
    return %c0_i32, %arg0 : i32, i32
  }
}

</mosaic_0001>

<bundles_post_ra>
// kernel: relative_position_bias_pallas.1
= control target key start
LH: loop header
LB: loop body
LE: loop exit
PB: predicated region body
PF: predicated region fallthrough
CT: control target
= control target key end

     0   :  { %s4879_s18 = smov 0   ;;  %s7326_s0 = inlined_call_operand.vmem [shape: f32[2,4096], index: 0, kind: input, shape index: {}]   ;;  %s7327_s1 = inlined_call_operand.vmem [shape: f32[256,2], index: 1, kind: input, shape index: {}]   ;;  %s7328_s2 = inlined_call_operand.vmem [shape: f32[256,1], index: 2, kind: input, shape index: {}]   ;;  %s7329_s3 = inlined_call_operand.vmem [shape: f32[2,256], index: 3, kind: input, shape index: {}]   ;;  %s7330_s4 = inlined_call_operand.vmem [shape: f32[2,1], index: 4, kind: input, shape index: {}]   ;;  %s7331_s5 = inlined_call_operand.vmem [shape: f32[2,4096], index: 5, kind: output, shape index: {}]  }
   0x1 LB: > { %s3960_s19 = sadd.s32 4294967295, %s4844_s18   ;;  %p3964_p0 = scmp.ge.s32.totalorder %s4844_s18, 1  ;;  %s4844_s18 = sphi %s4879_s18, %s15_s18  }
   0x2   : > { %p188_p1 = scmp.lt.s32.totalorder %s4844_s18, 3 }
   0x4   : > { %p189_p2 = pnand %p3964_p0, %p188_p1 }
   0x6   : > { %192 = sbr.rel (%p189_p2) target bundleno = 981 (0x3d5), region = 40 }
   0xd   : > { %s3965_s20 = sshll.u32 %s3960_s19, 4  ;;  %v464_v0 = vlaneseq  ;;  %v4846_v1 = vmov 1983009808   ;;  %v4847_v3 = vmov 0.0   ;;  %v4848_v5 = vmov 0   ;;  %v264_v14 = vld [vmem:[%s7328_s2] sm:$0xff] }
   0xe   : > { %p217_p3 = scmp.lt.s32.totalorder %s3965_s20, 31  ;;  %v462_v2 = vunpack.c.l.s4 %v4846_v1  ;;  %722 = vmatprep.mubr.f32.mxu0 %v4847_v3  ;;  %979 = vmatprep.mubr.f32.mxu1 %v4847_v3  ;;  %vm625_vm0 = vcmask 1041408   ;;  %v266_v15 = vld [vmem:[%s7328_s2 + $0x10] sm:$0xff]  ;;  %v265_v19 = vld [vmem:[%s7328_s2 + $0x8] sm:$0xff]  ;;  %v4919_v20 = vld [vmem:[%s7327_s1] sm:$0xff]  ;;  %vm528_vm1 = vcmask 15360  }
   0xf   : > { %v465_v4 = vshrl.u32 %v464_v0, 7  ;;  %4767 = vset.pattern.permute.xlu0 %v4848_v5  ;;  %4768 = vset.pattern.permute.xlu1 %v4848_v5  ;;  %v4931_v24 = vld [vmem:[%s7327_s1 + $0x8] sm:$0xff]  ;;  %v267_v26 = vld [vmem:[%s7328_s2 + $0x18] sm:$0xff]  ;;  %v268_v29 = vld [vmem:[%s7328_s2 + $0x20] sm:$0xff] }
  0x10   : > { %s7683_s20 = smov (!%p217_p3, %s3965_s20), 31  ;;  %v463_v6 = vunpack.c.0.s8 %v462_v2  ;;  %298 = vperm.xlu0 %4767, %v264_v14   ;;  %308 = vperm.xlu1 %4768, %v266_v15   ;;  %v4956_v30 = vld [vmem:[%s7327_s1 + $0x10] sm:$0xff]  ;;  %v269_v33 = vld [vmem:[%s7328_s2 + $0x28] sm:$0xff]  ;;  %v4981_v36 = vld [vmem:[%s7327_s1 + $0x18] sm:$0xff] }
  0x11   : > { %s3966_s21 = sshll.u32 %s7683_s20, 1  ;;  %v270_v35 = vld [vmem:[%s7328_s2 + $0x30] sm:$0xff]  ;;  %v271_v37 = vld [vmem:[%s7328_s2 + $0x38] sm:$0xff]  ;;  %v272_v38 = vld [vmem:[%s7328_s2 + $0x40] sm:$0xff] }
  0x12   : > { %v4892_v7 = vsub.s32 %v463_v6, %v465_v4  ;;  %s4899_s24 = scalar_lea.vmem %s7326_s0, %s3966_s21  ;;  %v4999_v39 = vld [vmem:[%s7327_s1 + $0x20] sm:$0xff]  ;;  %v273_v40 = vld [vmem:[%s7328_s2 + $0x48] sm:$0xff]  ;;  %v274_v41 = vld [vmem:[%s7328_s2 + $0x50] sm:$0xff]  ;;  %s7298_s30 = scalar_lea.vmem %s7331_s5, %s3966_s21 }
  0x13   : > { %v260_v8 = vld [vmem:[%s4899_s24] sm:$0xff]  ;;  %v261_v9 = vld [vmem:[%s4899_s24 + $0x8] sm:$0xff]  ;;  %v262_v25 = vld [vmem:[%s4899_s24 + $0x10] sm:$0xff] }
  0x14   : > { %7419 = vst [vmem:[#allocation2_spill] sm:$0xff] %v4892_v7  ;;  %v467_v10 = vrot.slane %v260_v8, %v4892_v7  ;;  %v460_v11 = vcombine.high %v260_v8, %v260_v8  ;;  %v484_v12 = vrot.slane %v261_v9, %v4892_v7  ;;  %v477_v13 = vcombine.high %v261_v9, %v261_v9  ;;  %v5016_v42 = vld [vmem:[%s7327_s1 + $0x28] sm:$0xff]  ;;  %v275_v43 = vld [vmem:[%s7328_s2 + $0x58] sm:$0xff]  ;;  %v276_v44 = vld [vmem:[%s7328_s2 + $0x60] sm:$0xff] }
  0x15   : > { %303 = vperm.xlu0 %4767, %v265_v19   ;;  %v4943_v27 = vrot.slane %v262_v25, %v4892_v7  ;;  %v494_v28 = vcombine.high %v262_v25, %v262_v25  ;;  %313 = vperm.xlu1 %4768, %v267_v26   ;;  %v5033_v45 = vld [vmem:[%s7327_s1 + $0x30] sm:$0xff]  ;;  %v277_v46 = vld [vmem:[%s7328_s2 + $0x68] sm:$0xff]  ;;  %v5050_v48 = vld [vmem:[%s7327_s1 + $0x38] sm:$0xff] }
  0x16   : > { %v475_v16 = vcombine.high %v467_v10, %v467_v10  ;;  %v474_v17 = vrot.slane %v460_v11, %v4892_v7  ;;  %v491_v18 = vrot.slane %v477_v13, %v4892_v7  ;;  %v492_v21 = vcombine.high %v484_v12, %v484_v12  ;;  %v278_v47 = vld [vmem:[%s7328_s2 + $0x70] sm:$0xff]  ;;  %v279_v49 = vld [vmem:[%s7328_s2 + $0x78] sm:$0xff]  ;;  %v280_v50 = vld [vmem:[%s7328_s2 + $0x80] sm:$0xff] }
  0x17   : > { %v509_v31 = vcombine.high %v4943_v27, %v4943_v27  ;;  %v4961_v32 = vrot.slane %v494_v28, %v4892_v7  ;;  %v5067_v51 = vld [vmem:[%s7327_s1 + $0x40] sm:$0xff]  ;;  %v281_v52 = vld [vmem:[%s7328_s2 + $0x88] sm:$0xff]  ;;  %v282_v53 = vld [vmem:[%s7328_s2 + $0x90] sm:$0xff] }
  0x18   : > { %3969 = vmatprep.subr.msk.mxu0 %vm625_vm0, %v475_v16  ;;  %v476_v22 = vcombine.high %v474_v17, %v474_v17  ;;  %v493_v23 = vcombine.high %v491_v18, %v491_v18  ;;  %v5084_v54 = vld [vmem:[%s7327_s1 + $0x48] sm:$0xff]  ;;  %v283_v55 = vld [vmem:[%s7328_s2 + $0x98] sm:$0xff]  ;;  %v5098_v56 = vld [vmem:[%s7327_s1 + $0x50] sm:$0xff] }
  0x19   : > { %3970 = vmatpush1.msk.msra.mxu0 %vm625_vm0, %v467_v10  ;;  %318 = vperm.xlu0 %4767, %v268_v29   ;;  %v510_v34 = vcombine.high %v4961_v32, %v4961_v32  ;;  %v284_v57 = vld [vmem:[%s7328_s2 + $0xa0] sm:$0xff]  ;;  %v285_v58 = vld [vmem:[%s7328_s2 + $0xa8] sm:$0xff]  ;;  %v5115_v59 = vld [vmem:[%s7327_s1 + $0x58] sm:$0xff] }
  0x1a   : > { %3971 = vmatmul.mubr.msk.f32.vlgmr.msra.gmra.mrb[0].mxu0 %vm528_vm1, %v4919_v20  ;;  %4003 = vmatprep.subr.msk.mxu1 %vm625_vm0, %v476_v22  ;;  %v5126_v60 = vld [vmem:[%s7327_s1 + $0x60] sm:$0xff]  ;;  %v286_v61 = vld [vmem:[%s7328_s2 + $0xb0] sm:$0xff]  ;;  %v287_v62 = vld [vmem:[%s7328_s2 + $0xb8] sm:$0xff] }
  0x1b   : > { %4004 = vmatpush1.msk.msra.mxu1 %vm625_vm0, %v474_v17  ;;  %4037 = vmatprep.subr.msk.mxu0 %vm625_vm0, %v492_v21  ;;  %v5143_v63 = vld [vmem:[%s7327_s1 + $0x68] sm:$0xff]  ;;  %v5154_v0 = vld [vmem:[%s7327_s1 + $0x70] sm:$0xff]  ;;  %v288_v1 = vld [vmem:[%s7328_s2 + $0xc0] sm:$0xff] }
  0x1c   : > { %4005 = vmatmul.mubr.msk.f32.vlgmr.msra.gmra.mrb[0].mxu1 %vm528_vm1, %v4919_v20  ;;  %4071 = vmatprep.subr.msk.mxu1 %vm625_vm0, %v493_v23  ;;  %v289_v2 = vld [vmem:[%s7328_s2 + $0xc8] sm:$0xff]  ;;  %v5171_v4 = vld [vmem:[%s7327_s1 + $0x78] sm:$0xff]  ;;  %v5182_v5 = vld [vmem:[%s7327_s1 + $0x80] sm:$0xff] }
  0x1d   : > { %728 = vmatprep.mubr.f32.mxu0 %v4847_v3  ;;  %4038 = vmatpush1.msk.msra.mxu0 %vm625_vm0, %v484_v12  ;;  %v290_v6 = vld [vmem:[%s7328_s2 + $0xd0] sm:$0xff]  ;;  %v291_v8 = vld [vmem:[%s7328_s2 + $0xd8] sm:$0xff]  ;;  %v5199_v9 = vld [vmem:[%s7327_s1 + $0x88] sm:$0xff] }
  0x1e   : > { %4072 = vmatpush1.msk.msra.mxu1 %vm625_vm0, %v491_v18  ;;  %3972 = vmatmul.mubr.msk.f32.gmra.mrb[2].mxu0 %vm528_vm1, %v4931_v24  ;;  %v5210_v10 = vld [vmem:[%s7327_s1 + $0x90] sm:$0xff]  ;;  %v292_v11 = vld [vmem:[%s7328_s2 + $0xe0] sm:$0xff]  ;;  %v293_v12 = vld [vmem:[%s7328_s2 + $0xe8] sm:$0xff] }
  0x1f   : > { %985 = vmatprep.mubr.f32.mxu1 %v4847_v3  ;;  %734 = vmatprep.mubr.f32.mxu0 %v4847_v3  ;;  %v5227_v13 = vld [vmem:[%s7327_s1 + $0x98] sm:$0xff]  ;;  %v5238_v14 = vld [vmem:[%s7327_s1 + $0xa0] sm:$0xff]  ;;  %v294_v15 = vld [vmem:[%s7328_s2 + $0xf0] sm:$0xff] }
  0x20   : > { %4006 = vmatmul.mubr.msk.f32.gmra.mrb[2].mxu1 %vm528_vm1, %v4931_v24  ;;  %4105 = vmatprep.subr.msk.mxu0 %vm625_vm0, %v509_v31  ;;  %v295_v16 = vld [vmem:[%s7328_s2 + $0xf8] sm:$0xff]  ;;  %v5255_v17 = vld [vmem:[%s7327_s1 + $0xa8] sm:$0xff]  ;;  %v5266_v18 = vld [vmem:[%s7327_s1 + $0xb0] sm:$0xff] }
  0x21   : > { %991 = vmatprep.mubr.f32.mxu1 %v4847_v3  ;;  %4139 = vmatprep.subr.msk.mxu1 %vm625_vm0, %v510_v34  ;;  %v5277_v19 = vld [vmem:[%s7327_s1 + $0xb8] sm:$0xff]  ;;  %v5288_v21 = vld [vmem:[%s7327_s1 + $0xc0] sm:$0xff]  ;;  %v5299_v22 = vld [vmem:[%s7327_s1 + $0xc8] sm:$0xff] }
  0x22   : > { %3973 = vmatmul.mubr.msk.f32.gmra.mrb[4].mxu0 %vm528_vm1, %v4956_v30  ;;  %323 = vperm.xlu1 %4768, %v269_v33   ;;  %v5310_v23 = vld [vmem:[%s7327_s1 + $0xd0] sm:$0xff]  ;;  %v5321_v25 = vld [vmem:[%s7327_s1 + $0xd8] sm:$0xff]  ;;  %v5332_v26 = vld [vmem:[%s7327_s1 + $0xe0] sm:$0xff] }
  0x23   : > { %740 = vmatprep.mubr.f32.mxu0 %v4847_v3  ;;  %328 = vperm.xlu0 %4767, %v270_v35   ;;  %v5343_v28 = vld [vmem:[%s7327_s1 + $0xe8] sm:$0xff]  ;;  %v5354_v29 = vld [vmem:[%s7327_s1 + $0xf0] sm:$0xff]  ;;  %v5365_v31 = vld [vmem:[%s7327_s1 + $0xf8] sm:$0xff] }
  0x24   : > { %4007 = vmatmul.mubr.msk.f32.gmra.mrb[4].mxu1 %vm528_vm1, %v4956_v30  ;;  %v263_v33 = vld [vmem:[%s4899_s24 + $0x18] sm:$0xff] }
  0x25   : > { %997 = vmatprep.mubr.f32.mxu1 %v4847_v3  ;;  %v5372_v34 = vrot.slane %v263_v33, %v4892_v7  ;;  %v511_v35 = vcombine.high %v263_v33, %v263_v33 }
  0x26   : > { %3974 = vmatmul.mubr.msk.f32.gmra.mrb[6].mxu0 %vm528_vm1, %v4981_v36  ;;  %333 = vperm.xlu1 %4768, %v271_v37  }
  0x27   : > { %746 = vmatprep.mubr.f32.mxu0 %v4847_v3  ;;  %338 = vperm.xlu0 %4767, %v272_v38   ;;  %v526_v37 = vcombine.high %v5372_v34, %v5372_v34  ;;  %v5382_v38 = vrot.slane %v511_v35, %v4892_v7 }
  0x28   : > { %4008 = vmatmul.mubr.msk.f32.gmra.mrb[6].mxu1 %vm528_vm1, %v4981_v36 }
  0x29   : > { %1003 = vmatprep.mubr.f32.mxu1 %v4847_v3 }
  0x2a   : > { %3975 = vmatmul.mubr.msk.f32.gmra.mrb[8].mxu0 %vm528_vm1, %v4999_v39  ;;  %343 = vperm.xlu1 %4768, %v273_v40   ;;  %v527_v40 = vcombine.high %v5382_v38, %v5382_v38 }
  0x2b   : > { %752 = vmatprep.mubr.f32.mxu0 %v4847_v3  ;;  %348 = vperm.xlu0 %4767, %v274_v41  }
  0x2c   : > { %4009 = vmatmul.mubr.msk.f32.gmra.mrb[8].mxu1 %vm528_vm1, %v4999_v39 }
  0x2d   : > { %1009 = vmatprep.mubr.f32.mxu1 %v4847_v3 }
  0x2e   : > { %3976 = vmatmul.mubr.msk.f32.gmra.mrb[10].mxu0 %vm528_vm1, %v5016_v42  ;;  %353 = vperm.xlu1 %4768, %v275_v43  }
  0x2f   : > { %758 = vmatprep.mubr.f32.mxu0 %v4847_v3  ;;  %358 = vperm.xlu0 %4767, %v276_v44  }
  0x30   : > { %4010 = vmatmul.mubr.msk.f32.gmra.mrb[10].mxu1 %vm528_vm1, %v5016_v42 }
  0x31   : > { %1015 = vmatprep.mubr.f32.mxu1 %v4847_v3 }
  0x32   : > { %3977 = vmatmul.mubr.msk.f32.gmra.mrb[12].mxu0 %vm528_vm1, %v5033_v45  ;;  %363 = vperm.xlu1 %4768, %v277_v46  }
  0x33   : > { %764 = vmatprep.mubr.f32.mxu0 %v4847_v3  ;;  %368 = vperm.xlu0 %4767, %v278_v47  }
  0x34   : > { %4011 = vmatmul.mubr.msk.f32.gmra.mrb[12].mxu1 %vm528_vm1, %v5033_v45 }
  0x35   : > { %1021 = vmatprep.mubr.f32.mxu1 %v4847_v3 }
  0x36   : > { %3978 = vmatmul.mubr.msk.f32.gmra.mrb[14].mxu0 %vm528_vm1, %v5050_v48  ;;  %373 = vperm.xlu1 %4768, %v279_v49  }
  0x37   : > { %770 = vmatprep.mubr.f32.mxu0 %v4847_v3  ;;  %378 = vperm.xlu0 %4767, %v280_v50  }
  0x38   : > { %4012 = vmatmul.mubr.msk.f32.gmra.mrb[14].mxu1 %vm528_vm1, %v5050_v48 }
  0x39   : > { %1027 = vmatprep.mubr.f32.mxu1 %v4847_v3 }
  0x3a   : > { %3979 = vmatmul.mubr.msk.f32.gmra.mrb[16].mxu0 %vm528_vm1, %v5067_v51  ;;  %383 = vperm.xlu1 %4768, %v281_v52  }
  0x3b   : > { %776 = vmatprep.mubr.f32.mxu0 %v4847_v3  ;;  %388 = vperm.xlu0 %4767, %v282_v53  }
  0x3c   : > { %4013 = vmatmul.mubr.msk.f32.gmra.mrb[16].mxu1 %vm528_vm1, %v5067_v51 }
  0x3d   : > { %1033 = vmatprep.mubr.f32.mxu1 %v4847_v3 }
  0x3e   : > { %3980 = vmatmul.mubr.msk.f32.gmra.mrb[18].mxu0 %vm528_vm1, %v5084_v54  ;;  %393 = vperm.xlu1 %4768, %v283_v55  }
  0x3f   : > { %782 = vmatprep.mubr.f32.mxu0 %v4847_v3  ;;  %398 = vperm.xlu0 %4767, %v284_v57  }
  0x40   : > { %4014 = vmatmul.mubr.msk.f32.gmra.mrb[18].mxu1 %vm528_vm1, %v5084_v54 }
  0x41   : > { %1039 = vmatprep.mubr.f32.mxu1 %v4847_v3 }
  0x42   : > { %3981 = vmatmul.mubr.msk.f32.gmra.mrb[20].mxu0 %vm528_vm1, %v5098_v56  ;;  %403 = vperm.xlu1 %4768, %v285_v58  }
  0x43   : > { %788 = vmatprep.mubr.f32.mxu0 %v4847_v3  ;;  %408 = vperm.xlu0 %4767, %v286_v61  }
  0x44   : > { %4015 = vmatmul.mubr.msk.f32.gmra.mrb[20].mxu1 %vm528_vm1, %v5098_v56 }
  0x45   : > { %1045 = vmatprep.mubr.f32.mxu1 %v4847_v3 }
  0x46   : > { %3982 = vmatmul.mubr.msk.f32.gmra.mrb[22].mxu0 %vm528_vm1, %v5115_v59  ;;  %413 = vperm.xlu1 %4768, %v287_v62  }
  0x47   : > { %794 = vmatprep.mubr.f32.mxu0 %v4847_v3  ;;  %418 = vperm.xlu0 %4767, %v288_v1  }
  0x48   : > { %4016 = vmatmul.mubr.msk.f32.gmra.mrb[22].mxu1 %vm528_vm1, %v5115_v59 }
  0x49   : > { %1051 = vmatprep.mubr.f32.mxu1 %v4847_v3 }
  0x4a   : > { %3983 = vmatmul.mubr.msk.f32.gmra.mrb[24].mxu0 %vm528_vm1, %v5126_v60  ;;  %423 = vperm.xlu1 %4768, %v289_v2  }
  0x4b   : > { %800 = vmatprep.mubr.f32.mxu0 %v4847_v3  ;;  %428 = vperm.xlu0 %4767, %v290_v6  }
  0x4c   : > { %4017 = vmatmul.mubr.msk.f32.gmra.mrb[24].mxu1 %vm528_vm1, %v5126_v60 }
  0x4d   : > { %1057 = vmatprep.mubr.f32.mxu1 %v4847_v3 }
  0x4e   : > { %3984 = vmatmul.mubr.msk.f32.gmra.mrb[26].mxu0 %vm528_vm1, %v5143_v63  ;;  %433 = vperm.xlu1 %4768, %v291_v8  }
  0x4f   : > { %806 = vmatprep.mubr.f32.mxu0 %v4847_v3  ;;  %438 = vperm.xlu0 %4767, %v292_v11  }
  0x50   : > { %4018 = vmatmul.mubr.msk.f32.gmra.mrb[26].mxu1 %vm528_vm1, %v5143_v63 }
  0x51   : > { %1063 = vmatprep.mubr.f32.mxu1 %v4847_v3 }
  0x52   : > { %3985 = vmatmul.mubr.msk.f32.gmra.mrb[28].mxu0 %vm528_vm1, %v5154_v0  ;;  %443 = vperm.xlu1 %4768, %v293_v12  }
  0x53   : > { %812 = vmatprep.mubr.f32.mxu0 %v4847_v3  ;;  %448 = vperm.xlu0 %4767, %v294_v15  }
  0x54   : > { %4019 = vmatmul.mubr.msk.f32.gmra.mrb[28].mxu1 %vm528_vm1, %v5154_v0 }
  0x55   : > { %1069 = vmatprep.mubr.f32.mxu1 %v4847_v3 }
  0x56   : > { %3986 = vmatmul.mubr.msk.f32.gmra.mrb[30].mxu0 %vm528_vm1, %v5171_v4  ;;  %453 = vperm.xlu1 %4768, %v295_v16  }
  0x57   : > { %818 = vmatprep.mubr.f32.mxu0 %v4847_v3 }
  0x58   : > { %4020 = vmatmul.mubr.msk.f32.gmra.mrb[30].mxu1 %vm528_vm1, %v5171_v4 }
  0x59   : > { %1075 = vmatprep.mubr.f32.mxu1 %v4847_v3 }
  0x5a   : > { %3987 = vmatmul.mubr.msk.f32.gmra.mrb[32].mxu0 %vm528_vm1, %v5182_v5 }
  0x5b   : > { %824 = vmatprep.mubr.f32.mxu0 %v4847_v3 }
  0x5c   : > { %4021 = vmatmul.mubr.msk.f32.gmra.mrb[32].mxu1 %vm528_vm1, %v5182_v5 }
  0x5d   : > { %1081 = vmatprep.mubr.f32.mxu1 %v4847_v3 }
  0x5e   : > { %3988 = vmatmul.mubr.msk.f32.gmra.mrb[34].mxu0 %vm528_vm1, %v5199_v9 }
  0x5f   : > { %830 = vmatprep.mubr.f32.mxu0 %v4847_v3 }
  0x60   : > { %4022 = vmatmul.mubr.msk.f32.gmra.mrb[34].mxu1 %vm528_vm1, %v5199_v9 }
  0x61   : > { %1087 = vmatprep.mubr.f32.mxu1 %v4847_v3 }
  0x62   : > { %3989 = vmatmul.mubr.msk.f32.gmra.mrb[36].mxu0 %vm528_vm1, %v5210_v10 }
  0x63   : > { %836 = vmatprep.mubr.f32.mxu0 %v4847_v3 }
  0x64   : > { %4023 = vmatmul.mubr.msk.f32.gmra.mrb[36].mxu1 %vm528_vm1, %v5210_v10 }
  0x65   : > { %1093 = vmatprep.mubr.f32.mxu1 %v4847_v3 }
  0x66   : > { %3990 = vmatmul.mubr.msk.f32.gmra.mrb[38].mxu0 %vm528_vm1, %v5227_v13 }
  0x67   : > { %842 = vmatprep.mubr.f32.mxu0 %v4847_v3 }
  0x68   : > { %4024 = vmatmul.mubr.msk.f32.gmra.mrb[38].mxu1 %vm528_vm1, %v5227_v13 }
  0x69   : > { %1099 = vmatprep.mubr.f32.mxu1 %v4847_v3 }
  0x6a   : > { %3991 = vmatmul.mubr.msk.f32.gmra.mrb[40].mxu0 %vm528_vm1, %v5238_v14 }
  0x6b   : > { %848 = vmatprep.mubr.f32.mxu0 %v4847_v3 }
  0x6c   : > { %4025 = vmatmul.mubr.msk.f32.gmra.mrb[40].mxu1 %vm528_vm1, %v5238_v14 }
  0x6d   : > { %1105 = vmatprep.mubr.f32.mxu1 %v4847_v3 }
  0x6e   : > { %3992 = vmatmul.mubr.msk.f32.gmra.mrb[42].mxu0 %vm528_vm1, %v5255_v17 }
  0x6f   : > { %854 = vmatprep.mubr.f32.mxu0 %v4847_v3 }
  0x70   : > { %4026 = vmatmul.mubr.msk.f32.gmra.mrb[42].mxu1 %vm528_vm1, %v5255_v17 }
  0x71   : > { %1111 = vmatprep.mubr.f32.mxu1 %v4847_v3 }
  0x72   : > { %3993 = vmatmul.mubr.msk.f32.gmra.mrb[44].mxu0 %vm528_vm1, %v5266_v18 }
  0x73   : > { %860 = vmatprep.mubr.f32.mxu0 %v4847_v3 }
  0x74   : > { %4027 = vmatmul.mubr.msk.f32.gmra.mrb[44].mxu1 %vm528_vm1, %v5266_v18 }
  0x75   : > { %1117 = vmatprep.mubr.f32.mxu1 %v4847_v3 }
  0x76   : > { %3994 = vmatmul.mubr.msk.f32.gmra.mrb[46].mxu0 %vm528_vm1, %v5277_v19 }
  0x77   : > { %866 = vmatprep.mubr.f32.mxu0 %v4847_v3 }
  0x78   : > { %4028 = vmatmul.mubr.msk.f32.gmra.mrb[46].mxu1 %vm528_vm1, %v5277_v19 }
  0x79   : > { %1123 = vmatprep.mubr.f32.mxu1 %v4847_v3 }
  0x7a   : > { %3995 = vmatmul.mubr.msk.f32.gmra.mrb[48].mxu0 %vm528_vm1, %v5288_v21 }
  0x7b   : > { %872 = vmatprep.mubr.f32.mxu0 %v4847_v3 }
  0x7c   : > { %4029 = vmatmul.mubr.msk.f32.gmra.mrb[48].mxu1 %vm528_vm1, %v5288_v21 }
  0x7d   : > { %1129 = vmatprep.mubr.f32.mxu1 %v4847_v3 }
  0x7e   : > { %3996 = vmatmul.mubr.msk.f32.gmra.mrb[50].mxu0 %vm528_vm1, %v5299_v22 }
  0x7f   : > { %878 = vmatprep.mubr.f32.mxu0 %v4847_v3 }
  0x80   : > { %4030 = vmatmul.mubr.msk.f32.gmra.mrb[50].mxu1 %vm528_vm1, %v5299_v22 }
  0x81   : > { %1135 = vmatprep.mubr.f32.mxu1 %v4847_v3 }
  0x82   : > { %3997 = vmatmul.mubr.msk.f32.gmra.mrb[52].mxu0 %vm528_vm1, %v5310_v23 }
  0x83   : > { %884 = vmatprep.mubr.f32.mxu0 %v4847_v3 }
  0x84   : > { %4031 = vmatmul.mubr.msk.f32.gmra.mrb[52].mxu1 %vm528_vm1, %v5310_v23 }
  0x85   : > { %1141 = vmatprep.mubr.f32.mxu1 %v4847_v3 }
  0x86   : > { %3998 = vmatmul.mubr.msk.f32.gmra.mrb[54].mxu0 %vm528_vm1, %v5321_v25 }
  0x87   : > { %890 = vmatprep.mubr.f32.mxu0 %v4847_v3 }
  0x88   : > { %4032 = vmatmul.mubr.msk.f32.gmra.mrb[54].mxu1 %vm528_vm1, %v5321_v25 }
  0x89   : > { %1147 = vmatprep.mubr.f32.mxu1 %v4847_v3 }
  0x8a   : > { %3999 = vmatmul.mubr.msk.f32.gmra.mrb[56].mxu0 %vm528_vm1, %v5332_v26 }
  0x8b   : > { %896 = vmatprep.mubr.f32.mxu0 %v4847_v3 }
  0x8c   : > { %4033 = vmatmul.mubr.msk.f32.gmra.mrb[56].mxu1 %vm528_vm1, %v5332_v26 }
  0x8d   : > { %1153 = vmatprep.mubr.f32.mxu1 %v4847_v3 }
  0x8e   : > { %4000 = vmatmul.mubr.msk.f32.gmra.mrb[58].mxu0 %vm528_vm1, %v5343_v28 }
  0x8f   : > { %902 = vmatprep.mubr.f32.mxu0 %v4847_v3  ;;  %v5534_v44 = vpop.permute.xlu1 %308 }
  0x90   : > { %4034 = vmatmul.mubr.msk.f32.gmra.mrb[58].mxu1 %vm528_vm1, %v5343_v28  ;;  %7422 = vst [vmem:[#allocation5_spill] sm:$0xff] %v5534_v44 }
  0x91   : > { %1159 = vmatprep.mubr.f32.mxu1 %v4847_v3 }
  0x92   : > { %4001 = vmatmul.mubr.msk.f32.gmra.mrb[60].mxu0 %vm528_vm1, %v5354_v29 }
  0x93   : > { %908 = vmatprep.mubr.f32.mxu0 %v4847_v3 }
  0x94   : > { %4035 = vmatmul.mubr.msk.f32.gmra.mrb[60].mxu1 %vm528_vm1, %v5354_v29  ;;  %v5552_v2 = vpop.permute.xlu1 %313 }
  0x95   : > { %1165 = vmatprep.mubr.f32.mxu1 %v4847_v3  ;;  %7423 = vst [vmem:[#allocation6_spill] sm:$0xff] %v5552_v2 }
  0x96   : > { %4002 = vmatmul.mubr.msk.f32.gmra.mrb[62].mxu0 %vm528_vm1, %v5365_v31 }
  0x97   : > { %1236 = vmatprep.mubr.f32.mxu0 %v4847_v3 }
  0x98   : > { %4036 = vmatmul.mubr.msk.f32.gmra.mrb[62].mxu1 %vm528_vm1, %v5365_v31 }
  0x99   : > { %1493 = vmatprep.mubr.f32.mxu1 %v4847_v3 }
  0x9a   : > { %4039 = vmatmul.mubr.msk.f32.vlgmr.msra.gmra.mrb[64].mxu0 %vm528_vm1, %v4919_v20 }
  0x9b   : > { %1242 = vmatprep.mubr.f32.mxu0 %v4847_v3  ;;  %4106 = vmatpush1.msk.msra.mxu0 %vm625_vm0, %v4943_v27 }
  0x9c   : > { %4073 = vmatmul.mubr.msk.f32.vlgmr.msra.gmra.mrb[64].mxu1 %vm528_vm1, %v4919_v20  ;;  %4173 = vmatprep.subr.msk.mxu0 %vm625_vm0, %v526_v37  ;;  %v3227_v20 = vld [vmem:[%s7330_s4] sm:$0x3] }
  0x9d   : > { %4140 = vmatpush1.msk.msra.mxu1 %vm625_vm0, %v4961_v32  ;;  %1499 = vmatprep.mubr.f32.mxu1 %v4847_v3 }
  0x9e   : > { %4040 = vmatmul.mubr.msk.f32.gmra.mrb[66].mxu0 %vm528_vm1, %v4931_v24  ;;  %4207 = vmatprep.subr.msk.mxu1 %vm625_vm0, %v527_v40 }
  0x9f   : > { %1248 = vmatprep.mubr.f32.mxu0 %v4847_v3  ;;  %3230 = vperm.xlu0 %4767, %v3227_v20  }
  0xa0   : > { %4074 = vmatmul.mubr.msk.f32.gmra.mrb[66].mxu1 %vm528_vm1, %v4931_v24  ;;  %v5516_v24 = vpop.permute.xlu0 %298 }
  0xa1   : > { %1505 = vmatprep.mubr.f32.mxu1 %v4847_v3  ;;  %7420 = vst [vmem:[#allocation3_spill] sm:$0xff] %v5516_v24 }
  0xa2   : > { %4041 = vmatmul.mubr.msk.f32.gmra.mrb[68].mxu0 %vm528_vm1, %v4956_v30 }
  0xa3   : > { %1254 = vmatprep.mubr.f32.mxu0 %v4847_v3 }
  0xa4   : > { %4075 = vmatmul.mubr.msk.f32.gmra.mrb[68].mxu1 %vm528_vm1, %v4956_v30 }
  0xa5   : > { %1511 = vmatprep.mubr.f32.mxu1 %v4847_v3 }
  0xa6   : > { %4042 = vmatmul.mubr.msk.f32.gmra.mrb[70].mxu0 %vm528_vm1, %v4981_v36 }
  0xa7   : > { %1260 = vmatprep.mubr.f32.mxu0 %v4847_v3 }
  0xa8   : > { %4076 = vmatmul.mubr.msk.f32.gmra.mrb[70].mxu1 %vm528_vm1, %v4981_v36  ;;  %v5526_v36 = vpop.permute.xlu0 %303 }
  0xa9   : > { %1517 = vmatprep.mubr.f32.mxu1 %v4847_v3  ;;  %7421 = vst [vmem:[#allocation4_spill] sm:$0xff] %v5526_v36 }
  0xaa   : > { %4043 = vmatmul.mubr.msk.f32.gmra.mrb[72].mxu0 %vm528_vm1, %v4999_v39 }
  0xab   : > { %1266 = vmatprep.mubr.f32.mxu0 %v4847_v3 }
  0xac   : > { %4077 = vmatmul.mubr.msk.f32.gmra.mrb[72].mxu1 %vm528_vm1, %v4999_v39 }
  0xad   : > { %1523 = vmatprep.mubr.f32.mxu1 %v4847_v3 }
  0xae   : > { %4044 = vmatmul.mubr.msk.f32.gmra.mrb[74].mxu0 %vm528_vm1, %v5016_v42 }
  0xaf   : > { %1272 = vmatprep.mubr.f32.mxu0 %v4847_v3 }
  0xb0   : > { %4078 = vmatmul.mubr.msk.f32.gmra.mrb[74].mxu1 %vm528_vm1, %v5016_v42 }
  0xb1   : > { %1529 = vmatprep.mubr.f32.mxu1 %v4847_v3 }
  0xb2   : > { %4045 = vmatmul.mubr.msk.f32.gmra.mrb[76].mxu0 %vm528_vm1, %v5033_v45 }
  0xb3   : > { %1278 = vmatprep.mubr.f32.mxu0 %v4847_v3 }
  0xb4   : > { %4079 = vmatmul.mubr.msk.f32.gmra.mrb[76].mxu1 %vm528_vm1, %v5033_v45 }
  0xb5   : > { %1535 = vmatprep.mubr.f32.mxu1 %v4847_v3 }
  0xb6   : > { %4046 = vmatmul.mubr.msk.f32.gmra.mrb[78].mxu0 %vm528_vm1, %v5050_v48 }
  0xb7   : > { %1284 = vmatprep.mubr.f32.mxu0 %v4847_v3 }
  0xb8   : > { %4080 = vmatmul.mubr.msk.f32.gmra.mrb[78].mxu1 %vm528_vm1, %v5050_v48 }
  0xb9   : > { %1541 = vmatprep.mubr.f32.mxu1 %v4847_v3 }
  0xba   : > { %4047 = vmatmul.mubr.msk.f32.gmra.mrb[80].mxu0 %vm528_vm1, %v5067_v51 }
  0xbb   : > { %1290 = vmatprep.mubr.f32.mxu0 %v4847_v3 }
  0xbc   : > { %4081 = vmatmul.mubr.msk.f32.gmra.mrb[80].mxu1 %vm528_vm1, %v5067_v51 }
  0xbd   : > { %1547 = vmatprep.mubr.f32.mxu1 %v4847_v3 }
  0xbe   : > { %4048 = vmatmul.mubr.msk.f32.gmra.mrb[82].mxu0 %vm528_vm1, %v5084_v54 }
  0xbf   : > { %1296 = vmatprep.mubr.f32.mxu0 %v4847_v3 }
  0xc0   : > { %4082 = vmatmul.mubr.msk.f32.gmra.mrb[82].mxu1 %vm528_vm1, %v5084_v54 }
  0xc1   : > { %1553 = vmatprep.mubr.f32.mxu1 %v4847_v3 }
  0xc2   : > { %4049 = vmatmul.mubr.msk.f32.gmra.mrb[84].mxu0 %vm528_vm1, %v5098_v56 }
  0xc3   : > { %1302 = vmatprep.mubr.f32.mxu0 %v4847_v3 }
  0xc4   : > { %4083 = vmatmul.mubr.msk.f32.gmra.mrb[84].mxu1 %vm528_vm1, %v5098_v56 }
  0xc5   : > { %1559 = vmatprep.mubr.f32.mxu1 %v4847_v3 }
  0xc6   : > { %4050 = vmatmul.mubr.msk.f32.gmra.mrb[86].mxu0 %vm528_vm1, %v5115_v59 }
  0xc7   : > { %1308 = vmatprep.mubr.f32.mxu0 %v4847_v3 }
  0xc8   : > { %4084 = vmatmul.mubr.msk.f32.gmra.mrb[86].mxu1 %vm528_vm1, %v5115_v59 }
  0xc9   : > { %1565 = vmatprep.mubr.f32.mxu1 %v4847_v3 }
  0xca   : > { %4051 = vmatmul.mubr.msk.f32.gmra.mrb[88].mxu0 %vm528_vm1, %v5126_v60 }
  0xcb   : > { %1314 = vmatprep.mubr.f32.mxu0 %v4847_v3 }
  0xcc   : > { %4085 = vmatmul.mubr.msk.f32.gmra.mrb[88].mxu1 %vm528_vm1, %v5126_v60 }
  0xcd   : > { %1571 = vmatprep.mubr.f32.mxu1 %v4847_v3 }
  0xce   : > { %4052 = vmatmul.mubr.msk.f32.gmra.mrb[90].mxu0 %vm528_vm1, %v5143_v63 }
  0xcf   : > { %1320 = vmatprep.mubr.f32.mxu0 %v4847_v3 }
  0xd0   : > { %4086 = vmatmul.mubr.msk.f32.gmra.mrb[90].mxu1 %vm528_vm1, %v5143_v63 }
  0xd1   : > { %1577 = vmatprep.mubr.f32.mxu1 %v4847_v3 }
  0xd2   : > { %4053 = vmatmul.mubr.msk.f32.gmra.mrb[92].mxu0 %vm528_vm1, %v5154_v0 }
  0xd3   : > { %1326 = vmatprep.mubr.f32.mxu0 %v4847_v3 }
  0xd4   : > { %4087 = vmatmul.mubr.msk.f32.gmra.mrb[92].mxu1 %vm528_vm1, %v5154_v0 }
  0xd5   : > { %1583 = vmatprep.mubr.f32.mxu1 %v4847_v3 }
  0xd6   : > { %4054 = vmatmul.mubr.msk.f32.gmra.mrb[94].mxu0 %vm528_vm1, %v5171_v4 }
  0xd7   : > { %1332 = vmatprep.mubr.f32.mxu0 %v4847_v3 }
  0xd8   : > { %4088 = vmatmul.mubr.msk.f32.gmra.mrb[94].mxu1 %vm528_vm1, %v5171_v4 }
  0xd9   : > { %1589 = vmatprep.mubr.f32.mxu1 %v4847_v3 }
  0xda   : > { %4055 = vmatmul.mubr.msk.f32.gmra.mrb[96].mxu0 %vm528_vm1, %v5182_v5 }
  0xdb   : > { %1338 = vmatprep.mubr.f32.mxu0 %v4847_v3 }
  0xdc   : > { %4089 = vmatmul.mubr.msk.f32.gmra.mrb[96].mxu1 %vm528_vm1, %v5182_v5 }
  0xdd   : > { %1595 = vmatprep.mubr.f32.mxu1 %v4847_v3 }
  0xde   : > { %4056 = vmatmul.mubr.msk.f32.gmra.mrb[98].mxu0 %vm528_vm1, %v5199_v9 }
  0xdf   : > { %1344 = vmatprep.mubr.f32.mxu0 %v4847_v3 }
  0xe0   : > { %4090 = vmatmul.mubr.msk.f32.gmra.mrb[98].mxu1 %vm528_vm1, %v5199_v9 }
  0xe1   : > { %1601 = vmatprep.mubr.f32.mxu1 %v4847_v3 }
  0xe2   : > { %4057 = vmatmul.mubr.msk.f32.gmra.mrb[100].mxu0 %vm528_vm1, %v5210_v10 }
  0xe3   : > { %1350 = vmatprep.mubr.f32.mxu0 %v4847_v3 }
  0xe4   : > { %4091 = vmatmul.mubr.msk.f32.gmra.mrb[100].mxu1 %vm528_vm1, %v5210_v10 }
  0xe5   : > { %1607 = vmatprep.mubr.f32.mxu1 %v4847_v3 }
  0xe6   : > { %4058 = vmatmul.mubr.msk.f32.gmra.mrb[102].mxu0 %vm528_vm1, %v5227_v13 }
  0xe7   : > { %1356 = vmatprep.mubr.f32.mxu0 %v4847_v3 }
  0xe8   : > { %4092 = vmatmul.mubr.msk.f32.gmra.mrb[102].mxu1 %vm528_vm1, %v5227_v13 }
  0xe9   : > { %1613 = vmatprep.mubr.f32.mxu1 %v4847_v3 }
  0xea   : > { %4059 = vmatmul.mubr.msk.f32.gmra.mrb[104].mxu0 %vm528_vm1, %v5238_v14 }
  0xeb   : > { %1362 = vmatprep.mubr.f32.mxu0 %v4847_v3 }
  0xec   : > { %4093 = vmatmul.mubr.msk.f32.gmra.mrb[104].mxu1 %vm528_vm1, %v5238_v14 }
  0xed   : > { %v724_v27 = vpop.f32.mrb[0].mxu0  ;;  %1619 = vmatprep.mubr.f32.mxu1 %v4847_v3 }
  0xee   : > { %4060 = vmatmul.mubr.msk.f32.gmra.mrb[106].mxu0 %vm528_vm1, %v5255_v17  ;;  %v726_v30 = vpop.f32.mrb[1].mxu0  ;;  %v725_v39 = vadd.f32 %v724_v27, %v5516_v24 }
  0xef   : > { %v981_v32 = vpop.f32.mrb[0].mxu1  ;;  %1368 = vmatprep.mubr.f32.mxu0 %v4847_v3  ;;  %v727_v42 = vadd.f32 %v726_v30, %v5516_v24  ;;  %v5578_v30 = vpop.permute.xlu0 %318 }
  0xf0   : > { %v983_v41 = vpop.f32.mrb[1].mxu1  ;;  %4094 = vmatmul.mubr.msk.f32.gmra.mrb[106].mxu1 %vm528_vm1, %v5255_v17  ;;  %v982_v45 = vadd.f32 %v981_v32, %v5516_v24  ;;  %v2714_v51 = vmax.f32 %v725_v39, 0.0  ;;  %7424 = vst [vmem:[#allocation7_spill] sm:$0xff] %v5578_v30 }
  0xf1   : > { %v730_v43 = vpop.f32.mrb[2].mxu0  ;;  %1625 = vmatprep.mubr.f32.mxu1 %v4847_v3  ;;  %v984_v48 = vadd.f32 %v983_v41, %v5516_v24  ;;  %v2715_v55 = vmax.f32 %v727_v42, 0.0 }
  0xf2   : > { %v731_v46 = vadd.f32 %v730_v43, %v5526_v36  ;;  %v732_v47 = vpop.f32.mrb[3].mxu0  ;;  %4061 = vmatmul.mubr.msk.f32.gmra.mrb[108].mxu0 %vm528_vm1, %v5266_v18  ;;  %v2716_v59 = vmax.f32 %v982_v45, 0.0 }
  0xf3   : > { %v733_v49 = vadd.f32 %v732_v47, %v5526_v36  ;;  %v987_v50 = vpop.f32.mrb[2].mxu1  ;;  %1374 = vmatprep.mubr.f32.mxu0 %v4847_v3  ;;  %v2717_v63 = vmax.f32 %v984_v48, 0.0 }
  0xf4   : > { %v2730_v52 = vmax.f32 %v731_v46, 0.0  ;;  %v988_v53 = vadd.f32 %v987_v50, %v5526_v36  ;;  %v989_v54 = vpop.f32.mrb[3].mxu1  ;;  %4095 = vmatmul.mubr.msk.f32.gmra.mrb[108].mxu1 %vm528_vm1, %v5266_v18  ;;  %v5584_v46 = vpop.permute.xlu1 %323 }
  0xf5   : > { %v2731_v56 = vmax.f32 %v733_v49, 0.0  ;;  %v990_v57 = vadd.f32 %v989_v54, %v5526_v36  ;;  %v736_v58 = vpop.f32.mrb[4].mxu0  ;;  %1631 = vmatprep.mubr.f32.mxu1 %v4847_v3  ;;  %7425 = vst [vmem:[#allocation8_spill] sm:$0xff] %v5584_v46 }
  0xf6   : > { %v5548_v60 = vpack.c.bf16 %v2730_v52, %v2714_v51  ;;  %v2732_v61 = vmax.f32 %v988_v53, 0.0  ;;  %4062 = vmatmul.mubr.msk.f32.gmra.mrb[110].mxu0 %vm528_vm1, %v5277_v19  ;;  %v738_v62 = vpop.f32.mrb[5].mxu0  ;;  %v737_v6 = vadd.f32 %v736_v58, %v5534_v44 }
  0xf7   : > { %v2733_v0 = vmax.f32 %v990_v57, 0.0  ;;  %v993_v1 = vpop.f32.mrb[4].mxu1  ;;  %1380 = vmatprep.mubr.f32.mxu0 %v4847_v3  ;;  %v5555_v4 = vpack.c.bf16 %v2731_v56, %v2715_v55  ;;  %v739_v9 = vadd.f32 %v738_v62, %v5534_v44 }
  0xf8   : > { %v5557_v5 = vpack.c.bf16 %v2732_v61, %v2716_v59  ;;  %v995_v8 = vpop.f32.mrb[5].mxu1  ;;  %4096 = vmatmul.mubr.msk.f32.gmra.mrb[110].mxu1 %vm528_vm1, %v5277_v19  ;;  %v994_v12 = vadd.f32 %v993_v1, %v5534_v44  ;;  %v2746_v18 = vmax.f32 %v737_v6, 0.0 }
  0xf9   : > { %v742_v10 = vpop.f32.mrb[6].mxu0  ;;  %1637 = vmatprep.mubr.f32.mxu1 %v4847_v3  ;;  %v5564_v11 = vpack.c.bf16 %v2733_v0, %v2717_v63  ;;  %v996_v15 = vadd.f32 %v995_v8, %v5534_v44  ;;  %v2747_v37 = vmax.f32 %v739_v9, 0.0  ;;  %v5610_v9 = vpop.permute.xlu0 %328 }
  0xfa   : > { %v743_v13 = vadd.f32 %v742_v10, %v5552_v2  ;;  %v744_v14 = vpop.f32.mrb[7].mxu0  ;;  %4063 = vmatmul.mubr.msk.f32.gmra.mrb[112].mxu0 %vm528_vm1, %v5288_v21  ;;  %v2748_v32 = vmax.f32 %v994_v12, 0.0  ;;  %7426 = vst [vmem:[#allocation9_spill] sm:$0xff] %v5610_v9 }
  0xfb   : > { %v745_v16 = vadd.f32 %v744_v14, %v5552_v2  ;;  %v999_v17 = vpop.f32.mrb[6].mxu1  ;;  %1386 = vmatprep.mubr.f32.mxu0 %v4847_v3  ;;  %v2749_v43 = vmax.f32 %v996_v15, 0.0 }
  0xfc   : > { %v2762_v19 = vmax.f32 %v743_v13, 0.0  ;;  %v1000_v33 = vadd.f32 %v999_v17, %v5552_v2  ;;  %v1001_v35 = vpop.f32.mrb[7].mxu1  ;;  %4097 = vmatmul.mubr.msk.f32.gmra.mrb[112].mxu1 %vm528_vm1, %v5288_v21 }
  0xfd   : > { %v2763_v40 = vmax.f32 %v745_v16, 0.0  ;;  %v1002_v20 = vadd.f32 %v1001_v35, %v5552_v2  ;;  %v748_v27 = vpop.f32.mrb[8].mxu0  ;;  %1643 = vmatprep.mubr.f32.mxu1 %v4847_v3 }
  0xfe   : > { %v5580_v39 = vpack.c.bf16 %v2762_v19, %v2746_v18  ;;  %v2764_v41 = vmax.f32 %v1000_v33, 0.0  ;;  %4064 = vmatmul.mubr.msk.f32.gmra.mrb[114].mxu0 %vm528_vm1, %v5299_v22  ;;  %v750_v42 = vpop.f32.mrb[9].mxu0  ;;  %v749_v50 = vadd.f32 %v748_v27, %v5578_v30  ;;  %v5618_v18 = vpop.permute.xlu1 %333 }
  0xff   : > { %v2765_v45 = vmax.f32 %v1002_v20, 0.0  ;;  %v1005_v21 = vpop.f32.mrb[8].mxu1  ;;  %1392 = vmatprep.mubr.f32.mxu0 %v4847_v3  ;;  %v5587_v47 = vpack.c.bf16 %v2763_v40, %v2747_v37  ;;  %v751_v51 = vadd.f32 %v750_v42, %v5578_v30  ;;  %7427 = vst [vmem:[#allocation10_spill] sm:$0xff] %v5618_v18 }
 0x100   : > { %v5589_v48 = vpack.c.bf16 %v2764_v41, %v2748_v32  ;;  %v1007_v49 = vpop.f32.mrb[9].mxu1  ;;  %4098 = vmatmul.mubr.msk.f32.gmra.mrb[114].mxu1 %vm528_vm1, %v5299_v22  ;;  %v1006_v56 = vadd.f32 %v1005_v21, %v5578_v30  ;;  %v2778_v59 = vmax.f32 %v749_v50, 0.0 }
 0x101   : > { %v754_v52 = vpop.f32.mrb[10].mxu0  ;;  %1649 = vmatprep.mubr.f32.mxu1 %v4847_v3  ;;  %v5596_v53 = vpack.c.bf16 %v2765_v45, %v2749_v43  ;;  %v1008_v57 = vadd.f32 %v1007_v49, %v5578_v30  ;;  %v2779_v0 = vmax.f32 %v751_v51, 0.0 }
 0x102   : > { %v755_v54 = vadd.f32 %v754_v52, %v5584_v46  ;;  %v756_v55 = vpop.f32.mrb[11].mxu0  ;;  %4065 = vmatmul.mubr.msk.f32.gmra.mrb[116].mxu0 %vm528_vm1, %v5310_v23  ;;  %v2780_v12 = vmax.f32 %v1006_v56, 0.0  ;;  %v5642_v56 = vpop.permute.xlu0 %338 }
 0x103   : > { %v757_v22 = vadd.f32 %v756_v55, %v5584_v46  ;;  %v1011_v58 = vpop.f32.mrb[10].mxu1  ;;  %1398 = vmatprep.mubr.f32.mxu0 %v4847_v3  ;;  %v2781_v15 = vmax.f32 %v1008_v57, 0.0  ;;  %7428 = vst [vmem:[#allocation11_spill] sm:$0xff] %v5642_v56 }
 0x104   : > { %v2794_v61 = vmax.f32 %v755_v54, 0.0  ;;  %v1012_v62 = vadd.f32 %v1011_v58, %v5584_v46  ;;  %v1013_v63 = vpop.f32.mrb[11].mxu1  ;;  %4099 = vmatmul.mubr.msk.f32.gmra.mrb[116].mxu1 %vm528_vm1, %v5310_v23 }
 0x105   : > { %v2795_v1 = vmax.f32 %v757_v22, 0.0  ;;  %v1014_v6 = vadd.f32 %v1013_v63, %v5584_v46  ;;  %v760_v8 = vpop.f32.mrb[12].mxu0  ;;  %1655 = vmatprep.mubr.f32.mxu1 %v4847_v3 }
 0x106   : > { %v5612_v10 = vpack.c.bf16 %v2794_v61, %v2778_v59  ;;  %v2796_v13 = vmax.f32 %v1012_v62, 0.0  ;;  %4066 = vmatmul.mubr.msk.f32.gmra.mrb[118].mxu0 %vm528_vm1, %v5321_v25  ;;  %v762_v14 = vpop.f32.mrb[13].mxu0  ;;  %v761_v35 = vadd.f32 %v760_v8, %v5610_v9 }
 0x107   : > { %v5616_v16 = vpack.c.bf16 %v2795_v1, %v2779_v0  ;;  %v2797_v23 = vmax.f32 %v1014_v6, 0.0  ;;  %v1017_v17 = vpop.f32.mrb[12].mxu1  ;;  %1404 = vmatprep.mubr.f32.mxu0 %v4847_v3  ;;  %v763_v40 = vadd.f32 %v762_v14, %v5610_v9  ;;  %v5650_v0 = vpop.permute.xlu1 %343 }
 0x108   : > { %v5621_v19 = vpack.c.bf16 %v2796_v13, %v2780_v12  ;;  %v1019_v33 = vpop.f32.mrb[13].mxu1  ;;  %4100 = vmatmul.mubr.msk.f32.gmra.mrb[118].mxu1 %vm528_vm1, %v5321_v25  ;;  %v1018_v41 = vadd.f32 %v1017_v17, %v5610_v9  ;;  %v2810_v45 = vmax.f32 %v761_v35, 0.0  ;;  %7429 = vst [vmem:[#allocation12_spill] sm:$0xff] %v5650_v0 }
 0x109   : > { %v5626_v37 = vpack.c.bf16 %v2797_v23, %v2781_v15  ;;  %v766_v20 = vpop.f32.mrb[14].mxu0  ;;  %1661 = vmatprep.mubr.f32.mxu1 %v4847_v3  ;;  %v1020_v42 = vadd.f32 %v1019_v33, %v5610_v9  ;;  %v2811_v51 = vmax.f32 %v763_v40, 0.0 }
 0x10a   : > { %v767_v27 = vadd.f32 %v766_v20, %v5618_v18  ;;  %v768_v32 = vpop.f32.mrb[15].mxu0  ;;  %4067 = vmatmul.mubr.msk.f32.gmra.mrb[120].mxu0 %vm528_vm1, %v5332_v26  ;;  %v2812_v22 = vmax.f32 %v1018_v41, 0.0 }
 0x10b   : > { %v769_v25 = vadd.f32 %v768_v32, %v5618_v18  ;;  %v1023_v43 = vpop.f32.mrb[14].mxu1  ;;  %1410 = vmatprep.mubr.f32.mxu0 %v4847_v3  ;;  %v2813_v61 = vmax.f32 %v1020_v42, 0.0 }
 0x10c   : > { %v2826_v21 = vmax.f32 %v767_v27, 0.0  ;;  %v1024_v49 = vadd.f32 %v1023_v43, %v5618_v18  ;;  %v1025_v50 = vpop.f32.mrb[15].mxu1  ;;  %4101 = vmatmul.mubr.msk.f32.gmra.mrb[120].mxu1 %vm528_vm1, %v5332_v26 }
 0x10d   : > { %v2827_v52 = vmax.f32 %v769_v25, 0.0  ;;  %v1026_v54 = vadd.f32 %v1025_v50, %v5618_v18  ;;  %v772_v55 = vpop.f32.mrb[16].mxu0  ;;  %1667 = vmatprep.mubr.f32.mxu1 %v4847_v3 }
 0x10e   : > { %v5644_v57 = vpack.c.bf16 %v2826_v21, %v2810_v45  ;;  %v2828_v58 = vmax.f32 %v1024_v49, 0.0  ;;  %4068 = vmatmul.mubr.msk.f32.gmra.mrb[122].mxu0 %vm528_vm1, %v5343_v28  ;;  %v774_v59 = vpop.f32.mrb[17].mxu0  ;;  %v773_v8 = vadd.f32 %v772_v55, %v5642_v56  ;;  %v5674_v45 = vpop.permute.xlu0 %348 }
 0x10f   : > { %v5648_v62 = vpack.c.bf16 %v2827_v52, %v2811_v51  ;;  %v2829_v26 = vmax.f32 %v1026_v54, 0.0  ;;  %v1029_v63 = vpop.f32.mrb[16].mxu1  ;;  %1416 = vmatprep.mubr.f32.mxu0 %v4847_v3  ;;  %v775_v13 = vadd.f32 %v774_v59, %v5642_v56  ;;  %7430 = vst [vmem:[#allocation13_spill] sm:$0xff] %v5674_v45 }
 0x110   : > { %v5653_v1 = vpack.c.bf16 %v2828_v58, %v2812_v22  ;;  %v1031_v6 = vpop.f32.mrb[17].mxu1  ;;  %4102 = vmatmul.mubr.msk.f32.gmra.mrb[122].mxu1 %vm528_vm1, %v5343_v28  ;;  %v1030_v17 = vadd.f32 %v1029_v63, %v5642_v56  ;;  %v2842_v40 = vmax.f32 %v773_v8, 0.0  ;;  %v5682_v22 = vpop.permute.xlu1 %353 }
 0x111   : > { %v5658_v12 = vpack.c.bf16 %v2829_v26, %v2813_v61  ;;  %v778_v14 = vpop.f32.mrb[18].mxu0  ;;  %1673 = vmatprep.mubr.f32.mxu1 %v4847_v3  ;;  %v1032_v33 = vadd.f32 %v1031_v6, %v5642_v56  ;;  %v2843_v41 = vmax.f32 %v775_v13, 0.0  ;;  %7431 = vst [vmem:[#allocation14_spill] sm:$0xff] %v5682_v22 }
 0x112   : > { %v779_v15 = vadd.f32 %v778_v14, %v5650_v0  ;;  %v780_v23 = vpop.f32.mrb[19].mxu0  ;;  %4069 = vmatmul.mubr.msk.f32.gmra.mrb[124].mxu0 %vm528_vm1, %v5354_v29  ;;  %v2844_v49 = vmax.f32 %v1030_v17, 0.0  ;;  %v4773_v14 = vld [vmem:[%s7327_s1] sm:$0xff] }
 0x113   : > { %v781_v28 = vadd.f32 %v780_v23, %v5650_v0  ;;  %v1035_v35 = vpop.f32.mrb[18].mxu1  ;;  %1422 = vmatprep.mubr.f32.mxu0 %v4847_v3  ;;  %v2845_v52 = vmax.f32 %v1032_v33, 0.0 }
 0x114   : > { %v2858_v20 = vmax.f32 %v779_v15, 0.0  ;;  %v1036_v27 = vadd.f32 %v1035_v35, %v5650_v0  ;;  %v1037_v32 = vpop.f32.mrb[19].mxu1  ;;  %4103 = vmatmul.mubr.msk.f32.gmra.mrb[124].mxu1 %vm528_vm1, %v5354_v29 }
 0x115   : > { %v2859_v42 = vmax.f32 %v781_v28, 0.0  ;;  %v1038_v25 = vadd.f32 %v1037_v32, %v5650_v0  ;;  %v784_v43 = vpop.f32.mrb[20].mxu0  ;;  %1679 = vmatprep.mubr.f32.mxu1 %v4847_v3 }
 0x116   : > { %v5676_v21 = vpack.c.bf16 %v2858_v20, %v2842_v40  ;;  %v2860_v50 = vmax.f32 %v1036_v27, 0.0  ;;  %4070 = vmatmul.mubr.msk.f32.gmra.mrb[126].mxu0 %vm528_vm1, %v5365_v31  ;;  %v786_v51 = vpop.f32.mrb[21].mxu0  ;;  %v785_v61 = vadd.f32 %v784_v43, %v5674_v45 }
 0x117   : > { %v5680_v54 = vpack.c.bf16 %v2859_v42, %v2843_v41  ;;  %v2861_v29 = vmax.f32 %v1038_v25, 0.0  ;;  %v1041_v55 = vpop.f32.mrb[20].mxu1  ;;  %1750 = vmatprep.mubr.f32.mxu0 %v4847_v3  ;;  %v787_v63 = vadd.f32 %v786_v51, %v5674_v45  ;;  %v5712_v41 = vpop.permute.xlu0 %358 }
 0x118   : > { %v5685_v58 = vpack.c.bf16 %v2860_v50, %v2844_v49  ;;  %v1043_v59 = vpop.f32.mrb[21].mxu1  ;;  %4104 = vmatmul.mubr.msk.f32.gmra.mrb[126].mxu1 %vm528_vm1, %v5365_v31  ;;  %v1042_v31 = vadd.f32 %v1041_v55, %v5674_v45  ;;  %v2874_v33 = vmax.f32 %v785_v61, 0.0  ;;  %7432 = vst [vmem:[#allocation15_spill] sm:$0xff] %v5712_v41 }
 0x119   : > { %v5690_v26 = vpack.c.bf16 %v2861_v29, %v2845_v52  ;;  %v790_v6 = vpop.f32.mrb[22].mxu0  ;;  %2007 = vmatprep.mubr.f32.mxu1 %v4847_v3  ;;  %v1044_v15 = vadd.f32 %v1043_v59, %v5674_v45  ;;  %v2875_v20 = vmax.f32 %v787_v63, 0.0  ;;  %v5723_v29 = vpop.permute.xlu1 %363 }
 0x11a   : > { %v791_v8 = vadd.f32 %v790_v6, %v5682_v22  ;;  %v792_v13 = vpop.f32.mrb[23].mxu0  ;;  %4107 = vmatmul.mubr.msk.f32.vlgmr.msra.gmra.mrb[128].mxu0 %vm528_vm1, %v4773_v14  ;;  %v2876_v25 = vmax.f32 %v1042_v31, 0.0 }
 0x11b   : > { %v793_v23 = vadd.f32 %v792_v13, %v5682_v22  ;;  %4174 = vmatpush1.msk.msra.mxu0 %vm625_vm0, %v5372_v34  ;;  %v1047_v17 = vpop.f32.mrb[22].mxu1  ;;  %1756 = vmatprep.mubr.f32.mxu0 %v4847_v3  ;;  %v2877_v50 = vmax.f32 %v1044_v15, 0.0 }
 0x11c   : > { %v2890_v28 = vmax.f32 %v791_v8, 0.0  ;;  %v1048_v35 = vadd.f32 %v1047_v17, %v5682_v22  ;;  %4245 = vmatprep.subr.bf16.mxu0 %v5555_v4  ;;  %v1049_v40 = vpop.f32.mrb[23].mxu1  ;;  %4141 = vmatmul.mubr.msk.f32.vlgmr.msra.gmra.mrb[128].mxu1 %vm528_vm1, %v4773_v14  ;;  %v4774_v4 = vld [vmem:[%s7327_s1 + $0x8] sm:$0xff]  ;;  %v4775_v14 = vld [vmem:[%s7327_s1 + $0x10] sm:$0xff] }
 0x11d   : > { %v2891_v27 = vmax.f32 %v793_v23, 0.0  ;;  %v1050_v32 = vadd.f32 %v1049_v40, %v5682_v22  ;;  %4208 = vmatpush1.msk.msra.mxu1 %vm625_vm0, %v5382_v38  ;;  %v796_v34 = vpop.f32.mrb[24].mxu0  ;;  %2013 = vmatprep.mubr.f32.mxu1 %v4847_v3 }
 0x11e   : > { %v5714_v42 = vpack.c.bf16 %v2890_v28, %v2874_v33  ;;  %v2892_v43 = vmax.f32 %v1048_v35, 0.0  ;;  %4309 = vmatprep.subr.bf16.mxu1 %v5564_v11  ;;  %4108 = vmatmul.mubr.msk.f32.gmra.mrb[130].mxu0 %vm528_vm1, %v4774_v4  ;;  %v798_v49 = vpop.f32.mrb[25].mxu0  ;;  %v797_v11 = vadd.f32 %v796_v34, %v5712_v41 }
 0x11f   : > { %v5721_v38 = vpack.c.bf16 %v2891_v27, %v2875_v20  ;;  %v2893_v51 = vmax.f32 %v1050_v32, 0.0  ;;  %v1053_v52 = vpop.f32.mrb[24].mxu1  ;;  %1762 = vmatprep.mubr.f32.mxu0 %v4847_v3  ;;  %v799_v63 = vadd.f32 %v798_v49, %v5712_v41 }
 0x120   : > { %v5726_v55 = vpack.c.bf16 %v2892_v43, %v2876_v25  ;;  %v1055_v59 = vpop.f32.mrb[25].mxu1  ;;  %4142 = vmatmul.mubr.msk.f32.gmra.mrb[130].mxu1 %vm528_vm1, %v4774_v4  ;;  %v1054_v31 = vadd.f32 %v1053_v52, %v5712_v41  ;;  %v2906_v33 = vmax.f32 %v797_v11, 0.0  ;;  %v5747_v25 = vpop.permute.xlu0 %368 }
 0x121   : > { %v5730_v61 = vpack.c.bf16 %v2893_v51, %v2877_v50  ;;  %v802_v6 = vpop.f32.mrb[26].mxu0  ;;  %2019 = vmatprep.mubr.f32.mxu1 %v4847_v3  ;;  %v1056_v15 = vadd.f32 %v1055_v59, %v5712_v41  ;;  %v2907_v20 = vmax.f32 %v799_v63, 0.0  ;;  %v4776_v50 = vld [vmem:[%s7327_s1 + $0x18] sm:$0xff] }
 0x122   : > { %v803_v8 = vadd.f32 %v802_v6, %v5723_v29  ;;  %v804_v13 = vpop.f32.mrb[27].mxu0  ;;  %4109 = vmatmul.mubr.msk.f32.gmra.mrb[132].mxu0 %vm528_vm1, %v4775_v14  ;;  %v2908_v4 = vmax.f32 %v1054_v31, 0.0  ;;  %v5757_v6 = vpop.permute.xlu1 %373 }
 0x123   : > { %v805_v23 = vadd.f32 %v804_v13, %v5723_v29  ;;  %v1059_v17 = vpop.f32.mrb[26].mxu1  ;;  %1768 = vmatprep.mubr.f32.mxu0 %v4847_v3  ;;  %v2909_v52 = vmax.f32 %v1056_v15, 0.0 }
 0x124   : > { %v2922_v28 = vmax.f32 %v803_v8, 0.0  ;;  %v1060_v35 = vadd.f32 %v1059_v17, %v5723_v29  ;;  %v1061_v40 = vpop.f32.mrb[27].mxu1  ;;  %4143 = vmatmul.mubr.msk.f32.gmra.mrb[132].mxu1 %vm528_vm1, %v4775_v14 }
 0x125   : > { %v2923_v27 = vmax.f32 %v805_v23, 0.0  ;;  %v1062_v32 = vadd.f32 %v1061_v40, %v5723_v29  ;;  %v808_v34 = vpop.f32.mrb[28].mxu0  ;;  %2025 = vmatprep.mubr.f32.mxu1 %v4847_v3 }
 0x126   : > { %v5749_v43 = vpack.c.bf16 %v2922_v28, %v2906_v33  ;;  %v2924_v49 = vmax.f32 %v1060_v35, 0.0  ;;  %4110 = vmatmul.mubr.msk.f32.gmra.mrb[134].mxu0 %vm528_vm1, %v4776_v50  ;;  %v810_v51 = vpop.f32.mrb[29].mxu0  ;;  %v809_v14 = vadd.f32 %v808_v34, %v5747_v25  ;;  %v4777_v28 = vld [vmem:[%s7327_s1 + $0x20] sm:$0xff] }
 0x127   : > { %v5755_v59 = vpack.c.bf16 %v2923_v27, %v2907_v20  ;;  %v2925_v11 = vmax.f32 %v1062_v32, 0.0  ;;  %v1065_v63 = vpop.f32.mrb[28].mxu1  ;;  %1774 = vmatprep.mubr.f32.mxu0 %v4847_v3  ;;  %v811_v23 = vadd.f32 %v810_v51, %v5747_v25 }
 0x128   : > { %7433 = vst [vmem:[#allocation16_spill] sm:$0xff] %v5749_v43  ;;  %v5760_v8 = vpack.c.bf16 %v2924_v49, %v2908_v4  ;;  %v1067_v13 = vpop.f32.mrb[29].mxu1  ;;  %4144 = vmatmul.mubr.msk.f32.gmra.mrb[134].mxu1 %vm528_vm1, %v4776_v50  ;;  %v1066_v35 = vadd.f32 %v1065_v63, %v5747_v25  ;;  %v2938_v32 = vmax.f32 %v809_v14, 0.0  ;;  %v5781_v63 = vpop.permute.xlu0 %378  ;;  %v4778_v14 = vld [vmem:[%s7327_s1 + $0x28] sm:$0xff] }
 0x129   : > { %v5764_v31 = vpack.c.bf16 %v2925_v11, %v2909_v52  ;;  %v814_v15 = vpop.f32.mrb[30].mxu0  ;;  %2031 = vmatprep.mubr.f32.mxu1 %v4847_v3  ;;  %v1068_v40 = vadd.f32 %v1067_v13, %v5747_v25  ;;  %v2939_v50 = vmax.f32 %v811_v23, 0.0 }
 0x12a   : > { %7434 = vst [vmem:[#allocation17_spill] sm:$0xff] %v5760_v8  ;;  %v815_v17 = vadd.f32 %v814_v15, %v5757_v6  ;;  %v816_v33 = vpop.f32.mrb[31].mxu0  ;;  %4111 = vmatmul.mubr.msk.f32.gmra.mrb[136].mxu0 %vm528_vm1, %v4777_v28  ;;  %v2940_v15 = vmax.f32 %v1066_v35, 0.0 }
 0x12b   : > { %v817_v20 = vadd.f32 %v816_v33, %v5757_v6  ;;  %v1071_v27 = vpop.f32.mrb[30].mxu1  ;;  %1780 = vmatprep.mubr.f32.mxu0 %v4847_v3  ;;  %v2941_v23 = vmax.f32 %v1068_v40, 0.0 }
 0x12c   : > { %v2954_v34 = vmax.f32 %v815_v17, 0.0  ;;  %v1072_v4 = vadd.f32 %v1071_v27, %v5757_v6  ;;  %v1073_v49 = vpop.f32.mrb[31].mxu1  ;;  %4145 = vmatmul.mubr.msk.f32.gmra.mrb[136].mxu1 %vm528_vm1, %v4777_v28 }
 0x12d   : > { %v2955_v51 = vmax.f32 %v817_v20, 0.0  ;;  %v1074_v52 = vadd.f32 %v1073_v49, %v5757_v6  ;;  %v820_v11 = vpop.f32.mrb[32].mxu0  ;;  %2037 = vmatprep.mubr.f32.mxu1 %v4847_v3  ;;  %v5791_v49 = vpop.permute.xlu1 %383 }
 0x12e   : > { %v5783_v13 = vpack.c.bf16 %v2954_v34, %v2938_v32  ;;  %v2956_v33 = vmax.f32 %v1072_v4, 0.0  ;;  %4112 = vmatmul.mubr.msk.f32.gmra.mrb[138].mxu0 %vm528_vm1, %v4778_v14  ;;  %v822_v17 = vpop.f32.mrb[33].mxu0  ;;  %7437 = vst [vmem:[#allocation20_spill] sm:$0xff] %v5791_v49  ;;  %v821_v34 = vadd.f32 %v820_v11, %v5781_v63 }
 0x12f   : > { %v5789_v28 = vpack.c.bf16 %v2955_v51, %v2939_v50  ;;  %v2957_v20 = vmax.f32 %v1074_v52, 0.0  ;;  %v1077_v27 = vpop.f32.mrb[32].mxu1  ;;  %1786 = vmatprep.mubr.f32.mxu0 %v4847_v3  ;;  %v823_v7 = vadd.f32 %v822_v17, %v5781_v63  ;;  %v4779_v52 = vld [vmem:[%s7327_s1 + $0x30] sm:$0xff] }
 0x130   : > { %7435 = vst [vmem:[#allocation18_spill] sm:$0xff] %v5783_v13  ;;  %v5794_v32 = vpack.c.bf16 %v2956_v33, %v2940_v15  ;;  %v1079_v35 = vpop.f32.mrb[33].mxu1  ;;  %4146 = vmatmul.mubr.msk.f32.gmra.mrb[138].mxu1 %vm528_vm1, %v4778_v14  ;;  %v1078_v15 = vadd.f32 %v1077_v27, %v5781_v63  ;;  %v2970_v17 = vmax.f32 %v821_v34, 0.0  ;;  %v5815_v27 = vpop.permute.xlu0 %388  ;;  %v4780_v34 = vld [vmem:[%s7327_s1 + $0x38] sm:$0xff] }
 0x131   : > { %7436 = vst [vmem:[#allocation19_spill] sm:$0xff] %v5789_v28  ;;  %v5798_v4 = vpack.c.bf16 %v2957_v20, %v2941_v23  ;;  %v826_v40 = vpop.f32.mrb[34].mxu0  ;;  %2043 = vmatprep.mubr.f32.mxu1 %v4847_v3  ;;  %v1080_v11 = vadd.f32 %v1079_v35, %v5781_v63  ;;  %7440 = vst [vmem:[#allocation23_spill] sm:$0xff] %v5815_v27 }
 0x132   : > { %7438 = vst [vmem:[#allocation21_spill] sm:$0xff] %v5794_v32  ;;  %v827_v50 = vadd.f32 %v826_v40, %v5791_v49  ;;  %v828_v51 = vpop.f32.mrb[35].mxu0  ;;  %4113 = vmatmul.mubr.msk.f32.gmra.mrb[140].mxu0 %vm528_vm1, %v4779_v52  ;;  %v2971_v32 = vmax.f32 %v823_v7, 0.0 }
 0x133   : > { %7439 = vst [vmem:[#allocation22_spill] sm:$0xff] %v5798_v4  ;;  %v829_v33 = vadd.f32 %v828_v51, %v5791_v49  ;;  %v1083_v14 = vpop.f32.mrb[34].mxu1  ;;  %1792 = vmatprep.mubr.f32.mxu0 %v4847_v3  ;;  %v2972_v51 = vmax.f32 %v1078_v15, 0.0  ;;  %v2973_v7 = vmax.f32 %v1080_v11, 0.0 }
 0x134   : > { %v2986_v23 = vmax.f32 %v827_v50, 0.0  ;;  %v1084_v20 = vadd.f32 %v1083_v14, %v5791_v49  ;;  %v1085_v40 = vpop.f32.mrb[35].mxu1  ;;  %4147 = vmatmul.mubr.msk.f32.gmra.mrb[140].mxu1 %vm528_vm1, %v4779_v52 }
 0x135   : > { %v2987_v13 = vmax.f32 %v829_v33, 0.0  ;;  %v1086_v4 = vadd.f32 %v1085_v40, %v5791_v49  ;;  %v832_v8 = vpop.f32.mrb[36].mxu0  ;;  %2049 = vmatprep.mubr.f32.mxu1 %v4847_v3  ;;  %v5825_v40 = vpop.permute.xlu1 %393 }
 0x136   : > { %v5817_v35 = vpack.c.bf16 %v2986_v23, %v2970_v17  ;;  %v2988_v28 = vmax.f32 %v1084_v20, 0.0  ;;  %4114 = vmatmul.mubr.msk.f32.gmra.mrb[142].mxu0 %vm528_vm1, %v4780_v34  ;;  %v834_v50 = vpop.f32.mrb[37].mxu0  ;;  %7443 = vst [vmem:[#allocation26_spill] sm:$0xff] %v5825_v40  ;;  %v833_v23 = vadd.f32 %v832_v8, %v5815_v27 }
 0x137   : > { %v5823_v52 = vpack.c.bf16 %v2987_v13, %v2971_v32  ;;  %v2989_v33 = vmax.f32 %v1086_v4, 0.0  ;;  %v1089_v14 = vpop.f32.mrb[36].mxu1  ;;  %1798 = vmatprep.mubr.f32.mxu0 %v4847_v3 }
 0x138   : > { %7441 = vst [vmem:[#allocation24_spill] sm:$0xff] %v5817_v35  ;;  %v5828_v17 = vpack.c.bf16 %v2988_v28, %v2972_v51  ;;  %v1091_v15 = vpop.f32.mrb[37].mxu1  ;;  %4148 = vmatmul.mubr.msk.f32.gmra.mrb[142].mxu1 %vm528_vm1, %v4780_v34  ;;  %v835_v35 = vadd.f32 %v834_v50, %v5815_v27  ;;  %v4781_v28 = vld [vmem:[%s7327_s1 + $0x40] sm:$0xff]  ;;  %v1090_v4 = vadd.f32 %v1089_v14, %v5815_v27  ;;  %v3002_v50 = vmax.f32 %v833_v23, 0.0  ;;  %v5849_v14 = vpop.permute.xlu0 %398  ;;  %v4782_v23 = vld [vmem:[%s7327_s1 + $0x48] sm:$0xff] }
 0x139   : > { %7442 = vst [vmem:[#allocation25_spill] sm:$0xff] %v5823_v52  ;;  %v5832_v20 = vpack.c.bf16 %v2989_v33, %v2973_v7  ;;  %v838_v11 = vpop.f32.mrb[38].mxu0  ;;  %2055 = vmatprep.mubr.f32.mxu1 %v4847_v3  ;;  %v1092_v8 = vadd.f32 %v1091_v15, %v5815_v27  ;;  %7446 = vst [vmem:[#allocation29_spill] sm:$0xff] %v5849_v14 }
 0x13a   : > { %7444 = vst [vmem:[#allocation27_spill] sm:$0xff] %v5828_v17  ;;  %v839_v13 = vadd.f32 %v838_v11, %v5825_v40  ;;  %v840_v32 = vpop.f32.mrb[39].mxu0  ;;  %4115 = vmatmul.mubr.msk.f32.gmra.mrb[144].mxu0 %vm528_vm1, %v4781_v28  ;;  %v3003_v17 = vmax.f32 %v835_v35, 0.0 }
 0x13b   : > { %7445 = vst [vmem:[#allocation28_spill] sm:$0xff] %v5832_v20  ;;  %v841_v51 = vadd.f32 %v840_v32, %v5825_v40  ;;  %v1095_v34 = vpop.f32.mrb[38].mxu1  ;;  %1804 = vmatprep.mubr.f32.mxu0 %v4847_v3  ;;  %v3004_v32 = vmax.f32 %v1090_v4, 0.0  ;;  %v3005_v35 = vmax.f32 %v1092_v8, 0.0 }
 0x13c   : > { %v3018_v7 = vmax.f32 %v839_v13, 0.0  ;;  %v1096_v33 = vadd.f32 %v1095_v34, %v5825_v40  ;;  %v1097_v11 = vpop.f32.mrb[39].mxu1  ;;  %4149 = vmatmul.mubr.msk.f32.gmra.mrb[144].mxu1 %vm528_vm1, %v4781_v28 }
 0x13d   : > { %v3019_v20 = vmax.f32 %v841_v51, 0.0  ;;  %v1098_v52 = vadd.f32 %v1097_v11, %v5825_v40  ;;  %v844_v43 = vpop.f32.mrb[40].mxu0  ;;  %2061 = vmatprep.mubr.f32.mxu1 %v4847_v3  ;;  %v5859_v11 = vpop.permute.xlu1 %403 }
 0x13e   : > { %v5851_v15 = vpack.c.bf16 %v3018_v7, %v3002_v50  ;;  %v3020_v27 = vmax.f32 %v1096_v33, 0.0  ;;  %4116 = vmatmul.mubr.msk.f32.gmra.mrb[146].mxu0 %vm528_vm1, %v4782_v23  ;;  %v846_v13 = vpop.f32.mrb[41].mxu0  ;;  %7449 = vst [vmem:[#allocation32_spill] sm:$0xff] %v5859_v11  ;;  %v845_v7 = vadd.f32 %v844_v43, %v5849_v14 }
 0x13f   : > { %v5857_v28 = vpack.c.bf16 %v3019_v20, %v3003_v17  ;;  %v3021_v51 = vmax.f32 %v1098_v52, 0.0  ;;  %v1101_v34 = vpop.f32.mrb[40].mxu1  ;;  %1810 = vmatprep.mubr.f32.mxu0 %v4847_v3 }
 0x140   : > { %7447 = vst [vmem:[#allocation30_spill] sm:$0xff] %v5851_v15  ;;  %v5862_v50 = vpack.c.bf16 %v3020_v27, %v3004_v32  ;;  %v1103_v4 = vpop.f32.mrb[41].mxu1  ;;  %4150 = vmatmul.mubr.msk.f32.gmra.mrb[146].mxu1 %vm528_vm1, %v4782_v23  ;;  %v847_v15 = vadd.f32 %v846_v13, %v5849_v14  ;;  %v4783_v27 = vld [vmem:[%s7327_s1 + $0x50] sm:$0xff]  ;;  %v1102_v20 = vadd.f32 %v1101_v34, %v5849_v14  ;;  %v3034_v13 = vmax.f32 %v845_v7, 0.0  ;;  %v5883_v34 = vpop.permute.xlu0 %408  ;;  %v4784_v7 = vld [vmem:[%s7327_s1 + $0x58] sm:$0xff] }
 0x141   : > { %7448 = vst [vmem:[#allocation31_spill] sm:$0xff] %v5857_v28  ;;  %v5866_v33 = vpack.c.bf16 %v3021_v51, %v3005_v35  ;;  %v850_v8 = vpop.f32.mrb[42].mxu0  ;;  %2067 = vmatprep.mubr.f32.mxu1 %v4847_v3  ;;  %v1104_v43 = vadd.f32 %v1103_v4, %v5849_v14  ;;  %7452 = vst [vmem:[#allocation35_spill] sm:$0xff] %v5883_v34 }
 0x142   : > { %7450 = vst [vmem:[#allocation33_spill] sm:$0xff] %v5862_v50  ;;  %v851_v52 = vadd.f32 %v850_v8, %v5859_v11  ;;  %v852_v17 = vpop.f32.mrb[43].mxu0  ;;  %4117 = vmatmul.mubr.msk.f32.gmra.mrb[148].mxu0 %vm528_vm1, %v4783_v27  ;;  %v3035_v50 = vmax.f32 %v847_v15, 0.0 }
 0x143   : > { %7451 = vst [vmem:[#allocation34_spill] sm:$0xff] %v5866_v33  ;;  %v853_v32 = vadd.f32 %v852_v17, %v5859_v11  ;;  %v1107_v23 = vpop.f32.mrb[42].mxu1  ;;  %1816 = vmatprep.mubr.f32.mxu0 %v4847_v3  ;;  %v3036_v17 = vmax.f32 %v1102_v20, 0.0  ;;  %v3037_v15 = vmax.f32 %v1104_v43, 0.0 }
 0x144   : > { %v3050_v35 = vmax.f32 %v851_v52, 0.0  ;;  %v1108_v51 = vadd.f32 %v1107_v23, %v5859_v11  ;;  %v1109_v8 = vpop.f32.mrb[43].mxu1  ;;  %4151 = vmatmul.mubr.msk.f32.gmra.mrb[148].mxu1 %vm528_vm1, %v4783_v27 }
 0x145   : > { %v3051_v33 = vmax.f32 %v853_v32, 0.0  ;;  %v1110_v28 = vadd.f32 %v1109_v8, %v5859_v11  ;;  %v856_v40 = vpop.f32.mrb[44].mxu0  ;;  %2073 = vmatprep.mubr.f32.mxu1 %v4847_v3  ;;  %v5893_v8 = vpop.permute.xlu1 %413 }
 0x146   : > { %v5885_v4 = vpack.c.bf16 %v3050_v35, %v3034_v13  ;;  %v3052_v14 = vmax.f32 %v1108_v51, 0.0  ;;  %4118 = vmatmul.mubr.msk.f32.gmra.mrb[150].mxu0 %vm528_vm1, %v4784_v7  ;;  %v858_v52 = vpop.f32.mrb[45].mxu0  ;;  %7455 = vst [vmem:[#allocation38_spill] sm:$0xff] %v5893_v8  ;;  %v857_v35 = vadd.f32 %v856_v40, %v5883_v34 }
 0x147   : > { %v5891_v27 = vpack.c.bf16 %v3051_v33, %v3035_v50  ;;  %v3053_v32 = vmax.f32 %v1110_v28, 0.0  ;;  %v1113_v23 = vpop.f32.mrb[44].mxu1  ;;  %1822 = vmatprep.mubr.f32.mxu0 %v4847_v3 }
 0x148   : > { %7453 = vst [vmem:[#allocation36_spill] sm:$0xff] %v5885_v4  ;;  %v5896_v13 = vpack.c.bf16 %v3052_v14, %v3036_v17  ;;  %v1115_v20 = vpop.f32.mrb[45].mxu1  ;;  %4152 = vmatmul.mubr.msk.f32.gmra.mrb[150].mxu1 %vm528_vm1, %v4784_v7  ;;  %v859_v4 = vadd.f32 %v858_v52, %v5883_v34  ;;  %v4785_v14 = vld [vmem:[%s7327_s1 + $0x60] sm:$0xff]  ;;  %v1114_v33 = vadd.f32 %v1113_v23, %v5883_v34  ;;  %v3066_v52 = vmax.f32 %v857_v35, 0.0  ;;  %v5917_v23 = vpop.permute.xlu0 %418  ;;  %v4786_v35 = vld [vmem:[%s7327_s1 + $0x68] sm:$0xff] }
 0x149   : > { %7454 = vst [vmem:[#allocation37_spill] sm:$0xff] %v5891_v27  ;;  %v5900_v51 = vpack.c.bf16 %v3053_v32, %v3037_v15  ;;  %v862_v43 = vpop.f32.mrb[46].mxu0  ;;  %2079 = vmatprep.mubr.f32.mxu1 %v4847_v3  ;;  %v1116_v40 = vadd.f32 %v1115_v20, %v5883_v34  ;;  %7458 = vst [vmem:[#allocation41_spill] sm:$0xff] %v5917_v23 }
 0x14a   : > { %7456 = vst [vmem:[#allocation39_spill] sm:$0xff] %v5896_v13  ;;  %v863_v28 = vadd.f32 %v862_v43, %v5893_v8  ;;  %v864_v50 = vpop.f32.mrb[47].mxu0  ;;  %4119 = vmatmul.mubr.msk.f32.gmra.mrb[152].mxu0 %vm528_vm1, %v4785_v14  ;;  %v3067_v13 = vmax.f32 %v859_v4, 0.0 }
 0x14b   : > { %7457 = vst [vmem:[#allocation40_spill] sm:$0xff] %v5900_v51  ;;  %v865_v17 = vadd.f32 %v864_v50, %v5893_v8  ;;  %v1119_v7 = vpop.f32.mrb[46].mxu1  ;;  %1828 = vmatprep.mubr.f32.mxu0 %v4847_v3  ;;  %v3068_v50 = vmax.f32 %v1114_v33, 0.0  ;;  %v3069_v4 = vmax.f32 %v1116_v40, 0.0 }
 0x14c   : > { %v3082_v15 = vmax.f32 %v863_v28, 0.0  ;;  %v1120_v32 = vadd.f32 %v1119_v7, %v5893_v8  ;;  %v1121_v43 = vpop.f32.mrb[47].mxu1  ;;  %4153 = vmatmul.mubr.msk.f32.gmra.mrb[152].mxu1 %vm528_vm1, %v4785_v14 }
 0x14d   : > { %v3083_v51 = vmax.f32 %v865_v17, 0.0  ;;  %v1122_v11 = vadd.f32 %v1121_v43, %v5893_v8  ;;  %v868_v27 = vpop.f32.mrb[48].mxu0  ;;  %2085 = vmatprep.mubr.f32.mxu1 %v4847_v3  ;;  %v5927_v43 = vpop.permute.xlu1 %423 }
 0x14e   : > { %v5919_v20 = vpack.c.bf16 %v3082_v15, %v3066_v52  ;;  %v3084_v34 = vmax.f32 %v1120_v32, 0.0  ;;  %4120 = vmatmul.mubr.msk.f32.gmra.mrb[154].mxu0 %vm528_vm1, %v4786_v35  ;;  %v870_v28 = vpop.f32.mrb[49].mxu0  ;;  %7461 = vst [vmem:[#allocation44_spill] sm:$0xff] %v5927_v43  ;;  %v869_v15 = vadd.f32 %v868_v27, %v5917_v23 }
 0x14f   : > { %v5925_v14 = vpack.c.bf16 %v3083_v51, %v3067_v13  ;;  %v3085_v17 = vmax.f32 %v1122_v11, 0.0  ;;  %v1125_v7 = vpop.f32.mrb[48].mxu1  ;;  %1834 = vmatprep.mubr.f32.mxu0 %v4847_v3  ;;  %v871_v8 = vadd.f32 %v870_v28, %v5917_v23 }
 0x150   : > { %7459 = vst [vmem:[#allocation42_spill] sm:$0xff] %v5919_v20  ;;  %v5930_v52 = vpack.c.bf16 %v3084_v34, %v3068_v50  ;;  %v1127_v33 = vpop.f32.mrb[49].mxu1  ;;  %4154 = vmatmul.mubr.msk.f32.gmra.mrb[154].mxu1 %vm528_vm1, %v4786_v35  ;;  %v4787_v34 = vld [vmem:[%s7327_s1 + $0x70] sm:$0xff]  ;;  %v1126_v51 = vadd.f32 %v1125_v7, %v5917_v23  ;;  %v3098_v28 = vmax.f32 %v869_v15, 0.0  ;;  %v5951_v7 = vpop.permute.xlu0 %428  ;;  %v4788_v15 = vld [vmem:[%s7327_s1 + $0x78] sm:$0xff] }
 0x151   : > { %7460 = vst [vmem:[#allocation43_spill] sm:$0xff] %v5925_v14  ;;  %v5934_v32 = vpack.c.bf16 %v3085_v17, %v3069_v4  ;;  %v874_v40 = vpop.f32.mrb[50].mxu0  ;;  %2091 = vmatprep.mubr.f32.mxu1 %v4847_v3  ;;  %v1128_v27 = vadd.f32 %v1127_v33, %v5917_v23  ;;  %7464 = vst [vmem:[#allocation47_spill] sm:$0xff] %v5951_v7 }
 0x152   : > { %7462 = vst [vmem:[#allocation45_spill] sm:$0xff] %v5930_v52  ;;  %v875_v11 = vadd.f32 %v874_v40, %v5927_v43  ;;  %v876_v13 = vpop.f32.mrb[51].mxu0  ;;  %4121 = vmatmul.mubr.msk.f32.gmra.mrb[156].mxu0 %vm528_vm1, %v4787_v34  ;;  %v3099_v52 = vmax.f32 %v871_v8, 0.0 }
 0x153   : > { %7463 = vst [vmem:[#allocation46_spill] sm:$0xff] %v5934_v32  ;;  %v877_v50 = vadd.f32 %v876_v13, %v5927_v43  ;;  %v1131_v35 = vpop.f32.mrb[50].mxu1  ;;  %1840 = vmatprep.mubr.f32.mxu0 %v4847_v3  ;;  %v3100_v13 = vmax.f32 %v1126_v51, 0.0  ;;  %v3101_v8 = vmax.f32 %v1128_v27, 0.0 }
 0x154   : > { %v3114_v4 = vmax.f32 %v875_v11, 0.0  ;;  %v1132_v17 = vadd.f32 %v1131_v35, %v5927_v43  ;;  %v1133_v40 = vpop.f32.mrb[51].mxu1  ;;  %4155 = vmatmul.mubr.msk.f32.gmra.mrb[156].mxu1 %vm528_vm1, %v4787_v34 }
 0x155   : > { %v3115_v20 = vmax.f32 %v877_v50, 0.0  ;;  %v1134_v32 = vadd.f32 %v1133_v40, %v5927_v43  ;;  %v880_v14 = vpop.f32.mrb[52].mxu0  ;;  %2097 = vmatprep.mubr.f32.mxu1 %v4847_v3  ;;  %v5961_v40 = vpop.permute.xlu1 %433 }
 0x156   : > { %v5953_v33 = vpack.c.bf16 %v3114_v4, %v3098_v28  ;;  %v3116_v23 = vmax.f32 %v1132_v17, 0.0  ;;  %4122 = vmatmul.mubr.msk.f32.gmra.mrb[158].mxu0 %vm528_vm1, %v4788_v15  ;;  %v882_v11 = vpop.f32.mrb[53].mxu0  ;;  %7467 = vst [vmem:[#allocation50_spill] sm:$0xff] %v5961_v40  ;;  %v881_v4 = vadd.f32 %v880_v14, %v5951_v7 }
 0x157   : > { %v5959_v34 = vpack.c.bf16 %v3115_v20, %v3099_v52  ;;  %v3117_v50 = vmax.f32 %v1134_v32, 0.0  ;;  %v1137_v35 = vpop.f32.mrb[52].mxu1  ;;  %1846 = vmatprep.mubr.f32.mxu0 %v4847_v3  ;;  %v883_v43 = vadd.f32 %v882_v11, %v5951_v7 }
 0x158   : > { %7465 = vst [vmem:[#allocation48_spill] sm:$0xff] %v5953_v33  ;;  %v5964_v28 = vpack.c.bf16 %v3116_v23, %v3100_v13  ;;  %v1139_v51 = vpop.f32.mrb[53].mxu1  ;;  %4156 = vmatmul.mubr.msk.f32.gmra.mrb[158].mxu1 %vm528_vm1, %v4788_v15  ;;  %v4789_v23 = vld [vmem:[%s7327_s1 + $0x80] sm:$0xff]  ;;  %v1138_v32 = vadd.f32 %v1137_v35, %v5951_v7  ;;  %v3130_v11 = vmax.f32 %v881_v4, 0.0  ;;  %v5985_v35 = vpop.permute.xlu0 %438  ;;  %v4790_v4 = vld [vmem:[%s7327_s1 + $0x88] sm:$0xff] }
 0x159   : > { %7466 = vst [vmem:[#allocation49_spill] sm:$0xff] %v5959_v34  ;;  %v5968_v17 = vpack.c.bf16 %v3117_v50, %v3101_v8  ;;  %v886_v27 = vpop.f32.mrb[54].mxu0  ;;  %2103 = vmatprep.mubr.f32.mxu1 %v4847_v3  ;;  %v1140_v14 = vadd.f32 %v1139_v51, %v5951_v7  ;;  %7470 = vst [vmem:[#allocation53_spill] sm:$0xff] %v5985_v35 }
 0x15a   : > { %7468 = vst [vmem:[#allocation51_spill] sm:$0xff] %v5964_v28  ;;  %v887_v20 = vadd.f32 %v886_v27, %v5961_v40  ;;  %v888_v52 = vpop.f32.mrb[55].mxu0  ;;  %4123 = vmatmul.mubr.msk.f32.gmra.mrb[160].mxu0 %vm528_vm1, %v4789_v23  ;;  %v3131_v28 = vmax.f32 %v883_v43, 0.0 }
 0x15b   : > { %7469 = vst [vmem:[#allocation52_spill] sm:$0xff] %v5968_v17  ;;  %v889_v13 = vadd.f32 %v888_v52, %v5961_v40  ;;  %v1143_v15 = vpop.f32.mrb[54].mxu1  ;;  %1852 = vmatprep.mubr.f32.mxu0 %v4847_v3  ;;  %v3132_v52 = vmax.f32 %v1138_v32, 0.0  ;;  %v3133_v43 = vmax.f32 %v1140_v14, 0.0 }
 0x15c   : > { %v3146_v8 = vmax.f32 %v887_v20, 0.0  ;;  %v1144_v50 = vadd.f32 %v1143_v15, %v5961_v40  ;;  %v1145_v27 = vpop.f32.mrb[55].mxu1  ;;  %4157 = vmatmul.mubr.msk.f32.gmra.mrb[160].mxu1 %vm528_vm1, %v4789_v23 }
 0x15d   : > { %v3147_v33 = vmax.f32 %v889_v13, 0.0  ;;  %v1146_v17 = vadd.f32 %v1145_v27, %v5961_v40  ;;  %v892_v34 = vpop.f32.mrb[56].mxu0  ;;  %2109 = vmatprep.mubr.f32.mxu1 %v4847_v3  ;;  %v5995_v27 = vpop.permute.xlu1 %443 }
 0x15e   : > { %v5987_v51 = vpack.c.bf16 %v3146_v8, %v3130_v11  ;;  %v3148_v7 = vmax.f32 %v1144_v50, 0.0  ;;  %4124 = vmatmul.mubr.msk.f32.gmra.mrb[162].mxu0 %vm528_vm1, %v4790_v4  ;;  %v894_v20 = vpop.f32.mrb[57].mxu0  ;;  %7473 = vst [vmem:[#allocation56_spill] sm:$0xff] %v5995_v27  ;;  %v893_v8 = vadd.f32 %v892_v34, %v5985_v35 }
 0x15f   : > { %v5993_v23 = vpack.c.bf16 %v3147_v33, %v3131_v28  ;;  %v3149_v13 = vmax.f32 %v1146_v17, 0.0  ;;  %v1149_v15 = vpop.f32.mrb[56].mxu1  ;;  %1858 = vmatprep.mubr.f32.mxu0 %v4847_v3  ;;  %v895_v40 = vadd.f32 %v894_v20, %v5985_v35 }
 0x160   : > { %7471 = vst [vmem:[#allocation54_spill] sm:$0xff] %v5987_v51  ;;  %v5998_v11 = vpack.c.bf16 %v3148_v7, %v3132_v52  ;;  %v1151_v32 = vpop.f32.mrb[57].mxu1  ;;  %4158 = vmatmul.mubr.msk.f32.gmra.mrb[162].mxu1 %vm528_vm1, %v4790_v4  ;;  %v4791_v7 = vld [vmem:[%s7327_s1 + $0x90] sm:$0xff]  ;;  %v1150_v17 = vadd.f32 %v1149_v15, %v5985_v35  ;;  %v3162_v20 = vmax.f32 %v893_v8, 0.0  ;;  %v6019_v15 = vpop.permute.xlu0 %448  ;;  %v4792_v8 = vld [vmem:[%s7327_s1 + $0x98] sm:$0xff] }
 0x161   : > { %7472 = vst [vmem:[#allocation55_spill] sm:$0xff] %v5993_v23  ;;  %v6002_v50 = vpack.c.bf16 %v3149_v13, %v3133_v43  ;;  %v898_v14 = vpop.f32.mrb[58].mxu0  ;;  %2115 = vmatprep.mubr.f32.mxu1 %v4847_v3  ;;  %v1152_v34 = vadd.f32 %v1151_v32, %v5985_v35  ;;  %7476 = vst [vmem:[#allocation59_spill] sm:$0xff] %v6019_v15 }
 0x162   : > { %7474 = vst [vmem:[#allocation57_spill] sm:$0xff] %v5998_v11  ;;  %v899_v33 = vadd.f32 %v898_v14, %v5995_v27  ;;  %v900_v28 = vpop.f32.mrb[59].mxu0  ;;  %4125 = vmatmul.mubr.msk.f32.gmra.mrb[164].mxu0 %vm528_vm1, %v4791_v7  ;;  %v3163_v11 = vmax.f32 %v895_v40, 0.0 }
 0x163   : > { %7475 = vst [vmem:[#allocation58_spill] sm:$0xff] %v6002_v50  ;;  %v901_v52 = vadd.f32 %v900_v28, %v5995_v27  ;;  %v1155_v4 = vpop.f32.mrb[58].mxu1  ;;  %1864 = vmatprep.mubr.f32.mxu0 %v4847_v3  ;;  %v3164_v28 = vmax.f32 %v1150_v17, 0.0  ;;  %v3165_v40 = vmax.f32 %v1152_v34, 0.0 }
 0x164   : > { %v3178_v43 = vmax.f32 %v899_v33, 0.0  ;;  %v1156_v13 = vadd.f32 %v1155_v4, %v5995_v27  ;;  %v1157_v14 = vpop.f32.mrb[59].mxu1  ;;  %4159 = vmatmul.mubr.msk.f32.gmra.mrb[164].mxu1 %vm528_vm1, %v4791_v7 }
 0x165   : > { %v3179_v51 = vmax.f32 %v901_v52, 0.0  ;;  %v1158_v50 = vadd.f32 %v1157_v14, %v5995_v27  ;;  %v904_v23 = vpop.f32.mrb[60].mxu0  ;;  %2121 = vmatprep.mubr.f32.mxu1 %v4847_v3  ;;  %v6029_v14 = vpop.permute.xlu1 %453 }
 0x166   : > { %v6021_v32 = vpack.c.bf16 %v3178_v43, %v3162_v20  ;;  %v3180_v35 = vmax.f32 %v1156_v13, 0.0  ;;  %4126 = vmatmul.mubr.msk.f32.gmra.mrb[166].mxu0 %vm528_vm1, %v4792_v8  ;;  %v906_v33 = vpop.f32.mrb[61].mxu0  ;;  %7479 = vst [vmem:[#allocation62_spill] sm:$0xff] %v6029_v14  ;;  %v905_v43 = vadd.f32 %v904_v23, %v6019_v15 }
 0x167   : > { %v6027_v7 = vpack.c.bf16 %v3179_v51, %v3163_v11  ;;  %v3181_v52 = vmax.f32 %v1158_v50, 0.0  ;;  %v1161_v4 = vpop.f32.mrb[60].mxu1  ;;  %1870 = vmatprep.mubr.f32.mxu0 %v4847_v3  ;;  %v907_v27 = vadd.f32 %v906_v33, %v6019_v15 }
 0x168   : > { %7477 = vst [vmem:[#allocation60_spill] sm:$0xff] %v6021_v32  ;;  %v6032_v20 = vpack.c.bf16 %v3180_v35, %v3164_v28  ;;  %v1163_v17 = vpop.f32.mrb[61].mxu1  ;;  %4160 = vmatmul.mubr.msk.f32.gmra.mrb[166].mxu1 %vm528_vm1, %v4792_v8  ;;  %v4793_v35 = vld [vmem:[%s7327_s1 + $0xa0] sm:$0xff]  ;;  %v1162_v50 = vadd.f32 %v1161_v4, %v6019_v15  ;;  %v3194_v33 = vmax.f32 %v905_v43, 0.0  ;;  %v4794_v43 = vld [vmem:[%s7327_s1 + $0xa8] sm:$0xff] }
 0x169   : > { %7478 = vst [vmem:[#allocation61_spill] sm:$0xff] %v6027_v7  ;;  %v6036_v13 = vpack.c.bf16 %v3181_v52, %v3165_v40  ;;  %v910_v34 = vpop.f32.mrb[62].mxu0  ;;  %2127 = vmatprep.mubr.f32.mxu1 %v4847_v3  ;;  %v1164_v23 = vadd.f32 %v1163_v17, %v6019_v15 }
 0x16a   : > { %7480 = vst [vmem:[#allocation63_spill] sm:$0xff] %v6032_v20  ;;  %v911_v51 = vadd.f32 %v910_v34, %v6029_v14  ;;  %v912_v11 = vpop.f32.mrb[63].mxu0  ;;  %4127 = vmatmul.mubr.msk.f32.gmra.mrb[168].mxu0 %vm528_vm1, %v4793_v35  ;;  %v3195_v20 = vmax.f32 %v907_v27, 0.0  ;;  %v3196_v17 = vmax.f32 %v1162_v50, 0.0 }
 0x16b   : > { %7481 = vst [vmem:[#allocation64_spill] sm:$0xff] %v6036_v13  ;;  %v913_v28 = vadd.f32 %v912_v11, %v6029_v14  ;;  %v1167_v8 = vpop.f32.mrb[62].mxu1  ;;  %1876 = vmatprep.mubr.f32.mxu0 %v4847_v3 }
 0x16c   : > { %v3210_v40 = vmax.f32 %v911_v51, 0.0  ;;  %v1168_v52 = vadd.f32 %v1167_v8, %v6029_v14  ;;  %v1169_v34 = vpop.f32.mrb[63].mxu1  ;;  %4161 = vmatmul.mubr.msk.f32.gmra.mrb[168].mxu1 %vm528_vm1, %v4793_v35  ;;  %v3197_v8 = vmax.f32 %v1164_v23, 0.0  ;;  %v4795_v23 = vld [vmem:[%s7327_s1 + $0xb0] sm:$0xff] }
 0x16d   : > { %v3211_v32 = vmax.f32 %v913_v28, 0.0  ;;  %v1170_v13 = vadd.f32 %v1169_v34, %v6029_v14  ;;  %v1238_v7 = vpop.f32.mrb[64].mxu0  ;;  %2133 = vmatprep.mubr.f32.mxu1 %v4847_v3 }
 0x16e   : > { %v6053_v4 = vpack.c.bf16 %v3210_v40, %v3194_v33  ;;  %v3212_v11 = vmax.f32 %v1168_v52, 0.0  ;;  %4128 = vmatmul.mubr.msk.f32.gmra.mrb[170].mxu0 %vm528_vm1, %v4794_v43  ;;  %v1240_v51 = vpop.f32.mrb[65].mxu0  ;;  %v1239_v33 = vadd.f32 %v1238_v7, %v5516_v24 }
 0x16f   : > { %v6059_v35 = vpack.c.bf16 %v3211_v32, %v3195_v20  ;;  %v3213_v27 = vmax.f32 %v1170_v13, 0.0  ;;  %v1495_v28 = vpop.f32.mrb[64].mxu1  ;;  %1882 = vmatprep.mubr.f32.mxu0 %v4847_v3  ;;  %v1241_v52 = vadd.f32 %v1240_v51, %v5516_v24 }
 0x170   : > { %v6062_v34 = vpack.c.bf16 %v3212_v11, %v3196_v17  ;;  %v1497_v50 = vpop.f32.mrb[65].mxu1  ;;  %4162 = vmatmul.mubr.msk.f32.gmra.mrb[170].mxu1 %vm528_vm1, %v4794_v43  ;;  %v1496_v32 = vadd.f32 %v1495_v28, %v5516_v24  ;;  %v2718_v43 = vmax.f32 %v1239_v33, 0.0  ;;  %v4796_v33 = vld [vmem:[%s7327_s1 + $0xb8] sm:$0xff] }
 0x171   : > { %v6066_v40 = vpack.c.bf16 %v3213_v27, %v3197_v8  ;;  %v1244_v14 = vpop.f32.mrb[66].mxu0  ;;  %2139 = vmatprep.mubr.f32.mxu1 %v4847_v3  ;;  %v1498_v7 = vadd.f32 %v1497_v50, %v5516_v24 }
 0x172   : > { %7482 = vst [vmem:[#allocation65_spill] sm:$0xff] %v6062_v34  ;;  %v1245_v20 = vadd.f32 %v1244_v14, %v5526_v36  ;;  %v1246_v13 = vpop.f32.mrb[67].mxu0  ;;  %4129 = vmatmul.mubr.msk.f32.gmra.mrb[172].mxu0 %vm528_vm1, %v4795_v23  ;;  %v2719_v14 = vmax.f32 %v1241_v52, 0.0  ;;  %v2720_v50 = vmax.f32 %v1496_v32, 0.0 }
 0x173   : > { %v1247_v17 = vadd.f32 %v1246_v13, %v5526_v36  ;;  %v1501_v11 = vpop.f32.mrb[66].mxu1  ;;  %1888 = vmatprep.mubr.f32.mxu0 %v4847_v3 }
 0x174   : > { %v2734_v51 = vmax.f32 %v1245_v20, 0.0  ;;  %v1502_v8 = vadd.f32 %v1501_v11, %v5526_v36  ;;  %v1503_v27 = vpop.f32.mrb[67].mxu1  ;;  %4163 = vmatmul.mubr.msk.f32.gmra.mrb[172].mxu1 %vm528_vm1, %v4795_v23  ;;  %v2721_v11 = vmax.f32 %v1498_v7, 0.0 }
 0x175   : > { %v2735_v28 = vmax.f32 %v1247_v17, 0.0  ;;  %v1504_v15 = vadd.f32 %v1503_v27, %v5526_v36  ;;  %v1250_v34 = vpop.f32.mrb[68].mxu0  ;;  %2145 = vmatprep.mubr.f32.mxu1 %v4847_v3 }
 0x176   : > { %v6083_v24 = vpack.c.bf16 %v2734_v51, %v2718_v43  ;;  %v2736_v13 = vmax.f32 %v1502_v8, 0.0  ;;  %4130 = vmatmul.mubr.msk.f32.gmra.mrb[174].mxu0 %vm528_vm1, %v4796_v33  ;;  %v1252_v20 = vpop.f32.mrb[69].mxu0  ;;  %v1251_v32 = vadd.f32 %v1250_v34, %v5534_v44 }
 0x177   : > { %v6089_v23 = vpack.c.bf16 %v2735_v28, %v2719_v14  ;;  %v2737_v52 = vmax.f32 %v1504_v15, 0.0  ;;  %v1507_v17 = vpop.f32.mrb[68].mxu1  ;;  %1894 = vmatprep.mubr.f32.mxu0 %v4847_v3  ;;  %v1253_v8 = vadd.f32 %v1252_v20, %v5534_v44  ;;  %v4797_v28 = vld [vmem:[%s7327_s1 + $0xc0] sm:$0xff] }
 0x178   : > { %7483 = vst [vmem:[#allocation66_spill] sm:$0xff] %v6083_v24  ;;  %v6092_v27 = vpack.c.bf16 %v2736_v13, %v2720_v50  ;;  %v1509_v43 = vpop.f32.mrb[69].mxu1  ;;  %4164 = vmatmul.mubr.msk.f32.gmra.mrb[174].mxu1 %vm528_vm1, %v4796_v33  ;;  %v1508_v7 = vadd.f32 %v1507_v17, %v5534_v44  ;;  %v2750_v33 = vmax.f32 %v1251_v32, 0.0  ;;  %v4798_v32 = vld [vmem:[%s7327_s1 + $0xc8] sm:$0xff] }
 0x179   : > { %v6096_v51 = vpack.c.bf16 %v2737_v52, %v2721_v11  ;;  %v1256_v24 = vpop.f32.mrb[70].mxu0  ;;  %2151 = vmatprep.mubr.f32.mxu1 %v4847_v3  ;;  %v1510_v34 = vadd.f32 %v1509_v43, %v5534_v44 }
 0x17a   : > { %7484 = vst [vmem:[#allocation67_spill] sm:$0xff] %v6092_v27  ;;  %v1257_v15 = vadd.f32 %v1256_v24, %v5552_v2  ;;  %v1258_v14 = vpop.f32.mrb[71].mxu0  ;;  %4131 = vmatmul.mubr.msk.f32.gmra.mrb[176].mxu0 %vm528_vm1, %v4797_v28  ;;  %v2751_v24 = vmax.f32 %v1253_v8, 0.0  ;;  %v2752_v43 = vmax.f32 %v1508_v7, 0.0 }
 0x17b   : > { %v1259_v50 = vadd.f32 %v1258_v14, %v5552_v2  ;;  %v1513_v13 = vpop.f32.mrb[70].mxu1  ;;  %1900 = vmatprep.mubr.f32.mxu0 %v4847_v3 }
 0x17c   : > { %v2766_v20 = vmax.f32 %v1257_v15, 0.0  ;;  %v1514_v11 = vadd.f32 %v1513_v13, %v5552_v2  ;;  %v1515_v52 = vpop.f32.mrb[71].mxu1  ;;  %4165 = vmatmul.mubr.msk.f32.gmra.mrb[176].mxu1 %vm528_vm1, %v4797_v28  ;;  %v2753_v13 = vmax.f32 %v1510_v34, 0.0 }
 0x17d   : > { %v2767_v17 = vmax.f32 %v1259_v50, 0.0  ;;  %v1516_v27 = vadd.f32 %v1515_v52, %v5552_v2  ;;  %v1262_v36 = vpop.f32.mrb[72].mxu0  ;;  %2157 = vmatprep.mubr.f32.mxu1 %v4847_v3 }
 0x17e   : > { %v6113_v44 = vpack.c.bf16 %v2766_v20, %v2750_v33  ;;  %v2768_v14 = vmax.f32 %v1514_v11, 0.0  ;;  %4132 = vmatmul.mubr.msk.f32.gmra.mrb[178].mxu0 %vm528_vm1, %v4798_v32  ;;  %v1264_v15 = vpop.f32.mrb[73].mxu0  ;;  %v1263_v7 = vadd.f32 %v1262_v36, %v5578_v30 }
 0x17f   : > { %v6119_v28 = vpack.c.bf16 %v2767_v17, %v2751_v24  ;;  %v2769_v8 = vmax.f32 %v1516_v27, 0.0  ;;  %v1519_v50 = vpop.f32.mrb[72].mxu1  ;;  %1906 = vmatprep.mubr.f32.mxu0 %v4847_v3  ;;  %v1265_v11 = vadd.f32 %v1264_v15, %v5578_v30  ;;  %v4799_v17 = vld [vmem:[%s7327_s1 + $0xd0] sm:$0xff] }
 0x180   : > { %7485 = vst [vmem:[#allocation68_spill] sm:$0xff] %v6113_v44  ;;  %v6122_v52 = vpack.c.bf16 %v2768_v14, %v2752_v43  ;;  %v1521_v33 = vpop.f32.mrb[73].mxu1  ;;  %4166 = vmatmul.mubr.msk.f32.gmra.mrb[178].mxu1 %vm528_vm1, %v4798_v32  ;;  %v1520_v34 = vadd.f32 %v1519_v50, %v5578_v30  ;;  %v2782_v32 = vmax.f32 %v1263_v7, 0.0  ;;  %v4800_v7 = vld [vmem:[%s7327_s1 + $0xd8] sm:$0xff] }
 0x181   : > { %7486 = vst [vmem:[#allocation69_spill] sm:$0xff] %v6119_v28  ;;  %v6126_v20 = vpack.c.bf16 %v2769_v8, %v2753_v13  ;;  %v1268_v44 = vpop.f32.mrb[74].mxu0  ;;  %2163 = vmatprep.mubr.f32.mxu1 %v4847_v3  ;;  %v1522_v36 = vadd.f32 %v1521_v33, %v5578_v30 }
 0x182   : > { %7487 = vst [vmem:[#allocation70_spill] sm:$0xff] %v6122_v52  ;;  %v1269_v27 = vadd.f32 %v1268_v44, %v5584_v46  ;;  %v1270_v24 = vpop.f32.mrb[75].mxu0  ;;  %4133 = vmatmul.mubr.msk.f32.gmra.mrb[180].mxu0 %vm528_vm1, %v4799_v17  ;;  %v2783_v44 = vmax.f32 %v1265_v11, 0.0  ;;  %v2784_v33 = vmax.f32 %v1520_v34, 0.0 }
 0x183   : > { %7488 = vst [vmem:[#allocation71_spill] sm:$0xff] %v6126_v20  ;;  %v1271_v43 = vadd.f32 %v1270_v24, %v5584_v46  ;;  %v1525_v14 = vpop.f32.mrb[74].mxu1  ;;  %1912 = vmatprep.mubr.f32.mxu0 %v4847_v3 }
 0x184   : > { %v2798_v15 = vmax.f32 %v1269_v27, 0.0  ;;  %v1526_v13 = vadd.f32 %v1525_v14, %v5584_v46  ;;  %v1527_v8 = vpop.f32.mrb[75].mxu1  ;;  %4167 = vmatmul.mubr.msk.f32.gmra.mrb[180].mxu1 %vm528_vm1, %v4799_v17  ;;  %v2785_v14 = vmax.f32 %v1522_v36, 0.0 }
 0x185   : > { %v2799_v50 = vmax.f32 %v1271_v43, 0.0  ;;  %v1528_v52 = vadd.f32 %v1527_v8, %v5584_v46  ;;  %v1274_v20 = vpop.f32.mrb[76].mxu0  ;;  %2169 = vmatprep.mubr.f32.mxu1 %v4847_v3 }
 0x186   : > { %v6143_v28 = vpack.c.bf16 %v2798_v15, %v2782_v32  ;;  %v2800_v24 = vmax.f32 %v1526_v13, 0.0  ;;  %4134 = vmatmul.mubr.msk.f32.gmra.mrb[182].mxu0 %vm528_vm1, %v4800_v7  ;;  %v1276_v27 = vpop.f32.mrb[77].mxu0  ;;  %v1275_v34 = vadd.f32 %v1274_v20, %v5610_v9 }
 0x187   : > { %v6149_v17 = vpack.c.bf16 %v2799_v50, %v2783_v44  ;;  %v2801_v11 = vmax.f32 %v1528_v52, 0.0  ;;  %v1531_v43 = vpop.f32.mrb[76].mxu1  ;;  %1918 = vmatprep.mubr.f32.mxu0 %v4847_v3  ;;  %v1277_v13 = vadd.f32 %v1276_v27, %v5610_v9  ;;  %v4801_v50 = vld [vmem:[%s7327_s1 + $0xe0] sm:$0xff] }
 0x188   : > { %7489 = vst [vmem:[#allocation72_spill] sm:$0xff] %v6143_v28  ;;  %v6152_v8 = vpack.c.bf16 %v2800_v24, %v2784_v33  ;;  %v1533_v32 = vpop.f32.mrb[77].mxu1  ;;  %4168 = vmatmul.mubr.msk.f32.gmra.mrb[182].mxu1 %vm528_vm1, %v4800_v7  ;;  %v1532_v36 = vadd.f32 %v1531_v43, %v5610_v9  ;;  %v2814_v7 = vmax.f32 %v1275_v34, 0.0  ;;  %v4802_v34 = vld [vmem:[%s7327_s1 + $0xe8] sm:$0xff] }
 0x189   : > { %7490 = vst [vmem:[#allocation73_spill] sm:$0xff] %v6149_v17  ;;  %v6156_v15 = vpack.c.bf16 %v2801_v11, %v2785_v14  ;;  %v1280_v28 = vpop.f32.mrb[78].mxu0  ;;  %2175 = vmatprep.mubr.f32.mxu1 %v4847_v3  ;;  %v1534_v20 = vadd.f32 %v1533_v32, %v5610_v9 }
 0x18a   : > { %7491 = vst [vmem:[#allocation74_spill] sm:$0xff] %v6152_v8  ;;  %v1281_v52 = vadd.f32 %v1280_v28, %v5618_v18  ;;  %v1282_v44 = vpop.f32.mrb[79].mxu0  ;;  %4135 = vmatmul.mubr.msk.f32.gmra.mrb[184].mxu0 %vm528_vm1, %v4801_v50  ;;  %v2815_v28 = vmax.f32 %v1277_v13, 0.0  ;;  %v2816_v32 = vmax.f32 %v1532_v36, 0.0 }
 0x18b   : > { %7492 = vst [vmem:[#allocation75_spill] sm:$0xff] %v6156_v15  ;;  %v1283_v33 = vadd.f32 %v1282_v44, %v5618_v18  ;;  %v1537_v24 = vpop.f32.mrb[78].mxu1  ;;  %1924 = vmatprep.mubr.f32.mxu0 %v4847_v3 }
 0x18c   : > { %v2830_v27 = vmax.f32 %v1281_v52, 0.0  ;;  %v1538_v14 = vadd.f32 %v1537_v24, %v5618_v18  ;;  %v1539_v11 = vpop.f32.mrb[79].mxu1  ;;  %4169 = vmatmul.mubr.msk.f32.gmra.mrb[184].mxu1 %vm528_vm1, %v4801_v50  ;;  %v2817_v24 = vmax.f32 %v1534_v20, 0.0 }
 0x18d   : > { %v2831_v43 = vmax.f32 %v1283_v33, 0.0  ;;  %v1540_v8 = vadd.f32 %v1539_v11, %v5618_v18  ;;  %v1286_v15 = vpop.f32.mrb[80].mxu0  ;;  %2181 = vmatprep.mubr.f32.mxu1 %v4847_v3 }
 0x18e   : > { %v6173_v17 = vpack.c.bf16 %v2830_v27, %v2814_v7  ;;  %v2832_v44 = vmax.f32 %v1538_v14, 0.0  ;;  %4136 = vmatmul.mubr.msk.f32.gmra.mrb[186].mxu0 %vm528_vm1, %v4802_v34  ;;  %v1288_v52 = vpop.f32.mrb[81].mxu0  ;;  %v1287_v36 = vadd.f32 %v1286_v15, %v5642_v56 }
 0x18f   : > { %v6179_v50 = vpack.c.bf16 %v2831_v43, %v2815_v28  ;;  %v2833_v13 = vmax.f32 %v1540_v8, 0.0  ;;  %v1543_v33 = vpop.f32.mrb[80].mxu1  ;;  %1930 = vmatprep.mubr.f32.mxu0 %v4847_v3  ;;  %v1289_v14 = vadd.f32 %v1288_v52, %v5642_v56  ;;  %v4803_v43 = vld [vmem:[%s7327_s1 + $0xf0] sm:$0xff] }
 0x190   : > { %7493 = vst [vmem:[#allocation76_spill] sm:$0xff] %v6173_v17  ;;  %v6182_v11 = vpack.c.bf16 %v2832_v44, %v2816_v32  ;;  %v1545_v7 = vpop.f32.mrb[81].mxu1  ;;  %4170 = vmatmul.mubr.msk.f32.gmra.mrb[186].mxu1 %vm528_vm1, %v4802_v34  ;;  %v1544_v20 = vadd.f32 %v1543_v33, %v5642_v56  ;;  %v2846_v34 = vmax.f32 %v1287_v36, 0.0  ;;  %v4804_v36 = vld [vmem:[%s7327_s1 + $0xf8] sm:$0xff] }
 0x191   : > { %7494 = vst [vmem:[#allocation77_spill] sm:$0xff] %v6179_v50  ;;  %v6186_v27 = vpack.c.bf16 %v2833_v13, %v2817_v24  ;;  %v1292_v17 = vpop.f32.mrb[82].mxu0  ;;  %2187 = vmatprep.mubr.f32.mxu1 %v4847_v3  ;;  %v1546_v15 = vadd.f32 %v1545_v7, %v5642_v56 }
 0x192   : > { %7495 = vst [vmem:[#allocation78_spill] sm:$0xff] %v6182_v11  ;;  %v1293_v8 = vadd.f32 %v1292_v17, %v5650_v0  ;;  %v1294_v28 = vpop.f32.mrb[83].mxu0  ;;  %4137 = vmatmul.mubr.msk.f32.gmra.mrb[188].mxu0 %vm528_vm1, %v4803_v43  ;;  %v2847_v17 = vmax.f32 %v1289_v14, 0.0  ;;  %v2848_v7 = vmax.f32 %v1544_v20, 0.0 }
 0x193   : > { %7496 = vst [vmem:[#allocation79_spill] sm:$0xff] %v6186_v27  ;;  %v1295_v32 = vadd.f32 %v1294_v28, %v5650_v0  ;;  %v1549_v44 = vpop.f32.mrb[82].mxu1  ;;  %1936 = vmatprep.mubr.f32.mxu0 %v4847_v3 }
 0x194   : > { %v2862_v52 = vmax.f32 %v1293_v8, 0.0  ;;  %v1550_v24 = vadd.f32 %v1549_v44, %v5650_v0  ;;  %v1551_v13 = vpop.f32.mrb[83].mxu1  ;;  %4171 = vmatmul.mubr.msk.f32.gmra.mrb[188].mxu1 %vm528_vm1, %v4803_v43  ;;  %v2849_v44 = vmax.f32 %v1546_v15, 0.0 }
 0x195   : > { %v2863_v33 = vmax.f32 %v1295_v32, 0.0  ;;  %v1552_v11 = vadd.f32 %v1551_v13, %v5650_v0  ;;  %v1298_v27 = vpop.f32.mrb[84].mxu0  ;;  %2193 = vmatprep.mubr.f32.mxu1 %v4847_v3 }
 0x196   : > { %v6203_v50 = vpack.c.bf16 %v2862_v52, %v2846_v34  ;;  %v2864_v28 = vmax.f32 %v1550_v24, 0.0  ;;  %4138 = vmatmul.mubr.msk.f32.gmra.mrb[190].mxu0 %vm528_vm1, %v4804_v36  ;;  %v1300_v8 = vpop.f32.mrb[85].mxu0  ;;  %v1299_v20 = vadd.f32 %v1298_v27, %v5674_v45 }
 0x197   : > { %v6209_v43 = vpack.c.bf16 %v2863_v33, %v2847_v17  ;;  %v2865_v14 = vmax.f32 %v1552_v11, 0.0  ;;  %v1555_v32 = vpop.f32.mrb[84].mxu1  ;;  %2264 = vmatprep.mubr.f32.mxu0 %v4847_v3  ;;  %v1301_v24 = vadd.f32 %v1300_v8, %v5674_v45  ;;  %v4805_v33 = vld [vmem:[%s7327_s1] sm:$0xff] }
 0x198   : > { %7497 = vst [vmem:[#allocation80_spill] sm:$0xff] %v6203_v50  ;;  %v6212_v13 = vpack.c.bf16 %v2864_v28, %v2848_v7  ;;  %v1557_v34 = vpop.f32.mrb[85].mxu1  ;;  %4172 = vmatmul.mubr.msk.f32.gmra.mrb[190].mxu1 %vm528_vm1, %v4804_v36  ;;  %v1556_v15 = vadd.f32 %v1555_v32, %v5674_v45  ;;  %v2878_v36 = vmax.f32 %v1299_v20, 0.0 }
 0x199   : > { %v6216_v52 = vpack.c.bf16 %v2865_v14, %v2849_v44  ;;  %v1304_v50 = vpop.f32.mrb[86].mxu0  ;;  %2521 = vmatprep.mubr.f32.mxu1 %v4847_v3  ;;  %v1558_v27 = vadd.f32 %v1557_v34, %v5674_v45  ;;  %v2879_v14 = vmax.f32 %v1301_v24, 0.0 }
 0x19a   : > { %7498 = vst [vmem:[#allocation81_spill] sm:$0xff] %v6212_v13  ;;  %v1305_v11 = vadd.f32 %v1304_v50, %v5682_v22  ;;  %v1306_v17 = vpop.f32.mrb[87].mxu0  ;;  %4175 = vmatmul.mubr.msk.f32.vlgmr.msra.gmra.mrb[192].mxu0 %vm528_vm1, %v4805_v33 }
 0x19b   : > { %v1307_v7 = vadd.f32 %v1306_v17, %v5682_v22  ;;  %4247 = vmatpush1.bf16.msra.mxu0 %v5548_v60  ;;  %v1561_v28 = vpop.f32.mrb[86].mxu1  ;;  %2270 = vmatprep.mubr.f32.mxu0 %v4847_v3  ;;  %v2880_v60 = vmax.f32 %v1556_v15, 0.0 }
 0x19c   : > { %v2894_v8 = vmax.f32 %v1305_v11, 0.0  ;;  %v1562_v50 = vadd.f32 %v1561_v28, %v5682_v22  ;;  %4249 = vmatprep.subr.bf16.mxu0 %v5587_v47  ;;  %v1563_v44 = vpop.f32.mrb[87].mxu1  ;;  %4209 = vmatmul.mubr.msk.f32.vlgmr.msra.gmra.mrb[192].mxu1 %vm528_vm1, %v4805_v33  ;;  %v4806_v47 = vld [vmem:[%s7327_s1 + $0x8] sm:$0xff]  ;;  %v2881_v11 = vmax.f32 %v1558_v27, 0.0 }
 0x19d   : > { %v2895_v32 = vmax.f32 %v1307_v7, 0.0  ;;  %v1564_v34 = vadd.f32 %v1563_v44, %v5682_v22  ;;  %4311 = vmatpush1.bf16.msra.mxu1 %v5557_v5  ;;  %v1310_v17 = vpop.f32.mrb[88].mxu0  ;;  %2527 = vmatprep.mubr.f32.mxu1 %v4847_v3 }
 0x19e   : > { %v6236_v13 = vpack.c.bf16 %v2894_v8, %v2878_v36  ;;  %v2896_v20 = vmax.f32 %v1562_v50, 0.0  ;;  %4313 = vmatprep.subr.bf16.mxu1 %v5596_v53  ;;  %4176 = vmatmul.mubr.msk.f32.gmra.mrb[194].mxu0 %vm528_vm1, %v4806_v47  ;;  %v1312_v24 = vpop.f32.mrb[89].mxu0  ;;  %v1311_v53 = vadd.f32 %v1310_v17, %v5712_v41 }
 0x19f   : > { %v6243_v33 = vpack.c.bf16 %v2895_v32, %v2879_v14  ;;  %v2897_v5 = vmax.f32 %v1564_v34, 0.0  ;;  %4251 = vmatpush1.bf16.msra.mxu0 %v5580_v39  ;;  %v1567_v7 = vpop.f32.mrb[88].mxu1  ;;  %2276 = vmatprep.mubr.f32.mxu0 %v4847_v3  ;;  %v1313_v27 = vadd.f32 %v1312_v24, %v5712_v41 }
 0x1a0   : > { %v6247_v15 = vpack.c.bf16 %v2896_v20, %v2880_v60  ;;  %4253 = vmatprep.subr.bf16.mxu0 %v5616_v16  ;;  %v1569_v28 = vpop.f32.mrb[89].mxu1  ;;  %4210 = vmatmul.mubr.msk.f32.gmra.mrb[194].mxu1 %vm528_vm1, %v4806_v47  ;;  %v1568_v39 = vadd.f32 %v1567_v7, %v5712_v41  ;;  %v4807_v16 = vld [vmem:[%s7327_s1 + $0x10] sm:$0xff]  ;;  %v2910_v34 = vmax.f32 %v1311_v53, 0.0 }
 0x1a1   : > { %v6252_v36 = vpack.c.bf16 %v2897_v5, %v2881_v11  ;;  %4315 = vmatpush1.bf16.msra.mxu1 %v5589_v48  ;;  %v1316_v8 = vpop.f32.mrb[90].mxu0  ;;  %2533 = vmatprep.mubr.f32.mxu1 %v4847_v3  ;;  %v1570_v14 = vadd.f32 %v1569_v28, %v5712_v41  ;;  %v2911_v20 = vmax.f32 %v1313_v27, 0.0 }
 0x1a2   : > { %v1317_v50 = vadd.f32 %v1316_v8, %v5723_v29  ;;  %4317 = vmatprep.subr.bf16.mxu1 %v5626_v37  ;;  %v1318_v44 = vpop.f32.mrb[91].mxu0  ;;  %4177 = vmatmul.mubr.msk.f32.gmra.mrb[196].mxu0 %vm528_vm1, %v4807_v16 }
 0x1a3   : > { %v1319_v48 = vadd.f32 %v1318_v44, %v5723_v29  ;;  %4255 = vmatpush1.bf16.msra.mxu0 %v5612_v10  ;;  %v1573_v32 = vpop.f32.mrb[90].mxu1  ;;  %2282 = vmatprep.mubr.f32.mxu0 %v4847_v3  ;;  %v2912_v10 = vmax.f32 %v1568_v39, 0.0  ;;  %v2913_v28 = vmax.f32 %v1570_v14, 0.0 }
 0x1a4   : > { %v2926_v17 = vmax.f32 %v1317_v50, 0.0  ;;  %v1574_v37 = vadd.f32 %v1573_v32, %v5723_v29  ;;  %4257 = vmatprep.subr.bf16.mxu0 %v5648_v62  ;;  %v1575_v60 = vpop.f32.mrb[91].mxu1  ;;  %4211 = vmatmul.mubr.msk.f32.gmra.mrb[196].mxu1 %vm528_vm1, %v4807_v16  ;;  %v4808_v62 = vld [vmem:[%s7327_s1 + $0x18] sm:$0xff] }
 0x1a5   : > { %v2927_v47 = vmax.f32 %v1319_v48, 0.0  ;;  %v1576_v24 = vadd.f32 %v1575_v60, %v5723_v29  ;;  %4319 = vmatpush1.bf16.msra.mxu1 %v5621_v19  ;;  %v1322_v11 = vpop.f32.mrb[92].mxu0  ;;  %2539 = vmatprep.mubr.f32.mxu1 %v4847_v3 }
 0x1a6   : > { %v6274_v5 = vpack.c.bf16 %v2926_v17, %v2910_v34  ;;  %v2928_v7 = vmax.f32 %v1574_v37, 0.0  ;;  %4321 = vmatprep.subr.bf16.mxu1 %v5658_v12  ;;  %4178 = vmatmul.mubr.msk.f32.gmra.mrb[198].mxu0 %vm528_vm1, %v4808_v62  ;;  %v1324_v53 = vpop.f32.mrb[93].mxu0  ;;  %v1323_v12 = vadd.f32 %v1322_v11, %v5747_v25 }
 0x1a7   : > { %v6281_v27 = vpack.c.bf16 %v2927_v47, %v2911_v20  ;;  %v2929_v19 = vmax.f32 %v1576_v24, 0.0  ;;  %4259 = vmatpush1.bf16.msra.mxu0 %v5644_v57  ;;  %v1579_v8 = vpop.f32.mrb[92].mxu1  ;;  %2288 = vmatprep.mubr.f32.mxu0 %v4847_v3  ;;  %v1325_v16 = vadd.f32 %v1324_v53, %v5747_v25 }
 0x1a8   : > { %v6285_v39 = vpack.c.bf16 %v2928_v7, %v2912_v10  ;;  %4261 = vmatprep.subr.bf16.mxu0 %v5680_v54  ;;  %v1581_v50 = vpop.f32.mrb[93].mxu1  ;;  %4212 = vmatmul.mubr.msk.f32.gmra.mrb[198].mxu1 %vm528_vm1, %v4808_v62  ;;  %v1580_v57 = vadd.f32 %v1579_v8, %v5747_v25  ;;  %v4809_v54 = vld [vmem:[%s7327_s1 + $0x20] sm:$0xff]  ;;  %v2942_v37 = vmax.f32 %v1323_v12, 0.0 }
 0x1a9   : > { %v6290_v44 = vpack.c.bf16 %v2929_v19, %v2913_v28  ;;  %4323 = vmatpush1.bf16.msra.mxu1 %v5653_v1  ;;  %v1328_v14 = vpop.f32.mrb[94].mxu0  ;;  %2545 = vmatprep.mubr.f32.mxu1 %v4847_v3  ;;  %v1582_v34 = vadd.f32 %v1581_v50, %v5747_v25  ;;  %v2943_v47 = vmax.f32 %v1325_v16, 0.0 }
 0x1aa   : > { %v1329_v48 = vadd.f32 %v1328_v14, %v5757_v6  ;;  %4325 = vmatprep.subr.bf16.mxu1 %v5690_v26  ;;  %v1330_v32 = vpop.f32.mrb[95].mxu0  ;;  %4179 = vmatmul.mubr.msk.f32.gmra.mrb[200].mxu0 %vm528_vm1, %v4809_v54 }
 0x1ab   : > { %v1331_v1 = vadd.f32 %v1330_v32, %v5757_v6  ;;  %4263 = vmatpush1.bf16.msra.mxu0 %v5676_v21  ;;  %v1585_v17 = vpop.f32.mrb[94].mxu1  ;;  %2294 = vmatprep.mubr.f32.mxu0 %v4847_v3  ;;  %v2944_v21 = vmax.f32 %v1580_v57, 0.0  ;;  %v2945_v28 = vmax.f32 %v1582_v34, 0.0  ;;  %v7499_v34 = vld [vmem:[#allocation16_spill] sm:$0xff] }
 0x1ac   : > { %v2958_v60 = vmax.f32 %v1329_v48, 0.0  ;;  %v1586_v26 = vadd.f32 %v1585_v17, %v5757_v6  ;;  %4265 = vmatprep.subr.bf16.mxu0 %v5721_v38  ;;  %v1587_v20 = vpop.f32.mrb[95].mxu1  ;;  %4213 = vmatmul.mubr.msk.f32.gmra.mrb[200].mxu1 %vm528_vm1, %v4809_v54  ;;  %v4810_v38 = vld [vmem:[%s7327_s1 + $0x28] sm:$0xff] }
 0x1ad   : > { %v2959_v24 = vmax.f32 %v1331_v1, 0.0  ;;  %v1588_v11 = vadd.f32 %v1587_v20, %v5757_v6  ;;  %4327 = vmatpush1.bf16.msra.mxu1 %v5685_v58  ;;  %v1334_v10 = vpop.f32.mrb[96].mxu0  ;;  %2551 = vmatprep.mubr.f32.mxu1 %v4847_v3 }
 0x1ae   : > { %v6312_v7 = vpack.c.bf16 %v2958_v60, %v2942_v37  ;;  %v2960_v62 = vmax.f32 %v1586_v26, 0.0  ;;  %4329 = vmatprep.subr.bf16.mxu1 %v5730_v61  ;;  %v1336_v53 = vpop.f32.mrb[97].mxu0  ;;  %4180 = vmatmul.mubr.msk.f32.gmra.mrb[202].mxu0 %vm528_vm1, %v4810_v38  ;;  %v1335_v61 = vadd.f32 %v1334_v10, %v5781_v63  ;;  %v7500_v60 = vld [vmem:[#allocation19_spill] sm:$0xff] }
 0x1af   : > { %v6319_v19 = vpack.c.bf16 %v2959_v24, %v2943_v47  ;;  %v2961_v58 = vmax.f32 %v1588_v11, 0.0  ;;  %4267 = vmatpush1.bf16.msra.mxu0 %v5714_v42  ;;  %v1591_v8 = vpop.f32.mrb[96].mxu1  ;;  %2300 = vmatprep.mubr.f32.mxu0 %v4847_v3  ;;  %v1337_v14 = vadd.f32 %v1336_v53, %v5781_v63  ;;  %v7501_v11 = vld [vmem:[#allocation17_spill] sm:$0xff] }
 0x1b0   : > { %v6323_v12 = vpack.c.bf16 %v2960_v62, %v2944_v21  ;;  %4269 = vmatprep.subr.bf16.mxu0 %v5755_v59  ;;  %v1593_v50 = vpop.f32.mrb[97].mxu1  ;;  %4214 = vmatmul.mubr.msk.f32.gmra.mrb[202].mxu1 %vm528_vm1, %v4810_v38  ;;  %v1592_v42 = vadd.f32 %v1591_v8, %v5781_v63  ;;  %v4811_v59 = vld [vmem:[%s7327_s1 + $0x30] sm:$0xff]  ;;  %v2974_v17 = vmax.f32 %v1335_v61, 0.0  ;;  %v7502_v38 = vld [vmem:[#allocation22_spill] sm:$0xff] }
 0x1b1   : > { %v6328_v16 = vpack.c.bf16 %v2961_v58, %v2945_v28  ;;  %4331 = vmatpush1.bf16.msra.mxu1 %v5726_v55  ;;  %v1340_v57 = vpop.f32.mrb[98].mxu0  ;;  %2557 = vmatprep.mubr.f32.mxu1 %v4847_v3  ;;  %v1594_v54 = vadd.f32 %v1593_v50, %v5781_v63  ;;  %v2975_v20 = vmax.f32 %v1337_v14, 0.0  ;;  %v4812_v58 = vld [vmem:[%s7327_s1 + $0x38] sm:$0xff]  ;;  %v7503_v14 = vld [vmem:[#allocation18_spill] sm:$0xff] }
 0x1b2   : > { %v1341_v48 = vadd.f32 %v1340_v57, %v5791_v49  ;;  %4333 = vmatprep.subr.bf16.mxu1 %v5764_v31  ;;  %v1342_v32 = vpop.f32.mrb[99].mxu0  ;;  %4181 = vmatmul.mubr.msk.f32.gmra.mrb[204].mxu0 %vm528_vm1, %v4811_v59  ;;  %v2976_v21 = vmax.f32 %v1592_v42, 0.0 }
 0x1b3   : > { %v1343_v55 = vadd.f32 %v1342_v32, %v5791_v49  ;;  %4271 = vmatpush1.bf16.msra.mxu0 %v7499_v34  ;;  %v1597_v1 = vpop.f32.mrb[98].mxu1  ;;  %2306 = vmatprep.mubr.f32.mxu0 %v4847_v3  ;;  %v2977_v8 = vmax.f32 %v1594_v54, 0.0 }
 0x1b4   : > { %v2990_v37 = vmax.f32 %v1341_v48, 0.0  ;;  %v1598_v31 = vadd.f32 %v1597_v1, %v5791_v49  ;;  %4273 = vmatprep.subr.bf16.mxu0 %v7500_v60  ;;  %v1599_v26 = vpop.f32.mrb[99].mxu1  ;;  %4215 = vmatmul.mubr.msk.f32.gmra.mrb[204].mxu1 %vm528_vm1, %v4811_v59  ;;  %v7504_v48 = vld [vmem:[#allocation23_spill] sm:$0xff]  ;;  %v7505_v59 = vld [vmem:[#allocation25_spill] sm:$0xff] }
 0x1b5   : > { %v2991_v47 = vmax.f32 %v1343_v55, 0.0  ;;  %v1600_v24 = vadd.f32 %v1599_v26, %v5791_v49  ;;  %4335 = vmatpush1.bf16.msra.mxu1 %v7501_v11  ;;  %v1346_v10 = vpop.f32.mrb[100].mxu0  ;;  %2563 = vmatprep.mubr.f32.mxu1 %v4847_v3  ;;  %v7506_v1 = vld [vmem:[#allocation21_spill] sm:$0xff]  ;;  %v7508_v26 = vld [vmem:[#allocation28_spill] sm:$0xff] }
 0x1b6   : > { %v6350_v62 = vpack.c.bf16 %v2990_v37, %v2974_v17  ;;  %v2992_v53 = vmax.f32 %v1598_v31, 0.0  ;;  %4337 = vmatprep.subr.bf16.mxu1 %v7502_v38  ;;  %v1348_v28 = vpop.f32.mrb[101].mxu0  ;;  %4182 = vmatmul.mubr.msk.f32.gmra.mrb[206].mxu0 %vm528_vm1, %v4812_v58  ;;  %v1347_v32 = vadd.f32 %v1346_v10, %v7504_v48  ;;  %v7507_v31 = vld [vmem:[#allocation26_spill] sm:$0xff]  ;;  %v7509_v10 = vld [vmem:[#allocation24_spill] sm:$0xff] }
 0x1b7   : > { %v6357_v61 = vpack.c.bf16 %v2991_v47, %v2975_v20  ;;  %v2993_v50 = vmax.f32 %v1600_v24, 0.0  ;;  %4275 = vmatpush1.bf16.msra.mxu0 %v7503_v14  ;;  %v1603_v57 = vpop.f32.mrb[100].mxu1  ;;  %2312 = vmatprep.mubr.f32.mxu0 %v4847_v3  ;;  %v1349_v54 = vadd.f32 %v1348_v28, %v7504_v48  ;;  %v4813_v47 = vld [vmem:[%s7327_s1 + $0x40] sm:$0xff] }
 0x1b8   : > { %v6361_v42 = vpack.c.bf16 %v2992_v53, %v2976_v21  ;;  %4277 = vmatprep.subr.bf16.mxu0 %v7505_v59  ;;  %v1605_v55 = vpop.f32.mrb[101].mxu1  ;;  %4216 = vmatmul.mubr.msk.f32.gmra.mrb[206].mxu1 %vm528_vm1, %v4812_v58  ;;  %v1604_v37 = vadd.f32 %v1603_v57, %v7504_v48  ;;  %v3006_v53 = vmax.f32 %v1347_v32, 0.0  ;;  %v7510_v58 = vld [vmem:[#allocation31_spill] sm:$0xff] }
 0x1b9   : > { %v6366_v34 = vpack.c.bf16 %v2993_v50, %v2977_v8  ;;  %4339 = vmatpush1.bf16.msra.mxu1 %v7506_v1  ;;  %v1352_v17 = vpop.f32.mrb[102].mxu0  ;;  %2569 = vmatprep.mubr.f32.mxu1 %v4847_v3  ;;  %v1606_v24 = vadd.f32 %v1605_v55, %v7504_v48  ;;  %v3007_v50 = vmax.f32 %v1349_v54, 0.0  ;;  %v7511_v59 = vld [vmem:[#allocation27_spill] sm:$0xff] }
 0x1ba   : > { %v1353_v60 = vadd.f32 %v1352_v17, %v7507_v31  ;;  %4341 = vmatprep.subr.bf16.mxu1 %v7508_v26  ;;  %v1354_v20 = vpop.f32.mrb[103].mxu0  ;;  %4183 = vmatmul.mubr.msk.f32.gmra.mrb[208].mxu0 %vm528_vm1, %v4813_v47  ;;  %v3008_v1 = vmax.f32 %v1604_v37, 0.0 }
 0x1bb   : > { %v1355_v11 = vadd.f32 %v1354_v20, %v7507_v31  ;;  %4279 = vmatpush1.bf16.msra.mxu0 %v7509_v10  ;;  %v1609_v21 = vpop.f32.mrb[102].mxu1  ;;  %2318 = vmatprep.mubr.f32.mxu0 %v4847_v3  ;;  %v4814_v20 = vld [vmem:[%s7327_s1 + $0x48] sm:$0xff]  ;;  %v3009_v54 = vmax.f32 %v1606_v24, 0.0  ;;  %v7514_v10 = vld [vmem:[#allocation30_spill] sm:$0xff] }
 0x1bc   : > { %v3022_v38 = vmax.f32 %v1353_v60, 0.0  ;;  %v1610_v28 = vadd.f32 %v1609_v21, %v7507_v31  ;;  %4281 = vmatprep.subr.bf16.mxu0 %v7510_v58  ;;  %v1611_v8 = vpop.f32.mrb[103].mxu1  ;;  %4217 = vmatmul.mubr.msk.f32.gmra.mrb[208].mxu1 %vm528_vm1, %v4813_v47  ;;  %v7513_v60 = vld [vmem:[#allocation34_spill] sm:$0xff] }
 0x1bd   : > { %v3023_v14 = vmax.f32 %v1355_v11, 0.0  ;;  %v1612_v57 = vadd.f32 %v1611_v8, %v7507_v31  ;;  %4343 = vmatpush1.bf16.msra.mxu1 %v7511_v59  ;;  %v1358_v55 = vpop.f32.mrb[104].mxu0  ;;  %2575 = vmatprep.mubr.f32.mxu1 %v4847_v3  ;;  %v7519_v59 = vld [vmem:[#allocation32_spill] sm:$0xff] }
 0x1be   : > { %v6388_v17 = vpack.c.bf16 %v3022_v38, %v3006_v53  ;;  %v3024_v32 = vmax.f32 %v1610_v28, 0.0  ;;  %4345 = vmatprep.subr.bf16.mxu1 %v7513_v60  ;;  %v1360_v26 = vpop.f32.mrb[105].mxu0  ;;  %4184 = vmatmul.mubr.msk.f32.gmra.mrb[210].mxu0 %vm528_vm1, %v4814_v20  ;;  %v7516_v53 = vld [vmem:[#allocation29_spill] sm:$0xff]  ;;  %v4815_v60 = vld [vmem:[%s7327_s1 + $0x50] sm:$0xff] }
 0x1bf   : > { %v6395_v47 = vpack.c.bf16 %v3023_v14, %v3007_v50  ;;  %v3025_v11 = vmax.f32 %v1612_v57, 0.0  ;;  %4283 = vmatpush1.bf16.msra.mxu0 %v7514_v10  ;;  %v1615_v21 = vpop.f32.mrb[104].mxu1  ;;  %2324 = vmatprep.mubr.f32.mxu0 %v4847_v3  ;;  %v1359_v38 = vadd.f32 %v1358_v55, %v7516_v53  ;;  %v7517_v28 = vld [vmem:[#allocation37_spill] sm:$0xff]  ;;  %v1361_v24 = vadd.f32 %v1360_v26, %v7516_v53 }
 0x1c0   : > { %7512 = vst [vmem:[#allocation16_spill] sm:$0xff] %v6388_v17  ;;  %v6399_v37 = vpack.c.bf16 %v3024_v32, %v3008_v1  ;;  %4285 = vmatprep.subr.bf16.mxu0 %v7517_v28  ;;  %v1617_v58 = vpop.f32.mrb[105].mxu1  ;;  %4218 = vmatmul.mubr.msk.f32.gmra.mrb[210].mxu1 %vm528_vm1, %v4814_v20  ;;  %v7518_v50 = vld [vmem:[#allocation33_spill] sm:$0xff]  ;;  %v1616_v57 = vadd.f32 %v1615_v21, %v7516_v53  ;;  %v7520_v32 = vld [vmem:[#allocation40_spill] sm:$0xff] }
 0x1c1   : > { %v6404_v8 = vpack.c.bf16 %v3025_v11, %v3009_v54  ;;  %4347 = vmatpush1.bf16.msra.mxu1 %v7518_v50  ;;  %v1364_v14 = vpop.f32.mrb[106].mxu0  ;;  %2581 = vmatprep.mubr.f32.mxu1 %v4847_v3  ;;  %v1618_v26 = vadd.f32 %v1617_v58, %v7516_v53  ;;  %v7521_v54 = vld [vmem:[#allocation36_spill] sm:$0xff]  ;;  %v3038_v10 = vmax.f32 %v1359_v38, 0.0  ;;  %v7522_v50 = vld [vmem:[#allocation43_spill] sm:$0xff] }
 0x1c2   : > { %7515 = vst [vmem:[#allocation19_spill] sm:$0xff] %v6399_v37  ;;  %v1365_v1 = vadd.f32 %v1364_v14, %v7519_v59  ;;  %4349 = vmatprep.subr.bf16.mxu1 %v7520_v32  ;;  %v1366_v55 = vpop.f32.mrb[107].mxu0  ;;  %4185 = vmatmul.mubr.msk.f32.gmra.mrb[212].mxu0 %vm528_vm1, %v4815_v60  ;;  %v3039_v32 = vmax.f32 %v1361_v24, 0.0  ;;  %v7523_v53 = vld [vmem:[#allocation39_spill] sm:$0xff] }
 0x1c3   : > { %v1367_v20 = vadd.f32 %v1366_v55, %v7519_v59  ;;  %4287 = vmatpush1.bf16.msra.mxu0 %v7521_v54  ;;  %v1621_v11 = vpop.f32.mrb[106].mxu1  ;;  %2330 = vmatprep.mubr.f32.mxu0 %v4847_v3  ;;  %v3040_v54 = vmax.f32 %v1616_v57, 0.0  ;;  %v3041_v24 = vmax.f32 %v1618_v26, 0.0  ;;  %v7532_v26 = vld [vmem:[#allocation45_spill] sm:$0xff] }
 0x1c4   : > { %v3054_v21 = vmax.f32 %v1365_v1, 0.0  ;;  %v1622_v28 = vadd.f32 %v1621_v11, %v7519_v59  ;;  %4289 = vmatprep.subr.bf16.mxu0 %v7522_v50  ;;  %v1623_v14 = vpop.f32.mrb[107].mxu1  ;;  %4219 = vmatmul.mubr.msk.f32.gmra.mrb[212].mxu1 %vm528_vm1, %v4815_v60  ;;  %v7525_v1 = vld [vmem:[#allocation46_spill] sm:$0xff]  ;;  %v4816_v60 = vld [vmem:[%s7327_s1 + $0x58] sm:$0xff] }
 0x1c5   : > { %v3055_v37 = vmax.f32 %v1367_v20, 0.0  ;;  %v1624_v58 = vadd.f32 %v1623_v14, %v7519_v59  ;;  %4351 = vmatpush1.bf16.msra.mxu1 %v7523_v53  ;;  %v1370_v55 = vpop.f32.mrb[108].mxu0  ;;  %2587 = vmatprep.mubr.f32.mxu1 %v4847_v3  ;;  %v7527_v50 = vld [vmem:[#allocation42_spill] sm:$0xff] }
 0x1c6   : > { %v6426_v17 = vpack.c.bf16 %v3054_v21, %v3038_v10  ;;  %v3056_v38 = vmax.f32 %v1622_v28, 0.0  ;;  %4353 = vmatprep.subr.bf16.mxu1 %v7525_v1  ;;  %v1372_v11 = vpop.f32.mrb[109].mxu0  ;;  %4186 = vmatmul.mubr.msk.f32.gmra.mrb[214].mxu0 %vm528_vm1, %v4816_v60  ;;  %v7529_v10 = vld [vmem:[#allocation35_spill] sm:$0xff]  ;;  %v7530_v28 = vld [vmem:[#allocation49_spill] sm:$0xff] }
 0x1c7   : > { %v6433_v20 = vpack.c.bf16 %v3055_v37, %v3039_v32  ;;  %v3057_v53 = vmax.f32 %v1624_v58, 0.0  ;;  %4291 = vmatpush1.bf16.msra.mxu0 %v7527_v50  ;;  %v1627_v14 = vpop.f32.mrb[108].mxu1  ;;  %2336 = vmatprep.mubr.f32.mxu0 %v4847_v3  ;;  %v1371_v21 = vadd.f32 %v1370_v55, %v7529_v10  ;;  %v1373_v37 = vadd.f32 %v1372_v11, %v7529_v10  ;;  %v7534_v50 = vld [vmem:[#allocation52_spill] sm:$0xff] }
 0x1c8   : > { %7524 = vst [vmem:[#allocation17_spill] sm:$0xff] %v6426_v17  ;;  %v6437_v57 = vpack.c.bf16 %v3056_v38, %v3040_v54  ;;  %4293 = vmatprep.subr.bf16.mxu0 %v7530_v28  ;;  %v1629_v1 = vpop.f32.mrb[109].mxu1  ;;  %4220 = vmatmul.mubr.msk.f32.gmra.mrb[214].mxu1 %vm528_vm1, %v4816_v60  ;;  %v1628_v58 = vadd.f32 %v1627_v14, %v7529_v10  ;;  %v7533_v54 = vld [vmem:[#allocation38_spill] sm:$0xff] }
 0x1c9   : > { %7526 = vst [vmem:[#allocation22_spill] sm:$0xff] %v6433_v20  ;;  %v6442_v17 = vpack.c.bf16 %v3057_v53, %v3041_v24  ;;  %4355 = vmatpush1.bf16.msra.mxu1 %v7532_v26  ;;  %v1376_v32 = vpop.f32.mrb[110].mxu0  ;;  %2593 = vmatprep.mubr.f32.mxu1 %v4847_v3  ;;  %v4817_v60 = vld [vmem:[%s7327_s1 + $0x60] sm:$0xff]  ;;  %v1630_v11 = vadd.f32 %v1629_v1, %v7529_v10  ;;  %v7535_v53 = vld [vmem:[#allocation48_spill] sm:$0xff]  ;;  %v3070_v14 = vmax.f32 %v1371_v21, 0.0  ;;  %v7537_v10 = vld [vmem:[#allocation51_spill] sm:$0xff] }
 0x1ca   : > { %7528 = vst [vmem:[#allocation18_spill] sm:$0xff] %v6437_v57  ;;  %v1377_v38 = vadd.f32 %v1376_v32, %v7533_v54  ;;  %4357 = vmatprep.subr.bf16.mxu1 %v7534_v50  ;;  %v1378_v55 = vpop.f32.mrb[111].mxu0  ;;  %4187 = vmatmul.mubr.msk.f32.gmra.mrb[216].mxu0 %vm528_vm1, %v4817_v60  ;;  %v7536_v50 = vld [vmem:[#allocation55_spill] sm:$0xff] }
 0x1cb   : > { %7531 = vst [vmem:[#allocation25_spill] sm:$0xff] %v6442_v17  ;;  %v1379_v24 = vadd.f32 %v1378_v55, %v7533_v54  ;;  %4295 = vmatpush1.bf16.msra.mxu0 %v7535_v53  ;;  %v1633_v28 = vpop.f32.mrb[110].mxu1  ;;  %2342 = vmatprep.mubr.f32.mxu0 %v4847_v3  ;;  %v3071_v17 = vmax.f32 %v1373_v37, 0.0  ;;  %v3072_v53 = vmax.f32 %v1628_v58, 0.0  ;;  %v3073_v37 = vmax.f32 %v1630_v11, 0.0 }
 0x1cc   : > { %v3086_v26 = vmax.f32 %v1377_v38, 0.0  ;;  %v1634_v32 = vadd.f32 %v1633_v28, %v7533_v54  ;;  %4297 = vmatprep.subr.bf16.mxu0 %v7536_v50  ;;  %v1635_v57 = vpop.f32.mrb[111].mxu1  ;;  %4221 = vmatmul.mubr.msk.f32.gmra.mrb[216].mxu1 %vm528_vm1, %v4817_v60  ;;  %v7539_v38 = vld [vmem:[#allocation58_spill] sm:$0xff]  ;;  %v4818_v60 = vld [vmem:[%s7327_s1 + $0x68] sm:$0xff] }
 0x1cd   : > { %v3087_v59 = vmax.f32 %v1379_v24, 0.0  ;;  %v1636_v1 = vadd.f32 %v1635_v57, %v7533_v54  ;;  %4359 = vmatpush1.bf16.msra.mxu1 %v7537_v10  ;;  %v1382_v55 = vpop.f32.mrb[112].mxu0  ;;  %2599 = vmatprep.mubr.f32.mxu1 %v4847_v3  ;;  %v7540_v24 = vld [vmem:[#allocation54_spill] sm:$0xff] }
 0x1ce   : > { %v6464_v20 = vpack.c.bf16 %v3086_v26, %v3070_v14  ;;  %v3088_v21 = vmax.f32 %v1634_v32, 0.0  ;;  %4361 = vmatprep.subr.bf16.mxu1 %v7539_v38  ;;  %v1384_v28 = vpop.f32.mrb[113].mxu0  ;;  %4188 = vmatmul.mubr.msk.f32.gmra.mrb[218].mxu0 %vm528_vm1, %v4818_v60  ;;  %v7542_v14 = vld [vmem:[#allocation41_spill] sm:$0xff] }
 0x1cf   : > { %v6471_v57 = vpack.c.bf16 %v3087_v59, %v3071_v17  ;;  %v3089_v10 = vmax.f32 %v1636_v1, 0.0  ;;  %4299 = vmatpush1.bf16.msra.mxu0 %v7540_v24  ;;  %v1639_v50 = vpop.f32.mrb[112].mxu1  ;;  %2348 = vmatprep.mubr.f32.mxu0 %v4847_v3  ;;  %v1383_v26 = vadd.f32 %v1382_v55, %v7542_v14  ;;  %v7543_v32 = vld [vmem:[#allocation61_spill] sm:$0xff]  ;;  %v1385_v17 = vadd.f32 %v1384_v28, %v7542_v14  ;;  %v7547_v24 = vld [vmem:[#allocation64_spill] sm:$0xff] }
 0x1d0   : > { %7538 = vst [vmem:[#allocation21_spill] sm:$0xff] %v6464_v20  ;;  %v6475_v58 = vpack.c.bf16 %v3088_v21, %v3072_v53  ;;  %4301 = vmatprep.subr.bf16.mxu0 %v7543_v32  ;;  %v1641_v38 = vpop.f32.mrb[113].mxu1  ;;  %4222 = vmatmul.mubr.msk.f32.gmra.mrb[218].mxu1 %vm528_vm1, %v4818_v60  ;;  %v7545_v59 = vld [vmem:[#allocation57_spill] sm:$0xff]  ;;  %v1640_v1 = vadd.f32 %v1639_v50, %v7542_v14  ;;  %v7546_v53 = vld [vmem:[#allocation44_spill] sm:$0xff] }
 0x1d1   : > { %v6480_v54 = vpack.c.bf16 %v3089_v10, %v3073_v37  ;;  %4363 = vmatpush1.bf16.msra.mxu1 %v7545_v59  ;;  %v1388_v11 = vpop.f32.mrb[114].mxu0  ;;  %2605 = vmatprep.mubr.f32.mxu1 %v4847_v3  ;;  %v4819_v60 = vld [vmem:[%s7327_s1 + $0x70] sm:$0xff]  ;;  %v1642_v28 = vadd.f32 %v1641_v38, %v7542_v14  ;;  %v3102_v50 = vmax.f32 %v1383_v26, 0.0  ;;  %v7549_v14 = vld [vmem:[#allocation63_spill] sm:$0xff] }
 0x1d2   : > { %7541 = vst [vmem:[#allocation28_spill] sm:$0xff] %v6475_v58  ;;  %v1389_v21 = vadd.f32 %v1388_v11, %v7546_v53  ;;  %4365 = vmatprep.subr.bf16.mxu1 %v7547_v24  ;;  %v1390_v55 = vpop.f32.mrb[115].mxu0  ;;  %4189 = vmatmul.mubr.msk.f32.gmra.mrb[220].mxu0 %vm528_vm1, %v4819_v60  ;;  %v7548_v10 = vld [vmem:[#allocation60_spill] sm:$0xff]  ;;  %v3103_v58 = vmax.f32 %v1385_v17, 0.0 }
 0x1d3   : > { %7544 = vst [vmem:[#allocation24_spill] sm:$0xff] %v6480_v54  ;;  %v1391_v37 = vadd.f32 %v1390_v55, %v7546_v53  ;;  %4303 = vmatpush1.bf16.msra.mxu0 %v7548_v10  ;;  %v1645_v32 = vpop.f32.mrb[114].mxu1  ;;  %2354 = vmatprep.mubr.f32.mxu0 %v4847_v3  ;;  %v3104_v10 = vmax.f32 %v1640_v1, 0.0  ;;  %v3105_v17 = vmax.f32 %v1642_v28, 0.0 }
 0x1d4   : > { %v3118_v59 = vmax.f32 %v1389_v21, 0.0  ;;  %v1646_v11 = vadd.f32 %v1645_v32, %v7546_v53  ;;  %4305 = vmatprep.subr.bf16.mxu0 %v6059_v35  ;;  %v1647_v24 = vpop.f32.mrb[115].mxu1  ;;  %4223 = vmatmul.mubr.msk.f32.gmra.mrb[220].mxu1 %vm528_vm1, %v4819_v60  ;;  %v4820_v35 = vld [vmem:[%s7327_s1 + $0x78] sm:$0xff]  ;;  %v7551_v32 = vld [vmem:[#allocation47_spill] sm:$0xff] }
 0x1d5   : > { %v3119_v20 = vmax.f32 %v1391_v37, 0.0  ;;  %v1648_v38 = vadd.f32 %v1647_v24, %v7546_v53  ;;  %4367 = vmatpush1.bf16.msra.mxu1 %v7549_v14  ;;  %v1394_v55 = vpop.f32.mrb[116].mxu0  ;;  %2611 = vmatprep.mubr.f32.mxu1 %v4847_v3 }
 0x1d6   : > { %v6502_v54 = vpack.c.bf16 %v3118_v59, %v3102_v50  ;;  %v3120_v26 = vmax.f32 %v1646_v11, 0.0  ;;  %4369 = vmatprep.subr.bf16.mxu1 %v6066_v40  ;;  %v1396_v21 = vpop.f32.mrb[117].mxu0  ;;  %4190 = vmatmul.mubr.msk.f32.gmra.mrb[222].mxu0 %vm528_vm1, %v4820_v35  ;;  %v1395_v40 = vadd.f32 %v1394_v55, %v7551_v32  ;;  %v7553_v11 = vld [vmem:[#allocation50_spill] sm:$0xff] }
 0x1d7   : > { %v6509_v60 = vpack.c.bf16 %v3119_v20, %v3103_v58  ;;  %v3121_v14 = vmax.f32 %v1648_v38, 0.0  ;;  %4307 = vmatpush1.bf16.msra.mxu0 %v6053_v4  ;;  %v1651_v37 = vpop.f32.mrb[116].mxu1  ;;  %2360 = vmatprep.mubr.f32.mxu0 %v4847_v3  ;;  %v1397_v20 = vadd.f32 %v1396_v21, %v7551_v32  ;;  %v7552_v58 = vld [vmem:[#allocation65_spill] sm:$0xff] }
 0x1d8   : > { %v6513_v1 = vpack.c.bf16 %v3120_v26, %v3104_v10  ;;  %4373 = vmatprep.subr.bf16.mxu0 %v6089_v23  ;;  %v1653_v50 = vpop.f32.mrb[117].mxu1  ;;  %4224 = vmatmul.mubr.msk.f32.gmra.mrb[222].mxu1 %vm528_vm1, %v4820_v35  ;;  %v1652_v4 = vadd.f32 %v1651_v37, %v7551_v32  ;;  %v4821_v23 = vld [vmem:[%s7327_s1 + $0x80] sm:$0xff]  ;;  %v3134_v21 = vmax.f32 %v1395_v40, 0.0  ;;  %v4822_v40 = vld [vmem:[%s7327_s1 + $0x88] sm:$0xff] }
 0x1d9   : > { %v6518_v59 = vpack.c.bf16 %v3121_v14, %v3105_v17  ;;  %4371 = vmatpush1.bf16.msra.mxu1 %v7552_v58  ;;  %v1400_v28 = vpop.f32.mrb[118].mxu0  ;;  %2617 = vmatprep.mubr.f32.mxu1 %v4847_v3  ;;  %v1654_v55 = vadd.f32 %v1653_v50, %v7551_v32 }
 0x1da   : > { %7550 = vst [vmem:[#allocation31_spill] sm:$0xff] %v6513_v1  ;;  %v1401_v24 = vadd.f32 %v1400_v28, %v7553_v11  ;;  %4437 = vmatprep.subr.bf16.mxu1 %v6096_v51  ;;  %v1402_v38 = vpop.f32.mrb[119].mxu0  ;;  %4191 = vmatmul.mubr.msk.f32.gmra.mrb[224].mxu0 %vm528_vm1, %v4821_v23  ;;  %v3135_v51 = vmax.f32 %v1397_v20, 0.0  ;;  %v3136_v50 = vmax.f32 %v1652_v4, 0.0  ;;  %v7556_v4 = vld [vmem:[#allocation53_spill] sm:$0xff] }
 0x1db   : > { %v1403_v10 = vadd.f32 %v1402_v38, %v7553_v11  ;;  %v1657_v26 = vpop.f32.mrb[118].mxu1  ;;  %2366 = vmatprep.mubr.f32.mxu0 %v4847_v3 }
 0x1dc   : > { %v3150_v35 = vmax.f32 %v1401_v24, 0.0  ;;  %v1658_v17 = vadd.f32 %v1657_v26, %v7553_v11  ;;  %v1659_v14 = vpop.f32.mrb[119].mxu1  ;;  %4225 = vmatmul.mubr.msk.f32.gmra.mrb[224].mxu1 %vm528_vm1, %v4821_v23  ;;  %v3137_v24 = vmax.f32 %v1654_v55, 0.0 }
 0x1dd   : > { %v3151_v37 = vmax.f32 %v1403_v10, 0.0  ;;  %v1660_v58 = vadd.f32 %v1659_v14, %v7553_v11  ;;  %v1406_v28 = vpop.f32.mrb[120].mxu0  ;;  %2623 = vmatprep.mubr.f32.mxu1 %v4847_v3 }
 0x1de   : > { %v6537_v32 = vpack.c.bf16 %v3150_v35, %v3134_v21  ;;  %v3152_v38 = vmax.f32 %v1658_v17, 0.0  ;;  %v1408_v53 = vpop.f32.mrb[121].mxu0  ;;  %4192 = vmatmul.mubr.msk.f32.gmra.mrb[226].mxu0 %vm528_vm1, %v4822_v40  ;;  %v1407_v21 = vadd.f32 %v1406_v28, %v7556_v4 }
 0x1df   : > { %v6543_v23 = vpack.c.bf16 %v3151_v37, %v3135_v51  ;;  %v3153_v20 = vmax.f32 %v1660_v58, 0.0  ;;  %v1663_v10 = vpop.f32.mrb[120].mxu1  ;;  %2372 = vmatprep.mubr.f32.mxu0 %v4847_v3  ;;  %v1409_v14 = vadd.f32 %v1408_v53, %v7556_v4  ;;  %v7558_v51 = vld [vmem:[#allocation56_spill] sm:$0xff] }
 0x1e0   : > { %7554 = vst [vmem:[#allocation27_spill] sm:$0xff] %v6537_v32  ;;  %v6546_v26 = vpack.c.bf16 %v3152_v38, %v3136_v50  ;;  %v1665_v35 = vpop.f32.mrb[121].mxu1  ;;  %4226 = vmatmul.mubr.msk.f32.gmra.mrb[226].mxu1 %vm528_vm1, %v4822_v40  ;;  %v1664_v55 = vadd.f32 %v1663_v10, %v7556_v4  ;;  %v4823_v50 = vld [vmem:[%s7327_s1 + $0x90] sm:$0xff]  ;;  %v3166_v53 = vmax.f32 %v1407_v21, 0.0  ;;  %v4824_v21 = vld [vmem:[%s7327_s1 + $0x98] sm:$0xff] }
 0x1e1   : > { %v6550_v17 = vpack.c.bf16 %v3153_v20, %v3137_v24  ;;  %v1412_v11 = vpop.f32.mrb[122].mxu0  ;;  %2629 = vmatprep.mubr.f32.mxu1 %v4847_v3  ;;  %v1666_v28 = vadd.f32 %v1665_v35, %v7556_v4 }
 0x1e2   : > { %7555 = vst [vmem:[#allocation34_spill] sm:$0xff] %v6546_v26  ;;  %v1413_v37 = vadd.f32 %v1412_v11, %v7558_v51  ;;  %v1414_v58 = vpop.f32.mrb[123].mxu0  ;;  %4193 = vmatmul.mubr.msk.f32.gmra.mrb[228].mxu0 %vm528_vm1, %v4823_v50  ;;  %v3167_v11 = vmax.f32 %v1409_v14, 0.0  ;;  %v3168_v35 = vmax.f32 %v1664_v55, 0.0  ;;  %v7562_v55 = vld [vmem:[#allocation59_spill] sm:$0xff] }
 0x1e3   : > { %7557 = vst [vmem:[#allocation30_spill] sm:$0xff] %v6550_v17  ;;  %v1415_v38 = vadd.f32 %v1414_v58, %v7558_v51  ;;  %v1669_v40 = vpop.f32.mrb[122].mxu1  ;;  %2378 = vmatprep.mubr.f32.mxu0 %v4847_v3 }
 0x1e4   : > { %v3182_v24 = vmax.f32 %v1413_v37, 0.0  ;;  %v1670_v20 = vadd.f32 %v1669_v40, %v7558_v51  ;;  %v1671_v10 = vpop.f32.mrb[123].mxu1  ;;  %4227 = vmatmul.mubr.msk.f32.gmra.mrb[228].mxu1 %vm528_vm1, %v4823_v50  ;;  %v3169_v37 = vmax.f32 %v1666_v28, 0.0 }
 0x1e5   : > { %v3183_v26 = vmax.f32 %v1415_v38, 0.0  ;;  %v1672_v32 = vadd.f32 %v1671_v10, %v7558_v51  ;;  %v1418_v17 = vpop.f32.mrb[124].mxu0  ;;  %2635 = vmatprep.mubr.f32.mxu1 %v4847_v3 }
 0x1e6   : > { %v6567_v4 = vpack.c.bf16 %v3182_v24, %v3166_v53  ;;  %v3184_v58 = vmax.f32 %v1670_v20, 0.0  ;;  %v1420_v1 = vpop.f32.mrb[125].mxu0  ;;  %4194 = vmatmul.mubr.msk.f32.gmra.mrb[230].mxu0 %vm528_vm1, %v4824_v21  ;;  %v1419_v53 = vadd.f32 %v1418_v17, %v7562_v55 }
 0x1e7   : > { %v6573_v50 = vpack.c.bf16 %v3183_v26, %v3167_v11  ;;  %v3185_v14 = vmax.f32 %v1672_v32, 0.0  ;;  %v1675_v38 = vpop.f32.mrb[124].mxu1  ;;  %2384 = vmatprep.mubr.f32.mxu0 %v4847_v3  ;;  %v1421_v10 = vadd.f32 %v1420_v1, %v7562_v55  ;;  %v7564_v32 = vld [vmem:[#allocation62_spill] sm:$0xff] }
 0x1e8   : > { %7559 = vst [vmem:[#allocation37_spill] sm:$0xff] %v6567_v4  ;;  %v6576_v40 = vpack.c.bf16 %v3184_v58, %v3168_v35  ;;  %v1677_v24 = vpop.f32.mrb[125].mxu1  ;;  %4228 = vmatmul.mubr.msk.f32.gmra.mrb[230].mxu1 %vm528_vm1, %v4824_v21  ;;  %v1676_v26 = vadd.f32 %v1675_v38, %v7562_v55  ;;  %v4825_v35 = vld [vmem:[%s7327_s1 + $0xa0] sm:$0xff]  ;;  %v3198_v1 = vmax.f32 %v1419_v53, 0.0  ;;  %v4826_v53 = vld [vmem:[%s7327_s1 + $0xa8] sm:$0xff] }
 0x1e9   : > { %7560 = vst [vmem:[#allocation33_spill] sm:$0xff] %v6573_v50  ;;  %v6580_v20 = vpack.c.bf16 %v3185_v14, %v3169_v37  ;;  %v1424_v51 = vpop.f32.mrb[126].mxu0  ;;  %2641 = vmatprep.mubr.f32.mxu1 %v4847_v3  ;;  %v1678_v17 = vadd.f32 %v1677_v24, %v7562_v55 }
 0x1ea   : > { %7561 = vst [vmem:[#allocation40_spill] sm:$0xff] %v6576_v40  ;;  %v1425_v28 = vadd.f32 %v1424_v51, %v7564_v32  ;;  %v1426_v11 = vpop.f32.mrb[127].mxu0  ;;  %4195 = vmatmul.mubr.msk.f32.gmra.mrb[232].mxu0 %vm528_vm1, %v4825_v35  ;;  %v3199_v51 = vmax.f32 %v1421_v10, 0.0  ;;  %v3200_v24 = vmax.f32 %v1676_v26, 0.0  ;;  %v7568_v26 = vld [vmem:[#allocation3_spill] sm:$0xff] }
 0x1eb   : > { %7563 = vst [vmem:[#allocation36_spill] sm:$0xff] %v6580_v20  ;;  %v1427_v58 = vadd.f32 %v1426_v11, %v7564_v32  ;;  %v1681_v21 = vpop.f32.mrb[126].mxu1  ;;  %2390 = vmatprep.mubr.f32.mxu0 %v4847_v3 }
 0x1ec   : > { %v3214_v37 = vmax.f32 %v1425_v28, 0.0  ;;  %v1682_v14 = vadd.f32 %v1681_v21, %v7564_v32  ;;  %v1683_v38 = vpop.f32.mrb[127].mxu1  ;;  %4229 = vmatmul.mubr.msk.f32.gmra.mrb[232].mxu1 %vm528_vm1, %v4825_v35  ;;  %v3201_v28 = vmax.f32 %v1678_v17, 0.0 }
 0x1ed   : > { %v3215_v40 = vmax.f32 %v1427_v58, 0.0  ;;  %v1684_v4 = vadd.f32 %v1683_v38, %v7564_v32  ;;  %v1752_v20 = vpop.f32.mrb[128].mxu0  ;;  %2647 = vmatprep.mubr.f32.mxu1 %v4847_v3 }
 0x1ee   : > { %v6597_v55 = vpack.c.bf16 %v3214_v37, %v3198_v1  ;;  %v3216_v11 = vmax.f32 %v1682_v14, 0.0  ;;  %v1754_v50 = vpop.f32.mrb[129].mxu0  ;;  %4196 = vmatmul.mubr.msk.f32.gmra.mrb[234].mxu0 %vm528_vm1, %v4826_v53  ;;  %v1753_v1 = vadd.f32 %v1752_v20, %v7568_v26 }
 0x1ef   : > { %v6603_v35 = vpack.c.bf16 %v3215_v40, %v3199_v51  ;;  %v3217_v10 = vmax.f32 %v1684_v4, 0.0  ;;  %v2009_v58 = vpop.f32.mrb[128].mxu1  ;;  %2396 = vmatprep.mubr.f32.mxu0 %v4847_v3  ;;  %v1755_v38 = vadd.f32 %v1754_v50, %v7568_v26  ;;  %v7570_v4 = vld [vmem:[#allocation4_spill] sm:$0xff] }
 0x1f0   : > { %7565 = vst [vmem:[#allocation43_spill] sm:$0xff] %v6597_v55  ;;  %v6606_v21 = vpack.c.bf16 %v3216_v11, %v3200_v24  ;;  %v2011_v37 = vpop.f32.mrb[129].mxu1  ;;  %4230 = vmatmul.mubr.msk.f32.gmra.mrb[234].mxu1 %vm528_vm1, %v4826_v53  ;;  %v2010_v40 = vadd.f32 %v2009_v58, %v7568_v26  ;;  %v4827_v24 = vld [vmem:[%s7327_s1 + $0xb0] sm:$0xff]  ;;  %v2722_v50 = vmax.f32 %v1753_v1, 0.0  ;;  %v4828_v1 = vld [vmem:[%s7327_s1 + $0xb8] sm:$0xff] }
 0x1f1   : > { %7566 = vst [vmem:[#allocation39_spill] sm:$0xff] %v6603_v35  ;;  %v6610_v14 = vpack.c.bf16 %v3217_v10, %v3201_v28  ;;  %v1758_v32 = vpop.f32.mrb[130].mxu0  ;;  %2653 = vmatprep.mubr.f32.mxu1 %v4847_v3  ;;  %v2012_v20 = vadd.f32 %v2011_v37, %v7568_v26 }
 0x1f2   : > { %7567 = vst [vmem:[#allocation46_spill] sm:$0xff] %v6606_v21  ;;  %v1759_v17 = vadd.f32 %v1758_v32, %v7570_v4  ;;  %v1760_v51 = vpop.f32.mrb[131].mxu0  ;;  %4197 = vmatmul.mubr.msk.f32.gmra.mrb[236].mxu0 %vm528_vm1, %v4827_v24  ;;  %v2723_v32 = vmax.f32 %v1755_v38, 0.0  ;;  %v2724_v37 = vmax.f32 %v2010_v40, 0.0  ;;  %v7573_v40 = vld [vmem:[#allocation5_spill] sm:$0xff] }
 0x1f3   : > { %7569 = vst [vmem:[#allocation42_spill] sm:$0xff] %v6610_v14  ;;  %v1761_v11 = vadd.f32 %v1760_v51, %v7570_v4  ;;  %v2015_v53 = vpop.f32.mrb[130].mxu1  ;;  %2402 = vmatprep.mubr.f32.mxu0 %v4847_v3 }
 0x1f4   : > { %v2738_v28 = vmax.f32 %v1759_v17, 0.0  ;;  %v2016_v10 = vadd.f32 %v2015_v53, %v7570_v4  ;;  %v2017_v58 = vpop.f32.mrb[131].mxu1  ;;  %4231 = vmatmul.mubr.msk.f32.gmra.mrb[236].mxu1 %vm528_vm1, %v4827_v24  ;;  %v2725_v17 = vmax.f32 %v2012_v20, 0.0 }
 0x1f5   : > { %v2739_v21 = vmax.f32 %v1761_v11, 0.0  ;;  %v2018_v55 = vadd.f32 %v2017_v58, %v7570_v4  ;;  %v1764_v14 = vpop.f32.mrb[132].mxu0  ;;  %2659 = vmatprep.mubr.f32.mxu1 %v4847_v3 }
 0x1f6   : > { %v6627_v26 = vpack.c.bf16 %v2738_v28, %v2722_v50  ;;  %v2740_v51 = vmax.f32 %v2016_v10, 0.0  ;;  %v1766_v35 = vpop.f32.mrb[133].mxu0  ;;  %4198 = vmatmul.mubr.msk.f32.gmra.mrb[238].mxu0 %vm528_vm1, %v4828_v1  ;;  %v1765_v50 = vadd.f32 %v1764_v14, %v7573_v40 }
 0x1f7   : > { %v6633_v24 = vpack.c.bf16 %v2739_v21, %v2723_v32  ;;  %v2741_v38 = vmax.f32 %v2018_v55, 0.0  ;;  %v2021_v11 = vpop.f32.mrb[132].mxu1  ;;  %2408 = vmatprep.mubr.f32.mxu0 %v4847_v3  ;;  %v1767_v58 = vadd.f32 %v1766_v35, %v7573_v40  ;;  %v4829_v32 = vld [vmem:[%s7327_s1 + $0xc0] sm:$0xff] }
 0x1f8   : > { %7571 = vst [vmem:[#allocation49_spill] sm:$0xff] %v6627_v26  ;;  %v6636_v53 = vpack.c.bf16 %v2740_v51, %v2724_v37  ;;  %v2023_v28 = vpop.f32.mrb[133].mxu1  ;;  %4232 = vmatmul.mubr.msk.f32.gmra.mrb[238].mxu1 %vm528_vm1, %v4828_v1  ;;  %v2022_v21 = vadd.f32 %v2021_v11, %v7573_v40  ;;  %v2754_v35 = vmax.f32 %v1765_v50, 0.0  ;;  %v4830_v50 = vld [vmem:[%s7327_s1 + $0xc8] sm:$0xff] }
 0x1f9   : > { %v6640_v10 = vpack.c.bf16 %v2741_v38, %v2725_v17  ;;  %v1770_v4 = vpop.f32.mrb[134].mxu0  ;;  %2665 = vmatprep.mubr.f32.mxu1 %v4847_v3  ;;  %v2024_v14 = vadd.f32 %v2023_v28, %v7573_v40 }
 0x1fa   : > { %7572 = vst [vmem:[#allocation45_spill] sm:$0xff] %v6636_v53  ;;  %v1771_v55 = vadd.f32 %v1770_v4, %v5552_v2  ;;  %v1772_v20 = vpop.f32.mrb[135].mxu0  ;;  %4199 = vmatmul.mubr.msk.f32.gmra.mrb[240].mxu0 %vm528_vm1, %v4829_v32  ;;  %v2755_v4 = vmax.f32 %v1767_v58, 0.0  ;;  %v2756_v28 = vmax.f32 %v2022_v21, 0.0 }
 0x1fb   : > { %7574 = vst [vmem:[#allocation52_spill] sm:$0xff] %v6640_v10  ;;  %v1773_v37 = vadd.f32 %v1772_v20, %v5552_v2  ;;  %v2027_v51 = vpop.f32.mrb[134].mxu1  ;;  %2414 = vmatprep.mubr.f32.mxu0 %v4847_v3 }
 0x1fc   : > { %v2770_v1 = vmax.f32 %v1771_v55, 0.0  ;;  %v2028_v17 = vadd.f32 %v2027_v51, %v5552_v2  ;;  %v2029_v38 = vpop.f32.mrb[135].mxu1  ;;  %4233 = vmatmul.mubr.msk.f32.gmra.mrb[240].mxu1 %vm528_vm1, %v4829_v32  ;;  %v2757_v55 = vmax.f32 %v2024_v14, 0.0 }
 0x1fd   : > { %v2771_v11 = vmax.f32 %v1773_v37, 0.0  ;;  %v2030_v53 = vadd.f32 %v2029_v38, %v5552_v2  ;;  %v1776_v26 = vpop.f32.mrb[136].mxu0  ;;  %2671 = vmatprep.mubr.f32.mxu1 %v4847_v3 }
 0x1fe   : > { %v6657_v40 = vpack.c.bf16 %v2770_v1, %v2754_v35  ;;  %v2772_v20 = vmax.f32 %v2028_v17, 0.0  ;;  %v1778_v10 = vpop.f32.mrb[137].mxu0  ;;  %4200 = vmatmul.mubr.msk.f32.gmra.mrb[242].mxu0 %vm528_vm1, %v4830_v50  ;;  %v1777_v21 = vadd.f32 %v1776_v26, %v5578_v30 }
 0x1ff   : > { %v6663_v32 = vpack.c.bf16 %v2771_v11, %v2755_v4  ;;  %v2773_v58 = vmax.f32 %v2030_v53, 0.0  ;;  %v2033_v37 = vpop.f32.mrb[136].mxu1  ;;  %2420 = vmatprep.mubr.f32.mxu0 %v4847_v3  ;;  %v1779_v17 = vadd.f32 %v1778_v10, %v5578_v30  ;;  %v4831_v11 = vld [vmem:[%s7327_s1 + $0xd0] sm:$0xff] }
 0x200   : > { %7575 = vst [vmem:[#allocation48_spill] sm:$0xff] %v6657_v40  ;;  %v6666_v51 = vpack.c.bf16 %v2772_v20, %v2756_v28  ;;  %v2035_v35 = vpop.f32.mrb[137].mxu1  ;;  %4234 = vmatmul.mubr.msk.f32.gmra.mrb[242].mxu1 %vm528_vm1, %v4830_v50  ;;  %v2034_v14 = vadd.f32 %v2033_v37, %v5578_v30  ;;  %v2786_v10 = vmax.f32 %v1777_v21, 0.0  ;;  %v4832_v21 = vld [vmem:[%s7327_s1 + $0xd8] sm:$0xff] }
 0x201   : > { %v6670_v1 = vpack.c.bf16 %v2773_v58, %v2757_v55  ;;  %v1782_v38 = vpop.f32.mrb[138].mxu0  ;;  %2677 = vmatprep.mubr.f32.mxu1 %v4847_v3  ;;  %v2036_v26 = vadd.f32 %v2035_v35, %v5578_v30  ;;  %v2787_v37 = vmax.f32 %v1779_v17, 0.0 }
 0x202   : > { %7576 = vst [vmem:[#allocation55_spill] sm:$0xff] %v6666_v51  ;;  %v1783_v53 = vadd.f32 %v1782_v38, %v5584_v46  ;;  %v1784_v4 = vpop.f32.mrb[139].mxu0  ;;  %4201 = vmatmul.mubr.msk.f32.gmra.mrb[244].mxu0 %vm528_vm1, %v4831_v11  ;;  %v2788_v35 = vmax.f32 %v2034_v14, 0.0 }
 0x203   : > { %v1785_v28 = vadd.f32 %v1784_v4, %v5584_v46  ;;  %v2039_v20 = vpop.f32.mrb[138].mxu1  ;;  %2426 = vmatprep.mubr.f32.mxu0 %v4847_v3 }
 0x204   : > { %v2802_v50 = vmax.f32 %v1783_v53, 0.0  ;;  %v2040_v55 = vadd.f32 %v2039_v20, %v5584_v46  ;;  %v2041_v58 = vpop.f32.mrb[139].mxu1  ;;  %4235 = vmatmul.mubr.msk.f32.gmra.mrb[244].mxu1 %vm528_vm1, %v4831_v11  ;;  %v2789_v53 = vmax.f32 %v2036_v26, 0.0 }
 0x205   : > { %v2803_v38 = vmax.f32 %v1785_v28, 0.0  ;;  %v2042_v2 = vadd.f32 %v2041_v58, %v5584_v46  ;;  %v1788_v51 = vpop.f32.mrb[140].mxu0  ;;  %2683 = vmatprep.mubr.f32.mxu1 %v4847_v3 }
 0x206   : > { %v6687_v30 = vpack.c.bf16 %v2802_v50, %v2786_v10  ;;  %v2804_v4 = vmax.f32 %v2040_v55, 0.0  ;;  %v1790_v40 = vpop.f32.mrb[141].mxu0  ;;  %4202 = vmatmul.mubr.msk.f32.gmra.mrb[246].mxu0 %vm528_vm1, %v4832_v21  ;;  %v1789_v14 = vadd.f32 %v1788_v51, %v5610_v9 }
 0x207   : > { %v6693_v11 = vpack.c.bf16 %v2803_v38, %v2787_v37  ;;  %v2805_v17 = vmax.f32 %v2042_v2, 0.0  ;;  %v2045_v28 = vpop.f32.mrb[140].mxu1  ;;  %2432 = vmatprep.mubr.f32.mxu0 %v4847_v3  ;;  %v1791_v55 = vadd.f32 %v1790_v40, %v5610_v9  ;;  %v4833_v38 = vld [vmem:[%s7327_s1 + $0xe0] sm:$0xff] }
 0x208   : > { %7577 = vst [vmem:[#allocation51_spill] sm:$0xff] %v6687_v30  ;;  %v6696_v20 = vpack.c.bf16 %v2804_v4, %v2788_v35  ;;  %v2047_v10 = vpop.f32.mrb[141].mxu1  ;;  %4236 = vmatmul.mubr.msk.f32.gmra.mrb[246].mxu1 %vm528_vm1, %v4832_v21  ;;  %v2046_v26 = vadd.f32 %v2045_v28, %v5610_v9  ;;  %v2818_v40 = vmax.f32 %v1789_v14, 0.0  ;;  %v4834_v14 = vld [vmem:[%s7327_s1 + $0xe8] sm:$0xff] }
 0x209   : > { %v6700_v50 = vpack.c.bf16 %v2805_v17, %v2789_v53  ;;  %v1794_v58 = vpop.f32.mrb[142].mxu0  ;;  %2689 = vmatprep.mubr.f32.mxu1 %v4847_v3  ;;  %v2048_v51 = vadd.f32 %v2047_v10, %v5610_v9  ;;  %v2819_v28 = vmax.f32 %v1791_v55, 0.0 }
 0x20a   : > { %7578 = vst [vmem:[#allocation58_spill] sm:$0xff] %v6696_v20  ;;  %v1795_v2 = vadd.f32 %v1794_v58, %v5618_v18  ;;  %v1796_v37 = vpop.f32.mrb[143].mxu0  ;;  %4203 = vmatmul.mubr.msk.f32.gmra.mrb[248].mxu0 %vm528_vm1, %v4833_v38  ;;  %v2820_v10 = vmax.f32 %v2046_v26, 0.0 }
 0x20b   : > { %v1797_v35 = vadd.f32 %v1796_v37, %v5618_v18  ;;  %v2051_v4 = vpop.f32.mrb[142].mxu1  ;;  %2438 = vmatprep.mubr.f32.mxu0 %v4847_v3 }
 0x20c   : > { %v2834_v21 = vmax.f32 %v1795_v2, 0.0  ;;  %v2052_v53 = vadd.f32 %v2051_v4, %v5618_v18  ;;  %v2053_v17 = vpop.f32.mrb[143].mxu1  ;;  %4237 = vmatmul.mubr.msk.f32.gmra.mrb[248].mxu1 %vm528_vm1, %v4833_v38  ;;  %v2821_v2 = vmax.f32 %v2048_v51, 0.0 }
 0x20d   : > { %v2835_v58 = vmax.f32 %v1797_v35, 0.0  ;;  %v2054_v46 = vadd.f32 %v2053_v17, %v5618_v18  ;;  %v1800_v20 = vpop.f32.mrb[144].mxu0  ;;  %2695 = vmatprep.mubr.f32.mxu1 %v4847_v3 }
 0x20e   : > { %v6717_v9 = vpack.c.bf16 %v2834_v21, %v2818_v40  ;;  %v2836_v37 = vmax.f32 %v2052_v53, 0.0  ;;  %v1802_v30 = vpop.f32.mrb[145].mxu0  ;;  %4204 = vmatmul.mubr.msk.f32.gmra.mrb[250].mxu0 %vm528_vm1, %v4834_v14  ;;  %v1801_v26 = vadd.f32 %v1800_v20, %v5642_v56  ;;  %v6733_v21 = vld.sshfl [vmem:[%s7329_s3] sm:$0x33 pattern:$0x76325410] }
 0x20f   : > { %v6723_v38 = vpack.c.bf16 %v2835_v58, %v2819_v28  ;;  %v2837_v55 = vmax.f32 %v2054_v46, 0.0  ;;  %v2057_v35 = vpop.f32.mrb[144].mxu1  ;;  %2444 = vmatprep.mubr.f32.mxu0 %v4847_v3  ;;  %v1803_v51 = vadd.f32 %v1802_v30, %v5642_v56  ;;  %v4835_v58 = vld [vmem:[%s7327_s1 + $0xf0] sm:$0xff]  ;;  %v6750_v30 = vcombine.high %v6733_v21, %v6733_v21 }
 0x210   : > { %7579 = vst [vmem:[#allocation54_spill] sm:$0xff] %v6717_v9  ;;  %v6726_v4 = vpack.c.bf16 %v2836_v37, %v2820_v10  ;;  %v2059_v40 = vpop.f32.mrb[145].mxu1  ;;  %4238 = vmatmul.mubr.msk.f32.gmra.mrb[250].mxu1 %vm528_vm1, %v4834_v14  ;;  %v2058_v17 = vadd.f32 %v2057_v35, %v5642_v56 }
 0x211   : > { %7580 = vst [vmem:[#allocation61_spill] sm:$0xff] %v6723_v38  ;;  %v6735_v53 = vpack.c.bf16 %v2837_v55, %v2821_v2  ;;  %v1806_v46 = vpop.f32.mrb[146].mxu0  ;;  %2701 = vmatprep.mubr.f32.mxu1 %v4847_v3  ;;  %v2060_v10 = vadd.f32 %v2059_v40, %v5642_v56  ;;  %v2850_v2 = vmax.f32 %v1801_v26, 0.0  ;;  %v2851_v18 = vmax.f32 %v1803_v51, 0.0  ;;  %v4836_v26 = vld [vmem:[%s7327_s1 + $0xf8] sm:$0xff] }
 0x212   : > { %7581 = vst [vmem:[#allocation57_spill] sm:$0xff] %v6726_v4  ;;  %v1807_v28 = vadd.f32 %v1806_v46, %v5650_v0  ;;  %v1808_v20 = vpop.f32.mrb[147].mxu0  ;;  %4205 = vmatmul.mubr.msk.f32.gmra.mrb[252].mxu0 %vm528_vm1, %v4835_v58 }
 0x213   : > { %7582 = vst [vmem:[#allocation64_spill] sm:$0xff] %v6735_v53  ;;  %v1809_v37 = vadd.f32 %v1808_v20, %v5650_v0  ;;  %v2063_v14 = vpop.f32.mrb[146].mxu1  ;;  %2450 = vmatprep.mubr.f32.mxu0 %v4847_v3  ;;  %v2852_v20 = vmax.f32 %v2058_v17, 0.0 }
 0x214   : > { %v2866_v55 = vmax.f32 %v1807_v28, 0.0  ;;  %v2064_v35 = vadd.f32 %v2063_v14, %v5650_v0  ;;  %v2065_v46 = vpop.f32.mrb[147].mxu1  ;;  %4239 = vmatmul.mubr.msk.f32.gmra.mrb[252].mxu1 %vm528_vm1, %v4835_v58  ;;  %v2853_v28 = vmax.f32 %v2060_v10, 0.0 }
 0x215   : > { %v2867_v4 = vmax.f32 %v1809_v37, 0.0  ;;  %v2066_v40 = vadd.f32 %v2065_v46, %v5650_v0  ;;  %v1812_v56 = vpop.f32.mrb[148].mxu0  ;;  %2707 = vmatprep.mubr.f32.mxu1 %v4847_v3  ;;  %v7585_v46 = vld [vmem:[#allocation66_spill] sm:$0xff] }
 0x216   : > { %v6756_v9 = vpack.c.bf16 %v2866_v55, %v2850_v2  ;;  %v2868_v53 = vmax.f32 %v2064_v35, 0.0  ;;  %v1814_v38 = vpop.f32.mrb[149].mxu0  ;;  %4206 = vmatmul.mubr.msk.f32.gmra.mrb[254].mxu0 %vm528_vm1, %v4836_v26  ;;  %v1813_v3 = vadd.f32 %v1812_v56, %v5674_v45 }
 0x217   : > { %v6762_v58 = vpack.c.bf16 %v2867_v4, %v2851_v18  ;;  %v2869_v51 = vmax.f32 %v2066_v40, 0.0  ;;  %v2069_v37 = vpop.f32.mrb[148].mxu1  ;;  %3308 = vmatprep.mubr.f32.mxu0 %v6750_v30  ;;  %v1815_v55 = vadd.f32 %v1814_v38, %v5674_v45 }
 0x218   : > { %7583 = vst [vmem:[#allocation60_spill] sm:$0xff] %v6756_v9  ;;  %v6765_v14 = vpack.c.bf16 %v2868_v53, %v2852_v20  ;;  %v2071_v17 = vpop.f32.mrb[149].mxu1  ;;  %4240 = vmatmul.mubr.msk.f32.gmra.mrb[254].mxu1 %vm528_vm1, %v4836_v26  ;;  %v2070_v18 = vadd.f32 %v2069_v37, %v5674_v45  ;;  %v2882_v38 = vmax.f32 %v1813_v3, 0.0 }
 0x219   : > { %v6769_v2 = vpack.c.bf16 %v2869_v51, %v2853_v28  ;;  %v1818_v35 = vpop.f32.mrb[150].mxu0  ;;  %3379 = vmatprep.mubr.f32.mxu1 %v6750_v30  ;;  %v2072_v53 = vadd.f32 %v2071_v17, %v5674_v45  ;;  %v7586_v28 = vld [vmem:[#allocation69_spill] sm:$0xff]  ;;  %v2883_v37 = vmax.f32 %v1815_v55, 0.0  ;;  %v7587_v45 = vld [vmem:[#allocation67_spill] sm:$0xff]  ;;  %v7590_v55 = vld [vmem:[#allocation68_spill] sm:$0xff] }
 0x21a   : > { %7584 = vst [vmem:[#allocation63_spill] sm:$0xff] %v6765_v14  ;;  %v1819_v4 = vadd.f32 %v1818_v35, %v5682_v22  ;;  %v1820_v10 = vpop.f32.mrb[151].mxu0  ;;  %3309 = vmatmul.mubr.f32.vlgmr.msra.gmra.mrb[0].mxu0 %v6733_v21 }
 0x21b   : > { %v1821_v56 = vadd.f32 %v1820_v10, %v5682_v22  ;;  %4375 = vmatpush1.bf16.msra.mxu0 %v7585_v46  ;;  %v2075_v40 = vpop.f32.mrb[150].mxu1  ;;  %3450 = vmatprep.mubr.f32.mxu0 %v6750_v30  ;;  %v2884_v46 = vmax.f32 %v2070_v18, 0.0 }
 0x21c   : > { %v2898_v20 = vmax.f32 %v1819_v4, 0.0  ;;  %v2076_v26 = vadd.f32 %v2075_v40, %v5682_v22  ;;  %4377 = vmatprep.subr.bf16.mxu0 %v7586_v28  ;;  %v2077_v51 = vpop.f32.mrb[151].mxu1  ;;  %3380 = vmatmul.mubr.f32.vlgmr.msra.gmra.mrb[0].mxu1 %v6733_v21  ;;  %v7589_v4 = vld [vmem:[#allocation71_spill] sm:$0xff]  ;;  %v2885_v28 = vmax.f32 %v2072_v53, 0.0 }
 0x21d   : > { %v2899_v35 = vmax.f32 %v1821_v56, 0.0  ;;  %v2078_v17 = vadd.f32 %v2077_v51, %v5682_v22  ;;  %4439 = vmatpush1.bf16.msra.mxu1 %v7587_v45  ;;  %v1824_v10 = vpop.f32.mrb[152].mxu0  ;;  %3521 = vmatprep.mubr.f32.mxu1 %v6750_v30  ;;  %v7592_v22 = vld [vmem:[#allocation73_spill] sm:$0xff] }
 0x21e   : > { %v6786_v0 = vpack.c.bf16 %v2898_v20, %v2882_v38  ;;  %v2900_v3 = vmax.f32 %v2076_v26, 0.0  ;;  %4441 = vmatprep.subr.bf16.mxu1 %v7589_v4  ;;  %v1826_v40 = vpop.f32.mrb[153].mxu0  ;;  %v1825_v45 = vadd.f32 %v1824_v10, %v5712_v41  ;;  %v7594_v26 = vld [vmem:[#allocation70_spill] sm:$0xff] }
 0x21f   : > { %v6789_v14 = vpack.c.bf16 %v2899_v35, %v2883_v37  ;;  %v2901_v9 = vmax.f32 %v2078_v17, 0.0  ;;  %4379 = vmatpush1.bf16.msra.mxu0 %v7590_v55  ;;  %v2081_v56 = vpop.f32.mrb[152].mxu1  ;;  %v1827_v20 = vadd.f32 %v1826_v40, %v5712_v41  ;;  %v7595_v17 = vld [vmem:[#allocation75_spill] sm:$0xff]  ;;  %v7597_v55 = vld [vmem:[#allocation77_spill] sm:$0xff] }
 0x220   : > { %7588 = vst [vmem:[#allocation65_spill] sm:$0xff] %v6786_v0  ;;  %v6792_v51 = vpack.c.bf16 %v2900_v3, %v2884_v46  ;;  %4381 = vmatprep.subr.bf16.mxu0 %v7592_v22  ;;  %v2083_v18 = vpop.f32.mrb[153].mxu1  ;;  %v2082_v37 = vadd.f32 %v2081_v56, %v5712_v41  ;;  %v7596_v22 = vld [vmem:[#allocation72_spill] sm:$0xff]  ;;  %v2914_v4 = vmax.f32 %v1825_v45, 0.0 }
 0x221   : > { %v6796_v38 = vpack.c.bf16 %v2901_v9, %v2885_v28  ;;  %4443 = vmatpush1.bf16.msra.mxu1 %v7594_v26  ;;  %v1830_v53 = vpop.f32.mrb[154].mxu0  ;;  %v2084_v3 = vadd.f32 %v2083_v18, %v5712_v41  ;;  %v2915_v56 = vmax.f32 %v1827_v20, 0.0 }
 0x222   : > { %7591 = vst [vmem:[#allocation66_spill] sm:$0xff] %v6792_v51  ;;  %v1831_v35 = vadd.f32 %v1830_v53, %v5723_v29  ;;  %4445 = vmatprep.subr.bf16.mxu1 %v7595_v17  ;;  %v1832_v46 = vpop.f32.mrb[155].mxu0  ;;  %v7598_v17 = vld [vmem:[#allocation74_spill] sm:$0xff]  ;;  %v2916_v18 = vmax.f32 %v2082_v37, 0.0 }
 0x223   : > { %7593 = vst [vmem:[#allocation69_spill] sm:$0xff] %v6796_v38  ;;  %v1833_v10 = vadd.f32 %v1832_v46, %v5723_v29  ;;  %4383 = vmatpush1.bf16.msra.mxu0 %v7596_v22  ;;  %v2087_v9 = vpop.f32.mrb[154].mxu1  ;;  %v7599_v22 = vld [vmem:[#allocation79_spill] sm:$0xff] }
 0x224   : > { %v2930_v28 = vmax.f32 %v1831_v35, 0.0  ;;  %v2088_v40 = vadd.f32 %v2087_v9, %v5723_v29  ;;  %4385 = vmatprep.subr.bf16.mxu0 %v7597_v55  ;;  %v2089_v26 = vpop.f32.mrb[155].mxu1  ;;  %v2917_v35 = vmax.f32 %v2084_v3, 0.0  ;;  %v7600_v55 = vld [vmem:[#allocation76_spill] sm:$0xff] }
 0x225   : > { %v2931_v51 = vmax.f32 %v1833_v10, 0.0  ;;  %v2090_v53 = vadd.f32 %v2089_v26, %v5723_v29  ;;  %4447 = vmatpush1.bf16.msra.mxu1 %v7598_v17  ;;  %v1836_v0 = vpop.f32.mrb[156].mxu0 }
 0x226   : > { %v6810_v41 = vpack.c.bf16 %v2930_v28, %v2914_v4  ;;  %v2932_v46 = vmax.f32 %v2088_v40, 0.0  ;;  %4449 = vmatprep.subr.bf16.mxu1 %v7599_v22  ;;  %v1838_v45 = vpop.f32.mrb[157].mxu0  ;;  %v1837_v26 = vadd.f32 %v1836_v0, %v5747_v25  ;;  %v7601_v40 = vld [vmem:[#allocation78_spill] sm:$0xff] }
 0x227   : > { %v6813_v38 = vpack.c.bf16 %v2931_v51, %v2915_v56  ;;  %v2933_v9 = vmax.f32 %v2090_v53, 0.0  ;;  %4387 = vmatpush1.bf16.msra.mxu0 %v7600_v55  ;;  %v2093_v20 = vpop.f32.mrb[156].mxu1  ;;  %v1839_v28 = vadd.f32 %v1838_v45, %v5747_v25 }
 0x228   : > { %v6816_v10 = vpack.c.bf16 %v2932_v46, %v2916_v18  ;;  %4389 = vmatprep.subr.bf16.mxu0 %v6209_v43  ;;  %v2095_v37 = vpop.f32.mrb[157].mxu1  ;;  %v2094_v51 = vadd.f32 %v2093_v20, %v5747_v25  ;;  %v7602_v43 = vld [vmem:[#allocation80_spill] sm:$0xff]  ;;  %v2946_v46 = vmax.f32 %v1837_v26, 0.0 }
 0x229   : > { %v6820_v4 = vpack.c.bf16 %v2933_v9, %v2917_v35  ;;  %4451 = vmatpush1.bf16.msra.mxu1 %v7601_v40  ;;  %v1842_v3 = vpop.f32.mrb[158].mxu0  ;;  %v2096_v17 = vadd.f32 %v2095_v37, %v5747_v25  ;;  %v2947_v9 = vmax.f32 %v1839_v28, 0.0 }
 0x22a   : > { %v1843_v56 = vadd.f32 %v1842_v3, %v5757_v6  ;;  %4453 = vmatprep.subr.bf16.mxu1 %v6216_v52  ;;  %v1844_v53 = vpop.f32.mrb[159].mxu0  ;;  %v7603_v52 = vld [vmem:[#allocation81_spill] sm:$0xff]  ;;  %v2948_v37 = vmax.f32 %v2094_v51, 0.0 }
 0x22b   : > { %v1845_v0 = vadd.f32 %v1844_v53, %v5757_v6  ;;  %4391 = vmatpush1.bf16.msra.mxu0 %v7602_v43  ;;  %v2099_v18 = vpop.f32.mrb[158].mxu1 }
 0x22c   : > { %v2962_v22 = vmax.f32 %v1843_v56, 0.0  ;;  %v2100_v45 = vadd.f32 %v2099_v18, %v5757_v6  ;;  %4393 = vmatprep.subr.bf16.mxu0 %v6243_v33  ;;  %v2101_v35 = vpop.f32.mrb[159].mxu1  ;;  %v2949_v56 = vmax.f32 %v2096_v17, 0.0 }
 0x22d   : > { %v2963_v55 = vmax.f32 %v1845_v0, 0.0  ;;  %v2102_v20 = vadd.f32 %v2101_v35, %v5757_v6  ;;  %4455 = vmatpush1.bf16.msra.mxu1 %v7603_v52  ;;  %v1848_v40 = vpop.f32.mrb[160].mxu0 }
 0x22e   : > { %v6834_v3 = vpack.c.bf16 %v2962_v22, %v2946_v46  ;;  %v2964_v53 = vmax.f32 %v2100_v45, 0.0  ;;  %4457 = vmatprep.subr.bf16.mxu1 %v6252_v36  ;;  %v1850_v26 = vpop.f32.mrb[161].mxu0  ;;  %v1849_v0 = vadd.f32 %v1848_v40, %v5781_v63 }
 0x22f   : > { %v6837_v43 = vpack.c.bf16 %v2963_v55, %v2947_v9  ;;  %v2965_v18 = vmax.f32 %v2102_v20, 0.0  ;;  %4395 = vmatpush1.bf16.msra.mxu0 %v6236_v13  ;;  %v2105_v33 = vpop.f32.mrb[160].mxu1  ;;  %v1851_v22 = vadd.f32 %v1850_v26, %v5781_v63 }
 0x230   : > { %v6840_v28 = vpack.c.bf16 %v2964_v53, %v2948_v37  ;;  %4397 = vmatprep.subr.bf16.mxu0 %v6281_v27  ;;  %v2107_v51 = vpop.f32.mrb[161].mxu1  ;;  %v2106_v17 = vadd.f32 %v2105_v33, %v5781_v63  ;;  %v2978_v55 = vmax.f32 %v1849_v0, 0.0 }
 0x231   : > { %v6844_v46 = vpack.c.bf16 %v2965_v18, %v2949_v56  ;;  %4459 = vmatpush1.bf16.msra.mxu1 %v6247_v15  ;;  %v1854_v36 = vpop.f32.mrb[162].mxu0  ;;  %v2108_v35 = vadd.f32 %v2107_v51, %v5781_v63  ;;  %v2979_v40 = vmax.f32 %v1851_v22, 0.0 }
 0x232   : > { %v1855_v45 = vadd.f32 %v1854_v36, %v5791_v49  ;;  %4461 = vmatprep.subr.bf16.mxu1 %v6290_v44  ;;  %v1856_v13 = vpop.f32.mrb[163].mxu0  ;;  %v2980_v26 = vmax.f32 %v2106_v17, 0.0 }
 0x233   : > { %v1857_v9 = vadd.f32 %v1856_v13, %v5791_v49  ;;  %4399 = vmatpush1.bf16.msra.mxu0 %v6274_v5  ;;  %v2111_v27 = vpop.f32.mrb[162].mxu1  ;;  %v2981_v33 = vmax.f32 %v2108_v35, 0.0 }
 0x234   : > { %v2994_v20 = vmax.f32 %v1855_v45, 0.0  ;;  %v2112_v52 = vadd.f32 %v2111_v27, %v5791_v49  ;;  %4401 = vmatprep.subr.bf16.mxu0 %v6319_v19  ;;  %v2113_v15 = vpop.f32.mrb[163].mxu1 }
 0x235   : > { %v2995_v37 = vmax.f32 %v1857_v9, 0.0  ;;  %v2114_v53 = vadd.f32 %v2113_v15, %v5791_v49  ;;  %4463 = vmatpush1.bf16.msra.mxu1 %v6285_v39  ;;  %v1860_v44 = vpop.f32.mrb[164].mxu0 }
 0x236   : > { %v6858_v56 = vpack.c.bf16 %v2994_v20, %v2978_v55  ;;  %v2996_v18 = vmax.f32 %v2112_v52, 0.0  ;;  %4465 = vmatprep.subr.bf16.mxu1 %v6328_v16  ;;  %v1862_v5 = vpop.f32.mrb[165].mxu0  ;;  %v1861_v36 = vadd.f32 %v1860_v44, %v7504_v48 }
 0x237   : > { %v6861_v0 = vpack.c.bf16 %v2995_v37, %v2979_v40  ;;  %v2997_v51 = vmax.f32 %v2114_v53, 0.0  ;;  %4403 = vmatpush1.bf16.msra.mxu0 %v6312_v7  ;;  %v2117_v19 = vpop.f32.mrb[164].mxu1  ;;  %v1863_v45 = vadd.f32 %v1862_v5, %v7504_v48 }
 0x238   : > { %v6864_v22 = vpack.c.bf16 %v2996_v18, %v2980_v26  ;;  %4405 = vmatprep.subr.bf16.mxu0 %v6357_v61  ;;  %v2119_v39 = vpop.f32.mrb[165].mxu1  ;;  %v2118_v13 = vadd.f32 %v2117_v19, %v7504_v48  ;;  %v3010_v55 = vmax.f32 %v1861_v36, 0.0  ;;  %v7605_v36 = vld [vmem:[#allocation29_spill] sm:$0xff] }
 0x239   : > { %v6868_v17 = vpack.c.bf16 %v2997_v51, %v2981_v33  ;;  %4467 = vmatpush1.bf16.msra.mxu1 %v6323_v12  ;;  %v1866_v16 = vpop.f32.mrb[166].mxu0  ;;  %v2120_v9 = vadd.f32 %v2119_v39, %v7504_v48  ;;  %v3011_v15 = vmax.f32 %v1863_v45, 0.0 }
 0x23a   : > { %v1867_v35 = vadd.f32 %v1866_v16, %v7507_v31  ;;  %4469 = vmatprep.subr.bf16.mxu1 %v6366_v34  ;;  %v1868_v7 = vpop.f32.mrb[167].mxu0  ;;  %v3012_v53 = vmax.f32 %v2118_v13, 0.0 }
 0x23b   : > { %v1869_v27 = vadd.f32 %v1868_v7, %v7507_v31  ;;  %4407 = vmatpush1.bf16.msra.mxu0 %v6350_v62  ;;  %v2123_v61 = vpop.f32.mrb[166].mxu1  ;;  %v3013_v18 = vmax.f32 %v2120_v9, 0.0  ;;  %v7608_v9 = vld [vmem:[#allocation32_spill] sm:$0xff] }
 0x23c   : > { %v3026_v20 = vmax.f32 %v1867_v35, 0.0  ;;  %v2124_v52 = vadd.f32 %v2123_v61, %v7507_v31  ;;  %4409 = vmatprep.subr.bf16.mxu0 %v6395_v47  ;;  %v2125_v12 = vpop.f32.mrb[167].mxu1  ;;  %v7604_v47 = vld [vmem:[#allocation16_spill] sm:$0xff]  ;;  %v7609_v61 = vld [vmem:[#allocation25_spill] sm:$0xff] }
 0x23d   : > { %v3027_v40 = vmax.f32 %v1869_v27, 0.0  ;;  %v2126_v37 = vadd.f32 %v2125_v12, %v7507_v31  ;;  %4471 = vmatpush1.bf16.msra.mxu1 %v6361_v42  ;;  %v1872_v34 = vpop.f32.mrb[168].mxu0  ;;  %v7606_v42 = vld [vmem:[#allocation22_spill] sm:$0xff]  ;;  %v7610_v12 = vld [vmem:[#allocation17_spill] sm:$0xff] }
 0x23e   : > { %v6882_v44 = vpack.c.bf16 %v3026_v20, %v3010_v55  ;;  %v3028_v26 = vmax.f32 %v2124_v52, 0.0  ;;  %4473 = vmatprep.subr.bf16.mxu1 %v6404_v8  ;;  %v1874_v62 = vpop.f32.mrb[169].mxu0  ;;  %v1873_v39 = vadd.f32 %v1872_v34, %v7605_v36  ;;  %v7607_v8 = vld [vmem:[#allocation19_spill] sm:$0xff] }
 0x23f   : > { %v6885_v5 = vpack.c.bf16 %v3027_v40, %v3011_v15  ;;  %v3029_v33 = vmax.f32 %v2126_v37, 0.0  ;;  %4411 = vmatpush1.bf16.msra.mxu0 %v7604_v47  ;;  %v2129_v51 = vpop.f32.mrb[168].mxu1  ;;  %v1875_v13 = vadd.f32 %v1874_v62, %v7605_v36 }
 0x240   : > { %v6888_v19 = vpack.c.bf16 %v3028_v26, %v3012_v53  ;;  %4413 = vmatprep.subr.bf16.mxu0 %v7606_v42  ;;  %v2131_v45 = vpop.f32.mrb[169].mxu1  ;;  %v2130_v7 = vadd.f32 %v2129_v51, %v7605_v36  ;;  %v3042_v40 = vmax.f32 %v1873_v39, 0.0 }
 0x241   : > { %v6892_v16 = vpack.c.bf16 %v3029_v33, %v3013_v18  ;;  %4475 = vmatpush1.bf16.msra.mxu1 %v7607_v8  ;;  %v1878_v35 = vpop.f32.mrb[170].mxu0  ;;  %v2132_v20 = vadd.f32 %v2131_v45, %v7605_v36  ;;  %v3043_v26 = vmax.f32 %v1875_v13, 0.0  ;;  %v7611_v33 = vld [vmem:[#allocation18_spill] sm:$0xff]  ;;  %v7612_v8 = vld [vmem:[#allocation24_spill] sm:$0xff] }
 0x242   : > { %v1879_v27 = vadd.f32 %v1878_v35, %v7608_v9  ;;  %4477 = vmatprep.subr.bf16.mxu1 %v7609_v61  ;;  %v1880_v55 = vpop.f32.mrb[171].mxu0  ;;  %v3044_v51 = vmax.f32 %v2130_v7, 0.0 }
 0x243   : > { %v1881_v52 = vadd.f32 %v1880_v55, %v7608_v9  ;;  %4415 = vmatpush1.bf16.msra.mxu0 %v7610_v12  ;;  %v2135_v15 = vpop.f32.mrb[170].mxu1  ;;  %v3045_v35 = vmax.f32 %v2132_v20, 0.0 }
 0x244   : > { %v3058_v37 = vmax.f32 %v1879_v27, 0.0  ;;  %v2136_v34 = vadd.f32 %v2135_v15, %v7608_v9  ;;  %4417 = vmatprep.subr.bf16.mxu0 %v6471_v57  ;;  %v2137_v53 = vpop.f32.mrb[171].mxu1  ;;  %v7613_v57 = vld [vmem:[#allocation21_spill] sm:$0xff] }
 0x245   : > { %v3059_v62 = vmax.f32 %v1881_v52, 0.0  ;;  %v2138_v18 = vadd.f32 %v2137_v53, %v7608_v9  ;;  %4479 = vmatpush1.bf16.msra.mxu1 %v7611_v33  ;;  %v1884_v47 = vpop.f32.mrb[172].mxu0  ;;  %v7614_v52 = vld [vmem:[#allocation35_spill] sm:$0xff]  ;;  %v7616_v53 = vld [vmem:[#allocation38_spill] sm:$0xff] }
 0x246   : > { %v6906_v42 = vpack.c.bf16 %v3058_v37, %v3042_v40  ;;  %v3060_v45 = vmax.f32 %v2136_v34, 0.0  ;;  %4481 = vmatprep.subr.bf16.mxu1 %v7612_v8  ;;  %v1886_v39 = vpop.f32.mrb[173].mxu0  ;;  %v1885_v12 = vadd.f32 %v1884_v47, %v7614_v52  ;;  %v7615_v37 = vld [vmem:[#allocation28_spill] sm:$0xff] }
 0x247   : > { %v6909_v27 = vpack.c.bf16 %v3059_v62, %v3043_v26  ;;  %v3061_v61 = vmax.f32 %v2138_v18, 0.0  ;;  %4419 = vmatpush1.bf16.msra.mxu0 %v7613_v57  ;;  %v2141_v13 = vpop.f32.mrb[172].mxu1  ;;  %v1887_v40 = vadd.f32 %v1886_v39, %v7614_v52 }
 0x248   : > { %v6912_v55 = vpack.c.bf16 %v3060_v45, %v3044_v51  ;;  %4421 = vmatprep.subr.bf16.mxu0 %v6509_v60  ;;  %v2143_v7 = vpop.f32.mrb[173].mxu1  ;;  %v2142_v34 = vadd.f32 %v2141_v13, %v7614_v52  ;;  %v3074_v47 = vmax.f32 %v1885_v12, 0.0 }
 0x249   : > { %v6916_v15 = vpack.c.bf16 %v3061_v61, %v3045_v35  ;;  %4483 = vmatpush1.bf16.msra.mxu1 %v7615_v37  ;;  %v1890_v20 = vpop.f32.mrb[174].mxu0  ;;  %v2144_v18 = vadd.f32 %v2143_v7, %v7614_v52  ;;  %v3075_v39 = vmax.f32 %v1887_v40, 0.0 }
 0x24a   : > { %v1891_v26 = vadd.f32 %v1890_v20, %v7616_v53  ;;  %4485 = vmatprep.subr.bf16.mxu1 %v6518_v59  ;;  %v1892_v62 = vpop.f32.mrb[175].mxu0  ;;  %v7617_v59 = vld [vmem:[#allocation31_spill] sm:$0xff]  ;;  %v3076_v13 = vmax.f32 %v2142_v34, 0.0 }
 0x24b   : > { %v1893_v33 = vadd.f32 %v1892_v62, %v7616_v53  ;;  %4423 = vmatpush1.bf16.msra.mxu0 %v6502_v54  ;;  %v2147_v60 = vpop.f32.mrb[174].mxu1  ;;  %v7618_v54 = vld [vmem:[#allocation30_spill] sm:$0xff]  ;;  %v3077_v20 = vmax.f32 %v2144_v18, 0.0 }
 0x24c   : > { %v3090_v51 = vmax.f32 %v1891_v26, 0.0  ;;  %v2148_v45 = vadd.f32 %v2147_v60, %v7616_v53  ;;  %4425 = vmatprep.subr.bf16.mxu0 %v6543_v23  ;;  %v2149_v8 = vpop.f32.mrb[175].mxu1  ;;  %v7619_v23 = vld [vmem:[#allocation27_spill] sm:$0xff]  ;;  %v7620_v60 = vld [vmem:[#allocation41_spill] sm:$0xff] }
 0x24d   : > { %v3091_v35 = vmax.f32 %v1893_v33, 0.0  ;;  %v2150_v61 = vadd.f32 %v2149_v8, %v7616_v53  ;;  %4487 = vmatpush1.bf16.msra.mxu1 %v7617_v59  ;;  %v1896_v57 = vpop.f32.mrb[176].mxu0  ;;  %v7621_v59 = vld [vmem:[#allocation33_spill] sm:$0xff] }
 0x24e   : > { %v6930_v7 = vpack.c.bf16 %v3090_v51, %v3074_v47  ;;  %v3092_v37 = vmax.f32 %v2148_v45, 0.0  ;;  %4489 = vmatprep.subr.bf16.mxu1 %v7618_v54  ;;  %v1898_v12 = vpop.f32.mrb[177].mxu0  ;;  %v1897_v8 = vadd.f32 %v1896_v57, %v7620_v60  ;;  %v7622_v45 = vld [vmem:[#allocation34_spill] sm:$0xff]  ;;  %v7624_v54 = vld [vmem:[#allocation36_spill] sm:$0xff] }
 0x24f   : > { %v6933_v26 = vpack.c.bf16 %v3091_v35, %v3075_v39  ;;  %v3093_v62 = vmax.f32 %v2150_v61, 0.0  ;;  %4427 = vmatpush1.bf16.msra.mxu0 %v7619_v23  ;;  %v2153_v40 = vpop.f32.mrb[176].mxu1  ;;  %v1899_v51 = vadd.f32 %v1898_v12, %v7620_v60  ;;  %v7623_v35 = vld [vmem:[#allocation44_spill] sm:$0xff]  ;;  %v7625_v23 = vld [vmem:[#allocation37_spill] sm:$0xff] }
 0x250   : > { %v6936_v33 = vpack.c.bf16 %v3092_v37, %v3076_v13  ;;  %4429 = vmatprep.subr.bf16.mxu0 %v7621_v59  ;;  %v2155_v34 = vpop.f32.mrb[177].mxu1  ;;  %v2154_v39 = vadd.f32 %v2153_v40, %v7620_v60 }
 0x251   : > { %v6940_v47 = vpack.c.bf16 %v3093_v62, %v3077_v20  ;;  %4491 = vmatpush1.bf16.msra.mxu1 %v7622_v45  ;;  %v1902_v18 = vpop.f32.mrb[178].mxu0  ;;  %v2156_v37 = vadd.f32 %v2155_v34, %v7620_v60  ;;  %v3106_v62 = vmax.f32 %v1897_v8, 0.0  ;;  %v7626_v45 = vld [vmem:[#allocation39_spill] sm:$0xff]  ;;  %v3107_v40 = vmax.f32 %v1899_v51, 0.0 }
 0x252   : > { %v1903_v61 = vadd.f32 %v1902_v18, %v7623_v35  ;;  %4493 = vmatprep.subr.bf16.mxu1 %v7624_v54  ;;  %v1904_v13 = vpop.f32.mrb[179].mxu0  ;;  %v7627_v54 = vld [vmem:[#allocation40_spill] sm:$0xff]  ;;  %v3108_v34 = vmax.f32 %v2154_v39, 0.0 }
 0x253   : > { %v1905_v57 = vadd.f32 %v1904_v13, %v7623_v35  ;;  %4431 = vmatpush1.bf16.msra.mxu0 %v7625_v23  ;;  %v2159_v20 = vpop.f32.mrb[178].mxu1  ;;  %v7628_v23 = vld [vmem:[#allocation42_spill] sm:$0xff] }
 0x254   : > { %v3122_v59 = vmax.f32 %v1903_v61, 0.0  ;;  %v2160_v12 = vadd.f32 %v2159_v20, %v7623_v35  ;;  %4433 = vmatprep.subr.bf16.mxu0 %v7626_v45  ;;  %v2161_v53 = vpop.f32.mrb[179].mxu1  ;;  %v3109_v61 = vmax.f32 %v2156_v37, 0.0  ;;  %v7629_v45 = vld [vmem:[#allocation43_spill] sm:$0xff] }
 0x255   : > { %v3123_v52 = vmax.f32 %v1905_v57, 0.0  ;;  %v2162_v18 = vadd.f32 %v2161_v53, %v7623_v35  ;;  %4495 = vmatpush1.bf16.msra.mxu1 %v7627_v54  ;;  %v1908_v9 = vpop.f32.mrb[180].mxu0  ;;  %v7630_v53 = vld [vmem:[#allocation47_spill] sm:$0xff]  ;;  %v7633_v54 = vld [vmem:[#allocation52_spill] sm:$0xff] }
 0x256   : > { %v6954_v60 = vpack.c.bf16 %v3122_v59, %v3106_v62  ;;  %v3124_v13 = vmax.f32 %v2160_v12, 0.0  ;;  %4497 = vmatprep.subr.bf16.mxu1 %v7628_v23  ;;  %v1910_v8 = vpop.f32.mrb[181].mxu0  ;;  %v1909_v35 = vadd.f32 %v1908_v9, %v7630_v53  ;;  %v7631_v12 = vld [vmem:[#allocation46_spill] sm:$0xff] }
 0x257   : > { %v6957_v36 = vpack.c.bf16 %v3123_v52, %v3107_v40  ;;  %v3125_v20 = vmax.f32 %v2162_v18, 0.0  ;;  %4435 = vmatpush1.bf16.msra.mxu0 %v7629_v45  ;;  %v2165_v51 = vpop.f32.mrb[180].mxu1  ;;  %v1911_v59 = vadd.f32 %v1910_v8, %v7630_v53  ;;  %v7632_v40 = vld [vmem:[#allocation50_spill] sm:$0xff] }
 0x258   : > { %v6960_v57 = vpack.c.bf16 %v3124_v13, %v3108_v34  ;;  %4501 = vmatprep.subr.bf16.mxu0 %v6633_v24  ;;  %v2167_v39 = vpop.f32.mrb[181].mxu1  ;;  %v2166_v52 = vadd.f32 %v2165_v51, %v7630_v53  ;;  %v7634_v13 = vld [vmem:[#allocation49_spill] sm:$0xff]  ;;  %v3138_v8 = vmax.f32 %v1909_v35, 0.0 }
 0x259   : > { %v6964_v62 = vpack.c.bf16 %v3125_v20, %v3109_v61  ;;  %4499 = vmatpush1.bf16.msra.mxu1 %v7631_v12  ;;  %v1914_v37 = vpop.f32.mrb[182].mxu0  ;;  %v2168_v9 = vadd.f32 %v2167_v39, %v7630_v53  ;;  %v3139_v51 = vmax.f32 %v1911_v59, 0.0  ;;  %v7636_v59 = vld [vmem:[#allocation48_spill] sm:$0xff] }
 0x25a   : > { %v1915_v18 = vadd.f32 %v1914_v37, %v7632_v40  ;;  %3451 = vmatmul.mubr.f32.vlgmr.msra.gmra.mrb[2].mxu0 %v6733_v21  ;;  %4565 = vmatprep.subr.bf16.mxu1 %v7633_v54  ;;  %v1916_v34 = vpop.f32.mrb[183].mxu0  ;;  %v7635_v37 = vld [vmem:[#allocation45_spill] sm:$0xff] }
 0x25b   : > { %v1917_v24 = vadd.f32 %v1916_v34, %v7632_v40  ;;  %4503 = vmatpush1.bf16.msra.mxu0 %v7634_v13  ;;  %v2171_v23 = vpop.f32.mrb[182].mxu1  ;;  %3592 = vmatprep.mubr.f32.mxu0 %v6750_v30  ;;  %v3140_v34 = vmax.f32 %v2166_v52, 0.0 }
 0x25c   : > { %v3154_v61 = vmax.f32 %v1915_v18, 0.0  ;;  %v2172_v20 = vadd.f32 %v2171_v23, %v7632_v40  ;;  %3522 = vmatmul.mubr.f32.vlgmr.msra.gmra.mrb[2].mxu1 %v6733_v21  ;;  %4505 = vmatprep.subr.bf16.mxu0 %v6663_v32  ;;  %v2173_v45 = vpop.f32.mrb[183].mxu1  ;;  %v3141_v21 = vmax.f32 %v2168_v9, 0.0 }
 0x25d   : > { %v3155_v12 = vmax.f32 %v1917_v24, 0.0  ;;  %v2174_v39 = vadd.f32 %v2173_v45, %v7632_v40  ;;  %4567 = vmatpush1.bf16.msra.mxu1 %v7635_v37  ;;  %v1920_v54 = vpop.f32.mrb[184].mxu0  ;;  %3663 = vmatprep.mubr.f32.mxu1 %v6750_v30  ;;  %v7637_v37 = vld [vmem:[#allocation53_spill] sm:$0xff] }
 0x25e   : > { %v6982_v13 = vpack.c.bf16 %v3154_v61, %v3138_v8  ;;  %v3156_v35 = vmax.f32 %v2172_v20, 0.0  ;;  %4569 = vmatprep.subr.bf16.mxu1 %v6670_v1  ;;  %v1922_v18 = vpop.f32.mrb[185].mxu0  ;;  %v1921_v40 = vadd.f32 %v1920_v54, %v7637_v37  ;;  %v7638_v1 = vld [vmem:[#allocation55_spill] sm:$0xff] }
 0x25f   : > { %v6985_v23 = vpack.c.bf16 %v3155_v12, %v3139_v51  ;;  %v3157_v32 = vmax.f32 %v2174_v39, 0.0  ;;  %4507 = vmatpush1.bf16.msra.mxu0 %v7636_v59  ;;  %v2177_v24 = vpop.f32.mrb[184].mxu1  ;;  %v1923_v61 = vadd.f32 %v1922_v18, %v7637_v37  ;;  %v7639_v51 = vld [vmem:[#allocation56_spill] sm:$0xff]  ;;  %v7641_v59 = vld [vmem:[#allocation61_spill] sm:$0xff] }
 0x260   : > { %v6988_v45 = vpack.c.bf16 %v3156_v35, %v3140_v34  ;;  %4509 = vmatprep.subr.bf16.mxu0 %v6693_v11  ;;  %v2179_v52 = vpop.f32.mrb[185].mxu1  ;;  %v2178_v20 = vadd.f32 %v2177_v24, %v7637_v37  ;;  %v7640_v11 = vld [vmem:[#allocation51_spill] sm:$0xff] }
 0x261   : > { %v6992_v8 = vpack.c.bf16 %v3157_v32, %v3141_v21  ;;  %4571 = vmatpush1.bf16.msra.mxu1 %v7638_v1  ;;  %v1926_v9 = vpop.f32.mrb[186].mxu0  ;;  %v2180_v34 = vadd.f32 %v2179_v52, %v7637_v37  ;;  %v3170_v21 = vmax.f32 %v1921_v40, 0.0  ;;  %v3171_v24 = vmax.f32 %v1923_v61, 0.0 }
 0x262   : > { %v1927_v12 = vadd.f32 %v1926_v9, %v7639_v51  ;;  %4573 = vmatprep.subr.bf16.mxu1 %v6700_v50  ;;  %v1928_v39 = vpop.f32.mrb[187].mxu0  ;;  %v7642_v50 = vld [vmem:[#allocation58_spill] sm:$0xff]  ;;  %v3172_v52 = vmax.f32 %v2178_v20, 0.0 }
 0x263   : > { %v1929_v54 = vadd.f32 %v1928_v39, %v7639_v51  ;;  %4511 = vmatpush1.bf16.msra.mxu0 %v7640_v11  ;;  %v2183_v35 = vpop.f32.mrb[186].mxu1  ;;  %v7643_v11 = vld [vmem:[#allocation64_spill] sm:$0xff] }
 0x264   : > { %v3186_v32 = vmax.f32 %v1927_v12, 0.0  ;;  %v2184_v18 = vadd.f32 %v2183_v35, %v7639_v51  ;;  %4513 = vmatprep.subr.bf16.mxu0 %v7641_v59  ;;  %v2185_v1 = vpop.f32.mrb[187].mxu1  ;;  %v3173_v12 = vmax.f32 %v2180_v34, 0.0  ;;  %v7644_v59 = vld [vmem:[#allocation54_spill] sm:$0xff] }
 0x265   : > { %v3187_v53 = vmax.f32 %v1929_v54, 0.0  ;;  %v2186_v9 = vadd.f32 %v2185_v1, %v7639_v51  ;;  %4575 = vmatpush1.bf16.msra.mxu1 %v7642_v50  ;;  %v1932_v31 = vpop.f32.mrb[188].mxu0  ;;  %v7645_v1 = vld [vmem:[#allocation59_spill] sm:$0xff] }
 0x266   : > { %v7006_v37 = vpack.c.bf16 %v3186_v32, %v3170_v21  ;;  %v3188_v39 = vmax.f32 %v2184_v18, 0.0  ;;  %4577 = vmatprep.subr.bf16.mxu1 %v7643_v11  ;;  %v1934_v40 = vpop.f32.mrb[189].mxu0  ;;  %v1933_v51 = vadd.f32 %v1932_v31, %v7645_v1  ;;  %v7646_v18 = vld [vmem:[#allocation57_spill] sm:$0xff] }
 0x267   : > { %v7009_v48 = vpack.c.bf16 %v3187_v53, %v3171_v24  ;;  %v3189_v35 = vmax.f32 %v2186_v9, 0.0  ;;  %4515 = vmatpush1.bf16.msra.mxu0 %v7644_v59  ;;  %v2189_v61 = vpop.f32.mrb[188].mxu1  ;;  %v1935_v32 = vadd.f32 %v1934_v40, %v7645_v1  ;;  %v7647_v24 = vld [vmem:[#allocation62_spill] sm:$0xff] }
 0x268   : > { %v7012_v54 = vpack.c.bf16 %v3188_v39, %v3172_v52  ;;  %4517 = vmatprep.subr.bf16.mxu0 %v6762_v58  ;;  %v2191_v20 = vpop.f32.mrb[189].mxu1  ;;  %v2190_v53 = vadd.f32 %v2189_v61, %v7645_v1  ;;  %v7648_v58 = vld [vmem:[#allocation60_spill] sm:$0xff]  ;;  %v3202_v11 = vmax.f32 %v1933_v51, 0.0 }
 0x269   : > { %v7016_v21 = vpack.c.bf16 %v3189_v35, %v3173_v12  ;;  %4579 = vmatpush1.bf16.msra.mxu1 %v7646_v18  ;;  %v1938_v34 = vpop.f32.mrb[190].mxu0  ;;  %v2192_v52 = vadd.f32 %v2191_v20, %v7645_v1  ;;  %v3203_v59 = vmax.f32 %v1935_v32, 0.0 }
 0x26a   : > { %v1939_v9 = vadd.f32 %v1938_v34, %v7647_v24  ;;  %4581 = vmatprep.subr.bf16.mxu1 %v6769_v2  ;;  %v1940_v50 = vpop.f32.mrb[191].mxu0  ;;  %v7649_v2 = vld [vmem:[#allocation63_spill] sm:$0xff]  ;;  %v3204_v20 = vmax.f32 %v2190_v53, 0.0 }
 0x26b   : > { %v1941_v31 = vadd.f32 %v1940_v50, %v7647_v24  ;;  %4519 = vmatpush1.bf16.msra.mxu0 %v7648_v58  ;;  %v2195_v39 = vpop.f32.mrb[190].mxu1  ;;  %v7650_v58 = vld [vmem:[#allocation69_spill] sm:$0xff] }
 0x26c   : > { %v3218_v12 = vmax.f32 %v1939_v9, 0.0  ;;  %v2196_v40 = vadd.f32 %v2195_v39, %v7647_v24  ;;  %4521 = vmatprep.subr.bf16.mxu0 %v6789_v14  ;;  %v2197_v35 = vpop.f32.mrb[191].mxu1  ;;  %v3205_v9 = vmax.f32 %v2192_v52, 0.0  ;;  %v7651_v14 = vld [vmem:[#allocation65_spill] sm:$0xff] }
 0x26d   : > { %v3219_v61 = vmax.f32 %v1941_v31, 0.0  ;;  %v2198_v18 = vadd.f32 %v2197_v35, %v7647_v24  ;;  %4583 = vmatpush1.bf16.msra.mxu1 %v7649_v2  ;;  %v2266_v34 = vpop.f32.mrb[192].mxu0  ;;  %v7652_v35 = vld [vmem:[#allocation3_spill] sm:$0xff] }
 0x26e   : > { %v7030_v1 = vpack.c.bf16 %v3218_v12, %v3202_v11  ;;  %v3220_v50 = vmax.f32 %v2196_v40, 0.0  ;;  %4585 = vmatprep.subr.bf16.mxu1 %v7650_v58  ;;  %v2268_v51 = vpop.f32.mrb[193].mxu0  ;;  %v2267_v24 = vadd.f32 %v2266_v34, %v7652_v35  ;;  %v7653_v40 = vld [vmem:[#allocation66_spill] sm:$0xff] }
 0x26f   : > { %v7033_v49 = vpack.c.bf16 %v3219_v61, %v3203_v59  ;;  %v3221_v39 = vmax.f32 %v2198_v18, 0.0  ;;  %4523 = vmatpush1.bf16.msra.mxu0 %v7651_v14  ;;  %v2523_v32 = vpop.f32.mrb[192].mxu1  ;;  %v2269_v12 = vadd.f32 %v2268_v51, %v7652_v35  ;;  %v7654_v61 = vld [vmem:[#allocation4_spill] sm:$0xff] }
 0x270   : > { %v7036_v31 = vpack.c.bf16 %v3220_v50, %v3204_v20  ;;  %4525 = vmatprep.subr.bf16.mxu0 %v6813_v38  ;;  %v2525_v53 = vpop.f32.mrb[193].mxu1  ;;  %v2524_v59 = vadd.f32 %v2523_v32, %v7652_v35  ;;  %v2726_v50 = vmax.f32 %v2267_v24, 0.0 }
 0x271   : > { %v7040_v11 = vpack.c.bf16 %v3221_v39, %v3205_v9  ;;  %4587 = vmatpush1.bf16.msra.mxu1 %v7653_v40  ;;  %v2272_v52 = vpop.f32.mrb[194].mxu0  ;;  %v2526_v20 = vadd.f32 %v2525_v53, %v7652_v35  ;;  %v2727_v39 = vmax.f32 %v2269_v12, 0.0 }
 0x272   : > { %v2273_v18 = vadd.f32 %v2272_v52, %v7654_v61  ;;  %4589 = vmatprep.subr.bf16.mxu1 %v6820_v4  ;;  %v2274_v2 = vpop.f32.mrb[195].mxu0  ;;  %v2728_v35 = vmax.f32 %v2524_v59, 0.0 }
 0x273   : > { %v2275_v34 = vadd.f32 %v2274_v2, %v7654_v61  ;;  %4527 = vmatpush1.bf16.msra.mxu0 %v6810_v41  ;;  %v2529_v38 = vpop.f32.mrb[194].mxu1  ;;  %v2729_v24 = vmax.f32 %v2526_v20, 0.0 }
 0x274   : > { %v2742_v58 = vmax.f32 %v2273_v18, 0.0  ;;  %v2530_v51 = vadd.f32 %v2529_v38, %v7654_v61  ;;  %4529 = vmatprep.subr.bf16.mxu0 %v6837_v43  ;;  %v2531_v9 = vpop.f32.mrb[195].mxu1  ;;  %v7656_v38 = vld [vmem:[#allocation6_spill] sm:$0xff] }
 0x275   : > { %v2743_v14 = vmax.f32 %v2275_v34, 0.0  ;;  %v2532_v32 = vadd.f32 %v2531_v9, %v7654_v61  ;;  %4591 = vmatpush1.bf16.msra.mxu1 %v6816_v10  ;;  %v2278_v4 = vpop.f32.mrb[196].mxu0  ;;  %v7655_v61 = vld [vmem:[#allocation5_spill] sm:$0xff] }
 0x276   : > { %v7054_v53 = vpack.c.bf16 %v2742_v58, %v2726_v50  ;;  %v2744_v40 = vmax.f32 %v2530_v51, 0.0  ;;  %4593 = vmatprep.subr.bf16.mxu1 %v6844_v46  ;;  %v2280_v41 = vpop.f32.mrb[197].mxu0  ;;  %v2279_v2 = vadd.f32 %v2278_v4, %v7655_v61 }
 0x277   : > { %v7057_v52 = vpack.c.bf16 %v2743_v14, %v2727_v39  ;;  %v2745_v18 = vmax.f32 %v2532_v32, 0.0  ;;  %4531 = vmatpush1.bf16.msra.mxu0 %v6834_v3  ;;  %v2535_v43 = vpop.f32.mrb[196].mxu1  ;;  %v2281_v34 = vadd.f32 %v2280_v41, %v7655_v61 }
 0x278   : > { %v7060_v12 = vpack.c.bf16 %v2744_v40, %v2728_v35  ;;  %4533 = vmatprep.subr.bf16.mxu0 %v6861_v0  ;;  %v2537_v10 = vpop.f32.mrb[197].mxu1  ;;  %v2536_v20 = vadd.f32 %v2535_v43, %v7655_v61  ;;  %v2758_v9 = vmax.f32 %v2279_v2, 0.0 }
 0x279   : > { %v7064_v59 = vpack.c.bf16 %v2745_v18, %v2729_v24  ;;  %4595 = vmatpush1.bf16.msra.mxu1 %v6840_v28  ;;  %v2284_v46 = vpop.f32.mrb[198].mxu0  ;;  %v2538_v58 = vadd.f32 %v2537_v10, %v7655_v61  ;;  %v2759_v32 = vmax.f32 %v2281_v34, 0.0  ;;  %v7657_v10 = vld [vmem:[#allocation7_spill] sm:$0xff] }
 0x27a   : > { %v2285_v50 = vadd.f32 %v2284_v46, %v7656_v38  ;;  %4597 = vmatprep.subr.bf16.mxu1 %v6868_v17  ;;  %v2286_v3 = vpop.f32.mrb[199].mxu0  ;;  %v2760_v40 = vmax.f32 %v2536_v20, 0.0 }
 0x27b   : > { %v2287_v51 = vadd.f32 %v2286_v3, %v7656_v38  ;;  %4535 = vmatpush1.bf16.msra.mxu0 %v6858_v56  ;;  %v2541_v0 = vpop.f32.mrb[198].mxu1  ;;  %v2761_v18 = vmax.f32 %v2538_v58, 0.0 }
 0x27c   : > { %v2774_v39 = vmax.f32 %v2285_v50, 0.0  ;;  %v2542_v14 = vadd.f32 %v2541_v0, %v7656_v38  ;;  %4537 = vmatprep.subr.bf16.mxu0 %v6885_v5  ;;  %v2543_v28 = vpop.f32.mrb[199].mxu1  ;;  %v7658_v50 = vld [vmem:[#allocation8_spill] sm:$0xff] }
 0x27d   : > { %v2775_v4 = vmax.f32 %v2287_v51, 0.0  ;;  %v2544_v35 = vadd.f32 %v2543_v28, %v7656_v38  ;;  %4599 = vmatpush1.bf16.msra.mxu1 %v6864_v22  ;;  %v2290_v17 = vpop.f32.mrb[200].mxu0 }
 0x27e   : > { %v7078_v41 = vpack.c.bf16 %v2774_v39, %v2758_v9  ;;  %v2776_v24 = vmax.f32 %v2542_v14, 0.0  ;;  %4601 = vmatprep.subr.bf16.mxu1 %v6892_v16  ;;  %v2292_v56 = vpop.f32.mrb[201].mxu0  ;;  %v2291_v34 = vadd.f32 %v2290_v17, %v7657_v10 }
 0x27f   : > { %v7081_v43 = vpack.c.bf16 %v2775_v4, %v2759_v32  ;;  %v2777_v61 = vmax.f32 %v2544_v35, 0.0  ;;  %4539 = vmatpush1.bf16.msra.mxu0 %v6882_v44  ;;  %v2547_v5 = vpop.f32.mrb[200].mxu1  ;;  %v2293_v20 = vadd.f32 %v2292_v56, %v7657_v10 }
 0x280   : > { %v7084_v2 = vpack.c.bf16 %v2776_v24, %v2760_v40  ;;  %4541 = vmatprep.subr.bf16.mxu0 %v6909_v27  ;;  %v2549_v22 = vpop.f32.mrb[201].mxu1  ;;  %v2548_v38 = vadd.f32 %v2547_v5, %v7657_v10  ;;  %v2790_v0 = vmax.f32 %v2291_v34, 0.0 }
 0x281   : > { %v7088_v46 = vpack.c.bf16 %v2777_v61, %v2761_v18  ;;  %4603 = vmatpush1.bf16.msra.mxu1 %v6888_v19  ;;  %v2296_v16 = vpop.f32.mrb[202].mxu0  ;;  %v2550_v58 = vadd.f32 %v2549_v22, %v7657_v10  ;;  %v2791_v14 = vmax.f32 %v2293_v20, 0.0  ;;  %v7659_v61 = vld [vmem:[#allocation9_spill] sm:$0xff]  ;;  %v7660_v20 = vld [vmem:[#allocation10_spill] sm:$0xff] }
 0x282   : > { %v2297_v3 = vadd.f32 %v2296_v16, %v7658_v50  ;;  %4605 = vmatprep.subr.bf16.mxu1 %v6916_v15  ;;  %v2298_v44 = vpop.f32.mrb[203].mxu0  ;;  %v2792_v4 = vmax.f32 %v2548_v38, 0.0 }
 0x283   : > { %v2299_v51 = vadd.f32 %v2298_v44, %v7658_v50  ;;  %4543 = vmatpush1.bf16.msra.mxu0 %v6906_v42  ;;  %v2553_v27 = vpop.f32.mrb[202].mxu1  ;;  %v2793_v40 = vmax.f32 %v2550_v58, 0.0 }
 0x284   : > { %v2806_v9 = vmax.f32 %v2297_v3, 0.0  ;;  %v2554_v39 = vadd.f32 %v2553_v27, %v7658_v50  ;;  %4545 = vmatprep.subr.bf16.mxu0 %v6933_v26  ;;  %v2555_v19 = vpop.f32.mrb[203].mxu1 }
 0x285   : > { %v2807_v28 = vmax.f32 %v2299_v51, 0.0  ;;  %v2556_v32 = vadd.f32 %v2555_v19, %v7658_v50  ;;  %4607 = vmatpush1.bf16.msra.mxu1 %v6912_v55  ;;  %v2302_v15 = vpop.f32.mrb[204].mxu0 }
 0x286   : > { %v7102_v35 = vpack.c.bf16 %v2806_v9, %v2790_v0  ;;  %v2808_v17 = vmax.f32 %v2554_v39, 0.0  ;;  %4609 = vmatprep.subr.bf16.mxu1 %v6940_v47  ;;  %v2304_v42 = vpop.f32.mrb[205].mxu0  ;;  %v2303_v5 = vadd.f32 %v2302_v15, %v7659_v61 }
 0x287   : > { %v7105_v24 = vpack.c.bf16 %v2807_v28, %v2791_v14  ;;  %v2809_v56 = vmax.f32 %v2556_v32, 0.0  ;;  %4547 = vmatpush1.bf16.msra.mxu0 %v6930_v7  ;;  %v2559_v26 = vpop.f32.mrb[204].mxu1  ;;  %v2305_v34 = vadd.f32 %v2304_v42, %v7659_v61 }
 0x288   : > { %v7108_v18 = vpack.c.bf16 %v2808_v17, %v2792_v4  ;;  %4549 = vmatprep.subr.bf16.mxu0 %v6957_v36  ;;  %v2561_v55 = vpop.f32.mrb[205].mxu1  ;;  %v2560_v22 = vadd.f32 %v2559_v26, %v7659_v61  ;;  %v2822_v3 = vmax.f32 %v2303_v5, 0.0  ;;  %v7661_v4 = vld [vmem:[#allocation11_spill] sm:$0xff]  ;;  %v7662_v26 = vld [vmem:[#allocation12_spill] sm:$0xff] }
 0x289   : > { %v7112_v10 = vpack.c.bf16 %v2809_v56, %v2793_v40  ;;  %4611 = vmatpush1.bf16.msra.mxu1 %v6936_v33  ;;  %v2308_v47 = vpop.f32.mrb[206].mxu0  ;;  %v2562_v38 = vadd.f32 %v2561_v55, %v7659_v61  ;;  %v2823_v51 = vmax.f32 %v2305_v34, 0.0 }
 0x28a   : > { %v2309_v16 = vadd.f32 %v2308_v47, %v7660_v20  ;;  %4613 = vmatprep.subr.bf16.mxu1 %v6964_v62  ;;  %v2310_v7 = vpop.f32.mrb[207].mxu0  ;;  %v2824_v9 = vmax.f32 %v2560_v22, 0.0 }
 0x28b   : > { %v2311_v50 = vadd.f32 %v2310_v7, %v7660_v20  ;;  %4551 = vmatpush1.bf16.msra.mxu0 %v6954_v60  ;;  %v2565_v36 = vpop.f32.mrb[206].mxu1  ;;  %v2825_v14 = vmax.f32 %v2562_v38, 0.0 }
 0x28c   : > { %v2838_v44 = vmax.f32 %v2309_v16, 0.0  ;;  %v2566_v58 = vadd.f32 %v2565_v36, %v7660_v20  ;;  %4553 = vmatprep.subr.bf16.mxu0 %v6985_v23  ;;  %v2567_v33 = vpop.f32.mrb[207].mxu1 }
 0x28d   : > { %v2839_v27 = vmax.f32 %v2311_v50, 0.0  ;;  %v2568_v0 = vadd.f32 %v2567_v33, %v7660_v20  ;;  %4615 = vmatpush1.bf16.msra.mxu1 %v6960_v57  ;;  %v2314_v62 = vpop.f32.mrb[208].mxu0 }
 0x28e   : > { %v7126_v39 = vpack.c.bf16 %v2838_v44, %v2822_v3  ;;  %v2840_v19 = vmax.f32 %v2566_v58, 0.0  ;;  %4617 = vmatprep.subr.bf16.mxu1 %v6992_v8  ;;  %v2316_v60 = vpop.f32.mrb[209].mxu0  ;;  %v2315_v17 = vadd.f32 %v2314_v62, %v7661_v4 }
 0x28f   : > { %v7129_v28 = vpack.c.bf16 %v2839_v27, %v2823_v51  ;;  %v2841_v32 = vmax.f32 %v2568_v0, 0.0  ;;  %4555 = vmatpush1.bf16.msra.mxu0 %v6982_v13  ;;  %v2571_v23 = vpop.f32.mrb[208].mxu1  ;;  %v2317_v40 = vadd.f32 %v2316_v60, %v7661_v4  ;;  %v7663_v51 = vld [vmem:[#allocation13_spill] sm:$0xff] }
 0x290   : > { %v7132_v15 = vpack.c.bf16 %v2840_v19, %v2824_v9  ;;  %4557 = vmatprep.subr.bf16.mxu0 %v7009_v48  ;;  %v2573_v57 = vpop.f32.mrb[209].mxu1  ;;  %v2572_v56 = vadd.f32 %v2571_v23, %v7661_v4  ;;  %v2854_v34 = vmax.f32 %v2315_v17, 0.0  ;;  %v7664_v19 = vld [vmem:[#allocation14_spill] sm:$0xff] }
 0x291   : > { %v7136_v42 = vpack.c.bf16 %v2841_v32, %v2825_v14  ;;  %4619 = vmatpush1.bf16.msra.mxu1 %v6988_v45  ;;  %v2320_v8 = vpop.f32.mrb[210].mxu0  ;;  %v2574_v5 = vadd.f32 %v2573_v57, %v7661_v4  ;;  %v2855_v20 = vmax.f32 %v2317_v40, 0.0 }
 0x292   : > { %v2321_v61 = vadd.f32 %v2320_v8, %v7662_v26  ;;  %4621 = vmatprep.subr.bf16.mxu1 %v7016_v21  ;;  %v2322_v13 = vpop.f32.mrb[211].mxu0  ;;  %v2856_v38 = vmax.f32 %v2572_v56, 0.0 }
 0x293   : > { %v2323_v55 = vadd.f32 %v2322_v13, %v7662_v26  ;;  %4559 = vmatpush1.bf16.msra.mxu0 %v7006_v37  ;;  %v2577_v48 = vpop.f32.mrb[210].mxu1  ;;  %v2857_v3 = vmax.f32 %v2574_v5, 0.0 }
 0x294   : > { %v2870_v47 = vmax.f32 %v2321_v61, 0.0  ;;  %v2578_v22 = vadd.f32 %v2577_v48, %v7662_v26  ;;  %4561 = vmatprep.subr.bf16.mxu0 %v7033_v49  ;;  %v2579_v45 = vpop.f32.mrb[211].mxu1 }
 0x295   : > { %v2871_v16 = vmax.f32 %v2323_v55, 0.0  ;;  %v2580_v7 = vadd.f32 %v2579_v45, %v7662_v26  ;;  %4623 = vmatpush1.bf16.msra.mxu1 %v7012_v54  ;;  %v2326_v21 = vpop.f32.mrb[212].mxu0 }
 0x296   : > { %v7150_v50 = vpack.c.bf16 %v2870_v47, %v2854_v34  ;;  %v2872_v36 = vmax.f32 %v2578_v22, 0.0  ;;  %4625 = vmatprep.subr.bf16.mxu1 %v7040_v11  ;;  %v2328_v37 = vpop.f32.mrb[213].mxu0  ;;  %v2327_v27 = vadd.f32 %v2326_v21, %v7663_v51  ;;  %v7665_v47 = vld [vmem:[#allocation15_spill] sm:$0xff] }
 0x297   : > { %v7153_v44 = vpack.c.bf16 %v2871_v16, %v2855_v20  ;;  %v2873_v58 = vmax.f32 %v2580_v7, 0.0  ;;  %4563 = vmatpush1.bf16.msra.mxu0 %v7030_v1  ;;  %v2583_v49 = vpop.f32.mrb[212].mxu1  ;;  %v2329_v62 = vadd.f32 %v2328_v37, %v7663_v51  ;;  %v7169_v1 = vld.sshfl [vmem:[%s7329_s3] sm:$0x33 pattern:$0x76325410] }
 0x298   : > { %v7156_v33 = vpack.c.bf16 %v2872_v36, %v2856_v38  ;;  %4629 = vmatprep.subr.bf16.mxu0 %v7057_v52  ;;  %v2585_v54 = vpop.f32.mrb[213].mxu1  ;;  %v2584_v9 = vadd.f32 %v2583_v49, %v7663_v51  ;;  %v2886_v23 = vmax.f32 %v2327_v27, 0.0 }
 0x299   : > { %v7160_v0 = vpack.c.bf16 %v2873_v58, %v2857_v3  ;;  %4627 = vmatpush1.bf16.msra.mxu1 %v7036_v31  ;;  %v2332_v11 = vpop.f32.mrb[214].mxu0  ;;  %v2586_v14 = vadd.f32 %v2585_v54, %v7663_v51 }
 0x29a   : > { %v2333_v60 = vadd.f32 %v2332_v11, %v7664_v19  ;;  %3593 = vmatmul.mubr.f32.vlgmr.msra.gmra.mrb[4].mxu0 %v7169_v1  ;;  %4693 = vmatprep.subr.bf16.mxu1 %v7064_v59  ;;  %v2334_v52 = vpop.f32.mrb[215].mxu0  ;;  %v2887_v59 = vmax.f32 %v2329_v62, 0.0 }
 0x29b   : > { %v2335_v32 = vadd.f32 %v2334_v52, %v7664_v19  ;;  %4631 = vmatpush1.bf16.msra.mxu0 %v7054_v53  ;;  %v2589_v31 = vpop.f32.mrb[214].mxu1  ;;  %3734 = vmatprep.mubr.f32.mxu0 %v6750_v30  ;;  %v2888_v53 = vmax.f32 %v2584_v9, 0.0  ;;  %v2889_v5 = vmax.f32 %v2586_v14, 0.0 }
 0x29c   : > { %v2902_v4 = vmax.f32 %v2333_v60, 0.0  ;;  %v2590_v17 = vadd.f32 %v2589_v31, %v7664_v19  ;;  %3664 = vmatmul.mubr.f32.vlgmr.msra.gmra.mrb[4].mxu1 %v7169_v1  ;;  %4633 = vmatprep.subr.bf16.mxu0 %v7081_v43  ;;  %v2591_v57 = vpop.f32.mrb[215].mxu1 }
 0x29d   : > { %v2903_v40 = vmax.f32 %v2335_v32, 0.0  ;;  %v2592_v8 = vadd.f32 %v2591_v57, %v7664_v19  ;;  %4695 = vmatpush1.bf16.msra.mxu1 %v7060_v12  ;;  %v2338_v56 = vpop.f32.mrb[216].mxu0  ;;  %3805 = vmatprep.mubr.f32.mxu1 %v6750_v30 }
 0x29e   : > { %v7183_v26 = vpack.c.bf16 %v2902_v4, %v2886_v23  ;;  %v2904_v61 = vmax.f32 %v2590_v17, 0.0  ;;  %4697 = vmatprep.subr.bf16.mxu1 %v7088_v46  ;;  %v2340_v13 = vpop.f32.mrb[217].mxu0  ;;  %v2339_v12 = vadd.f32 %v2338_v56, %v7665_v47 }
 0x29f   : > { %v4648_v55 = vpack.c.bf16 %v2903_v40, %v2887_v59  ;;  %v2905_v43 = vmax.f32 %v2592_v8, 0.0  ;;  %4635 = vmatpush1.bf16.msra.mxu0 %v7078_v41  ;;  %v2595_v48 = vpop.f32.mrb[216].mxu1  ;;  %v2341_v45 = vadd.f32 %v2340_v13, %v7665_v47 }
 0x2a0   : > { %v7187_v34 = vpack.c.bf16 %v2904_v61, %v2888_v53  ;;  %4637 = vmatprep.subr.bf16.mxu0 %v7105_v24  ;;  %v2597_v30 = vpop.f32.mrb[217].mxu1  ;;  %v2596_v20 = vadd.f32 %v2595_v48, %v7665_v47  ;;  %v2918_v38 = vmax.f32 %v2339_v12, 0.0 }
 0x2a1   : > { %v4712_v22 = vpack.c.bf16 %v2905_v43, %v2889_v5  ;;  %4699 = vmatpush1.bf16.msra.mxu1 %v7084_v2  ;;  %v2344_v46 = vpop.f32.mrb[218].mxu0  ;;  %v2598_v7 = vadd.f32 %v2597_v30, %v7665_v47  ;;  %v2919_v3 = vmax.f32 %v2341_v45, 0.0 }
 0x2a2   : > { %v2345_v16 = vadd.f32 %v2344_v46, %v5723_v29  ;;  %4701 = vmatprep.subr.bf16.mxu1 %v7112_v10  ;;  %v2346_v41 = vpop.f32.mrb[219].mxu0  ;;  %v2920_v51 = vmax.f32 %v2596_v20, 0.0 }
 0x2a3   : > { %v2347_v21 = vadd.f32 %v2346_v41, %v5723_v29  ;;  %4639 = vmatpush1.bf16.msra.mxu0 %v7102_v35  ;;  %v2601_v24 = vpop.f32.mrb[218].mxu1  ;;  %v2921_v62 = vmax.f32 %v2598_v7, 0.0 }
 0x2a4   : > { %v2934_v36 = vmax.f32 %v2345_v16, 0.0  ;;  %v2602_v37 = vadd.f32 %v2601_v24, %v5723_v29  ;;  %4641 = vmatprep.subr.bf16.mxu0 %v7129_v28  ;;  %v2603_v2 = vpop.f32.mrb[219].mxu1 }
 0x2a5   : > { %v2935_v58 = vmax.f32 %v2347_v21, 0.0  ;;  %v2604_v49 = vadd.f32 %v2603_v2, %v5723_v29  ;;  %4703 = vmatpush1.bf16.msra.mxu1 %v7108_v18  ;;  %v2350_v10 = vpop.f32.mrb[220].mxu0 }
 0x2a6   : > { %v4654_v27 = vpack.c.bf16 %v2934_v36, %v2918_v38  ;;  %v2936_v54 = vmax.f32 %v2602_v37, 0.0  ;;  %4705 = vmatprep.subr.bf16.mxu1 %v7136_v42  ;;  %v2352_v35 = vpop.f32.mrb[221].mxu0  ;;  %v2351_v60 = vadd.f32 %v2350_v10, %v5747_v25 }
 0x2a7   : > { %v4652_v11 = vpack.c.bf16 %v2935_v58, %v2919_v3  ;;  %v2937_v9 = vmax.f32 %v2604_v49, 0.0  ;;  %4643 = vmatpush1.bf16.msra.mxu0 %v7126_v39  ;;  %v2607_v28 = vpop.f32.mrb[220].mxu1  ;;  %v2353_v52 = vadd.f32 %v2352_v35, %v5747_v25  ;;  %v7667_v35 = vld [vmem:[#allocation23_spill] sm:$0xff] }
 0x2a8   : > { %v4718_v19 = vpack.c.bf16 %v2936_v54, %v2920_v51  ;;  %4645 = vmatprep.subr.bf16.mxu0 %v7153_v44  ;;  %v2609_v29 = vpop.f32.mrb[221].mxu1  ;;  %v2608_v42 = vadd.f32 %v2607_v28, %v5747_v25  ;;  %v2950_v4 = vmax.f32 %v2351_v60, 0.0 }
 0x2a9   : > { %v4716_v18 = vpack.c.bf16 %v2937_v9, %v2921_v62  ;;  %4707 = vmatpush1.bf16.msra.mxu1 %v7132_v15  ;;  %v2356_v14 = vpop.f32.mrb[222].mxu0  ;;  %v2610_v31 = vadd.f32 %v2609_v29, %v5747_v25  ;;  %v2951_v59 = vmax.f32 %v2353_v52, 0.0  ;;  %v7668_v29 = vld [vmem:[#allocation26_spill] sm:$0xff] }
 0x2aa   : > { %v2357_v32 = vadd.f32 %v2356_v14, %v5757_v6  ;;  %4709 = vmatprep.subr.bf16.mxu1 %v7160_v0  ;;  %v2358_v39 = vpop.f32.mrb[223].mxu0  ;;  %v2952_v56 = vmax.f32 %v2608_v42, 0.0 }
 0x2ab   : > { %v2359_v23 = vadd.f32 %v2358_v39, %v5757_v6  ;;  %4647 = vmatpush1.bf16.msra.mxu0 %v7150_v50  ;;  %v2613_v44 = vpop.f32.mrb[222].mxu1  ;;  %v2953_v50 = vmax.f32 %v2610_v31, 0.0 }
 0x2ac   : > { %v2966_v17 = vmax.f32 %v2357_v32, 0.0  ;;  %v2614_v57 = vadd.f32 %v2613_v44, %v5757_v6  ;;  %4649 = vmatprep.subr.bf16.mxu0 %v4648_v55  ;;  %v2615_v15 = vpop.f32.mrb[223].mxu1 }
 0x2ad   : > { %v2967_v40 = vmax.f32 %v2359_v23, 0.0  ;;  %v2616_v8 = vadd.f32 %v2615_v15, %v5757_v6  ;;  %4711 = vmatpush1.bf16.msra.mxu1 %v7156_v33  ;;  %v2362_v0 = vpop.f32.mrb[224].mxu0 }
 0x2ae   : > { %v4658_v25 = vpack.c.bf16 %v2966_v17, %v2950_v4  ;;  %v2968_v53 = vmax.f32 %v2614_v57, 0.0  ;;  %4713 = vmatprep.subr.bf16.mxu1 %v4712_v22  ;;  %v2364_v61 = vpop.f32.mrb[225].mxu0  ;;  %v2363_v48 = vadd.f32 %v2362_v0, %v5781_v63  ;;  %v7666_v22 = vld [vmem:[#allocation20_spill] sm:$0xff] }
 0x2af   : > { %v4656_v13 = vpack.c.bf16 %v2967_v40, %v2951_v59  ;;  %v2969_v5 = vmax.f32 %v2616_v8, 0.0  ;;  %4651 = vmatpush1.bf16.msra.mxu0 %v7183_v26  ;;  %v2619_v43 = vpop.f32.mrb[224].mxu1  ;;  %v2365_v33 = vadd.f32 %v2364_v61, %v5781_v63 }
 0x2b0   : > { %v4722_v55 = vpack.c.bf16 %v2968_v53, %v2952_v56  ;;  %4653 = vmatprep.subr.bf16.mxu0 %v4652_v11  ;;  %v2621_v47 = vpop.f32.mrb[225].mxu1  ;;  %v2620_v30 = vadd.f32 %v2619_v43, %v5781_v63  ;;  %v2982_v41 = vmax.f32 %v2363_v48, 0.0 }
 0x2b1   : > { %v4720_v6 = vpack.c.bf16 %v2969_v5, %v2953_v50  ;;  %4715 = vmatpush1.bf16.msra.mxu1 %v7187_v34  ;;  %v2368_v12 = vpop.f32.mrb[226].mxu0  ;;  %v2622_v26 = vadd.f32 %v2621_v47, %v5781_v63  ;;  %v2983_v34 = vmax.f32 %v2365_v33, 0.0  ;;  %v7670_v33 = vld [vmem:[#allocation32_spill] sm:$0xff] }
 0x2b2   : > { %v2369_v45 = vadd.f32 %v2368_v12, %v7666_v22  ;;  %4717 = vmatprep.subr.bf16.mxu1 %v4716_v18  ;;  %v2370_v46 = vpop.f32.mrb[227].mxu0  ;;  %v2984_v2 = vmax.f32 %v2620_v30, 0.0 }
 0x2b3   : > { %v2371_v20 = vadd.f32 %v2370_v46, %v7666_v22  ;;  %4655 = vmatpush1.bf16.msra.mxu0 %v4654_v27  ;;  %v2625_v16 = vpop.f32.mrb[226].mxu1  ;;  %v2985_v49 = vmax.f32 %v2622_v26, 0.0 }
 0x2b4   : > { %v2998_v7 = vmax.f32 %v2369_v45, 0.0  ;;  %v2626_v21 = vadd.f32 %v2625_v16, %v7666_v22  ;;  %4657 = vmatprep.subr.bf16.mxu0 %v4656_v13  ;;  %v2627_v24 = vpop.f32.mrb[227].mxu1  ;;  %v7669_v13 = vld [vmem:[#allocation29_spill] sm:$0xff] }
 0x2b5   : > { %v2999_v38 = vmax.f32 %v2371_v20, 0.0  ;;  %v2628_v36 = vadd.f32 %v2627_v24, %v7666_v22  ;;  %4719 = vmatpush1.bf16.msra.mxu1 %v4718_v19  ;;  %v2374_v37 = vpop.f32.mrb[228].mxu0 }
 0x2b6   : > { %v4662_v3 = vpack.c.bf16 %v2998_v7, %v2982_v41  ;;  %v3000_v58 = vmax.f32 %v2626_v21, 0.0  ;;  %4721 = vmatprep.subr.bf16.mxu1 %v4720_v6  ;;  %v2376_v63 = vpop.f32.mrb[229].mxu0  ;;  %v2375_v62 = vadd.f32 %v2374_v37, %v7667_v35 }
 0x2b7   : > { %v4660_v10 = vpack.c.bf16 %v2999_v38, %v2983_v34  ;;  %v3001_v51 = vmax.f32 %v2628_v36, 0.0  ;;  %4659 = vmatpush1.bf16.msra.mxu0 %v4658_v25  ;;  %v2631_v27 = vpop.f32.mrb[228].mxu1  ;;  %v2377_v28 = vadd.f32 %v2376_v63, %v7667_v35 }
 0x2b8   : > { %v4726_v54 = vpack.c.bf16 %v3000_v58, %v2984_v2  ;;  %v2633_v11 = vpop.f32.mrb[229].mxu1  ;;  %v2632_v60 = vadd.f32 %v2631_v27, %v7667_v35  ;;  %v3014_v39 = vmax.f32 %v2375_v62, 0.0 }
 0x2b9   : > { %v4724_v9 = vpack.c.bf16 %v3001_v51, %v2985_v49  ;;  %4723 = vmatpush1.bf16.msra.mxu1 %v4722_v55  ;;  %v2380_v19 = vpop.f32.mrb[230].mxu0  ;;  %4661 = vmatprep.subr.bf16.mxu0 %v4660_v10  ;;  %v2634_v14 = vadd.f32 %v2633_v11, %v7667_v35  ;;  %v3015_v4 = vmax.f32 %v2377_v28, 0.0  ;;  %v7671_v51 = vld [vmem:[#allocation35_spill] sm:$0xff]  ;;  %v7672_v28 = vld [vmem:[#allocation38_spill] sm:$0xff] }
 0x2ba   : > { %v2381_v18 = vadd.f32 %v2380_v19, %v7668_v29  ;;  %v2382_v52 = vpop.f32.mrb[231].mxu0  ;;  %v3016_v59 = vmax.f32 %v2632_v60, 0.0 }
 0x2bb   : > { %v2383_v42 = vadd.f32 %v2382_v52, %v7668_v29  ;;  %4663 = vmatpush1.bf16.msra.mxu0 %v4662_v3  ;;  %v2637_v32 = vpop.f32.mrb[230].mxu1  ;;  %4725 = vmatprep.subr.bf16.mxu1 %v4724_v9  ;;  %v3017_v56 = vmax.f32 %v2634_v14, 0.0 }
 0x2bc   : > { %v3030_v31 = vmax.f32 %v2381_v18, 0.0  ;;  %v2638_v23 = vadd.f32 %v2637_v32, %v7668_v29  ;;  %v2639_v44 = vpop.f32.mrb[231].mxu1 }
 0x2bd   : > { %v3031_v17 = vmax.f32 %v2383_v42, 0.0  ;;  %v2640_v57 = vadd.f32 %v2639_v44, %v7668_v29  ;;  %4727 = vmatpush1.bf16.msra.mxu1 %v4726_v54  ;;  %v2386_v15 = vpop.f32.mrb[232].mxu0 }
 0x2be   : > { %v4666_v40 = vpack.c.bf16 %v3030_v31, %v3014_v39  ;;  %v3032_v8 = vmax.f32 %v2638_v23, 0.0  ;;  %v2388_v0 = vpop.f32.mrb[233].mxu0  ;;  %v2387_v5 = vadd.f32 %v2386_v15, %v7669_v13 }
 0x2bf   : > { %v4664_v25 = vpack.c.bf16 %v3031_v17, %v3015_v4  ;;  %v3033_v53 = vmax.f32 %v2640_v57, 0.0  ;;  %v2643_v61 = vpop.f32.mrb[232].mxu1  ;;  %v2389_v48 = vadd.f32 %v2388_v0, %v7669_v13 }
 0x2c0   : > { %v4730_v50 = vpack.c.bf16 %v3032_v8, %v3016_v59  ;;  %v2645_v43 = vpop.f32.mrb[233].mxu1  ;;  %v2644_v6 = vadd.f32 %v2643_v61, %v7669_v13  ;;  %v3046_v26 = vmax.f32 %v2387_v5, 0.0 }
 0x2c1   : > { %v4728_v55 = vpack.c.bf16 %v3033_v53, %v3017_v56  ;;  %v2392_v47 = vpop.f32.mrb[234].mxu0  ;;  %4665 = vmatprep.subr.bf16.mxu0 %v4664_v25  ;;  %v2646_v22 = vadd.f32 %v2645_v43, %v7669_v13  ;;  %v3047_v7 = vmax.f32 %v2389_v48, 0.0  ;;  %v7673_v53 = vld [vmem:[#allocation41_spill] sm:$0xff]  ;;  %v7674_v48 = vld [vmem:[#allocation44_spill] sm:$0xff] }
 0x2c2   : > { %v2393_v12 = vadd.f32 %v2392_v47, %v7670_v33  ;;  %v2394_v30 = vpop.f32.mrb[235].mxu0  ;;  %4667 = vmatpush1.bf16.msra.mxu0 %v4666_v40  ;;  %v3048_v38 = vmax.f32 %v2644_v6, 0.0 }
 0x2c3   : > { %v2395_v45 = vadd.f32 %v2394_v30, %v7670_v33  ;;  %v2649_v46 = vpop.f32.mrb[234].mxu1  ;;  %4729 = vmatprep.subr.bf16.mxu1 %v4728_v55  ;;  %v3049_v3 = vmax.f32 %v2646_v22, 0.0 }
 0x2c4   : > { %v3062_v20 = vmax.f32 %v2393_v12, 0.0  ;;  %v2650_v16 = vadd.f32 %v2649_v46, %v7670_v33  ;;  %v2651_v41 = vpop.f32.mrb[235].mxu1  ;;  %4731 = vmatpush1.bf16.msra.mxu1 %v4730_v50 }
 0x2c5   : > { %v3063_v21 = vmax.f32 %v2395_v45, 0.0  ;;  %v2652_v24 = vadd.f32 %v2651_v41, %v7670_v33  ;;  %v2398_v34 = vpop.f32.mrb[236].mxu0 }
 0x2c6   : > { %v4670_v36 = vpack.c.bf16 %v3062_v20, %v3046_v26  ;;  %v3064_v37 = vmax.f32 %v2650_v16, 0.0  ;;  %v2400_v2 = vpop.f32.mrb[237].mxu0  ;;  %v2399_v27 = vadd.f32 %v2398_v34, %v7671_v51 }
 0x2c7   : > { %v4668_v58 = vpack.c.bf16 %v3063_v21, %v3047_v7  ;;  %v3065_v63 = vmax.f32 %v2652_v24, 0.0  ;;  %v2655_v49 = vpop.f32.mrb[236].mxu1  ;;  %v2401_v62 = vadd.f32 %v2400_v2, %v7671_v51 }
 0x2c8   : > { %v4734_v10 = vpack.c.bf16 %v3064_v37, %v3048_v38  ;;  %v2657_v54 = vpop.f32.mrb[237].mxu1  ;;  %v2656_v9 = vadd.f32 %v2655_v49, %v7671_v51  ;;  %v3078_v14 = vmax.f32 %v2399_v27, 0.0 }
 0x2c9   : > { %v4732_v35 = vpack.c.bf16 %v3065_v63, %v3049_v3  ;;  %v2404_v11 = vpop.f32.mrb[238].mxu0  ;;  %4669 = vmatprep.subr.bf16.mxu0 %v4668_v58  ;;  %v2658_v29 = vadd.f32 %v2657_v54, %v7671_v51  ;;  %v3079_v31 = vmax.f32 %v2401_v62, 0.0  ;;  %v7675_v63 = vld [vmem:[#allocation47_spill] sm:$0xff]  ;;  %v7676_v62 = vld [vmem:[#allocation50_spill] sm:$0xff] }
 0x2ca   : > { %v2405_v19 = vadd.f32 %v2404_v11, %v7672_v28  ;;  %v2406_v60 = vpop.f32.mrb[239].mxu0  ;;  %4671 = vmatpush1.bf16.msra.mxu0 %v4670_v36  ;;  %v3080_v17 = vmax.f32 %v2656_v9, 0.0 }
 0x2cb   : > { %v2407_v18 = vadd.f32 %v2406_v60, %v7672_v28  ;;  %v2661_v52 = vpop.f32.mrb[238].mxu1  ;;  %4733 = vmatprep.subr.bf16.mxu1 %v4732_v35  ;;  %v3081_v40 = vmax.f32 %v2658_v29, 0.0 }
 0x2cc   : > { %v3094_v42 = vmax.f32 %v2405_v19, 0.0  ;;  %v2662_v32 = vadd.f32 %v2661_v52, %v7672_v28  ;;  %v2663_v39 = vpop.f32.mrb[239].mxu1  ;;  %4735 = vmatpush1.bf16.msra.mxu1 %v4734_v10 }
 0x2cd   : > { %v3095_v23 = vmax.f32 %v2407_v18, 0.0  ;;  %v2664_v44 = vadd.f32 %v2663_v39, %v7672_v28  ;;  %v2410_v4 = vpop.f32.mrb[240].mxu0 }
 0x2ce   : > { %v4674_v57 = vpack.c.bf16 %v3094_v42, %v3078_v14  ;;  %v3096_v15 = vmax.f32 %v2662_v32, 0.0  ;;  %v2412_v59 = vpop.f32.mrb[241].mxu0  ;;  %v2411_v61 = vadd.f32 %v2410_v4, %v7673_v53 }
 0x2cf   : > { %v4672_v8 = vpack.c.bf16 %v3095_v23, %v3079_v31  ;;  %v3097_v0 = vmax.f32 %v2664_v44, 0.0  ;;  %v2667_v56 = vpop.f32.mrb[240].mxu1  ;;  %v2413_v5 = vadd.f32 %v2412_v59, %v7673_v53 }
 0x2d0   : > { %v4738_v25 = vpack.c.bf16 %v3096_v15, %v3080_v17  ;;  %v2669_v50 = vpop.f32.mrb[241].mxu1  ;;  %v2668_v55 = vadd.f32 %v2667_v56, %v7673_v53  ;;  %v3110_v22 = vmax.f32 %v2411_v61, 0.0 }
 0x2d1   : > { %v4736_v13 = vpack.c.bf16 %v3097_v0, %v3081_v40  ;;  %v2416_v43 = vpop.f32.mrb[242].mxu0  ;;  %4673 = vmatprep.subr.bf16.mxu0 %v4672_v8  ;;  %v2670_v33 = vadd.f32 %v2669_v50, %v7673_v53  ;;  %v3111_v20 = vmax.f32 %v2413_v5, 0.0  ;;  %v7677_v0 = vld [vmem:[#allocation53_spill] sm:$0xff]  ;;  %v7678_v5 = vld [vmem:[#allocation56_spill] sm:$0xff] }
 0x2d2   : > { %v2417_v47 = vadd.f32 %v2416_v43, %v7674_v48  ;;  %v2418_v6 = vpop.f32.mrb[243].mxu0  ;;  %4675 = vmatpush1.bf16.msra.mxu0 %v4674_v57  ;;  %v3112_v21 = vmax.f32 %v2668_v55, 0.0 }
 0x2d3   : > { %v2419_v12 = vadd.f32 %v2418_v6, %v7674_v48  ;;  %v2673_v30 = vpop.f32.mrb[242].mxu1  ;;  %4737 = vmatprep.subr.bf16.mxu1 %v4736_v13  ;;  %v3113_v36 = vmax.f32 %v2670_v33, 0.0 }
 0x2d4   : > { %v3126_v45 = vmax.f32 %v2417_v47, 0.0  ;;  %v2674_v46 = vadd.f32 %v2673_v30, %v7674_v48  ;;  %v2675_v26 = vpop.f32.mrb[243].mxu1  ;;  %4739 = vmatpush1.bf16.msra.mxu1 %v4738_v25 }
 0x2d5   : > { %v3127_v16 = vmax.f32 %v2419_v12, 0.0  ;;  %v2676_v41 = vadd.f32 %v2675_v26, %v7674_v48  ;;  %v2422_v7 = vpop.f32.mrb[244].mxu0 }
 0x2d6   : > { %v4678_v24 = vpack.c.bf16 %v3126_v45, %v3110_v22  ;;  %v3128_v34 = vmax.f32 %v2674_v46, 0.0  ;;  %v2424_v38 = vpop.f32.mrb[245].mxu0  ;;  %v2423_v49 = vadd.f32 %v2422_v7, %v7675_v63 }
 0x2d7   : > { %v4676_v37 = vpack.c.bf16 %v3127_v16, %v3111_v20  ;;  %v3129_v2 = vmax.f32 %v2676_v41, 0.0  ;;  %v2679_v3 = vpop.f32.mrb[244].mxu1  ;;  %v2425_v27 = vadd.f32 %v2424_v38, %v7675_v63 }
 0x2d8   : > { %v4742_v58 = vpack.c.bf16 %v3128_v34, %v3112_v21  ;;  %v2681_v10 = vpop.f32.mrb[245].mxu1  ;;  %v2680_v35 = vadd.f32 %v2679_v3, %v7675_v63  ;;  %v3142_v29 = vmax.f32 %v2423_v49, 0.0 }
 0x2d9   : > { %v4740_v51 = vpack.c.bf16 %v3129_v2, %v3113_v36  ;;  %v2428_v54 = vpop.f32.mrb[246].mxu0  ;;  %4677 = vmatprep.subr.bf16.mxu0 %v4676_v37  ;;  %v2682_v28 = vadd.f32 %v2681_v10, %v7675_v63  ;;  %v3143_v42 = vmax.f32 %v2425_v27, 0.0  ;;  %v7679_v2 = vld [vmem:[#allocation59_spill] sm:$0xff]  ;;  %v7680_v27 = vld [vmem:[#allocation62_spill] sm:$0xff] }
 0x2da   : > { %v2429_v11 = vadd.f32 %v2428_v54, %v7676_v62  ;;  %v2430_v9 = vpop.f32.mrb[247].mxu0  ;;  %4679 = vmatpush1.bf16.msra.mxu0 %v4678_v24  ;;  %v3144_v23 = vmax.f32 %v2680_v35, 0.0 }
 0x2db   : > { %v2431_v19 = vadd.f32 %v2430_v9, %v7676_v62  ;;  %v2685_v60 = vpop.f32.mrb[246].mxu1  ;;  %4741 = vmatprep.subr.bf16.mxu1 %v4740_v51  ;;  %v3145_v57 = vmax.f32 %v2682_v28, 0.0 }
 0x2dc   : > { %v3158_v18 = vmax.f32 %v2429_v11, 0.0  ;;  %v2686_v52 = vadd.f32 %v2685_v60, %v7676_v62  ;;  %v2687_v14 = vpop.f32.mrb[247].mxu1  ;;  %4743 = vmatpush1.bf16.msra.mxu1 %v4742_v58 }
 0x2dd   : > { %v3159_v32 = vmax.f32 %v2431_v19, 0.0  ;;  %v2688_v39 = vadd.f32 %v2687_v14, %v7676_v62  ;;  %v2434_v31 = vpop.f32.mrb[248].mxu0 }
 0x2de   : > { %v4682_v44 = vpack.c.bf16 %v3158_v18, %v3142_v29  ;;  %v3160_v4 = vmax.f32 %v2686_v52, 0.0  ;;  %v2436_v17 = vpop.f32.mrb[249].mxu0  ;;  %v2435_v56 = vadd.f32 %v2434_v31, %v7677_v0  ;;  %v7283_v18 = vpop.permute.xlu0 %3230 }
 0x2df   : > { %v4680_v15 = vpack.c.bf16 %v3159_v32, %v3143_v42  ;;  %v3161_v59 = vmax.f32 %v2688_v39, 0.0  ;;  %v2691_v40 = vpop.f32.mrb[248].mxu1  ;;  %v2437_v61 = vadd.f32 %v2436_v17, %v7677_v0 }
 0x2e0   : > { %v4746_v8 = vpack.c.bf16 %v3160_v4, %v3144_v23  ;;  %v2693_v25 = vpop.f32.mrb[249].mxu1  ;;  %v2692_v13 = vadd.f32 %v2691_v40, %v7677_v0  ;;  %v3174_v33 = vmax.f32 %v2435_v56, 0.0 }
 0x2e1   : > { %v4744_v53 = vpack.c.bf16 %v3161_v59, %v3145_v57  ;;  %v2440_v50 = vpop.f32.mrb[250].mxu0  ;;  %4681 = vmatprep.subr.bf16.mxu0 %v4680_v15  ;;  %v2694_v48 = vadd.f32 %v2693_v25, %v7677_v0  ;;  %v3175_v45 = vmax.f32 %v2437_v61, 0.0 }
 0x2e2   : > { %v2441_v43 = vadd.f32 %v2440_v50, %v7678_v5  ;;  %v2442_v55 = vpop.f32.mrb[251].mxu0  ;;  %4683 = vmatpush1.bf16.msra.mxu0 %v4682_v44  ;;  %v3176_v16 = vmax.f32 %v2692_v13, 0.0  ;;  %v7681_v13 = vld [vmem:[#allocation2_spill] sm:$0xff] }
 0x2e3   : > { %v2443_v47 = vadd.f32 %v2442_v55, %v7678_v5  ;;  %v2697_v6 = vpop.f32.mrb[250].mxu1  ;;  %4745 = vmatprep.subr.bf16.mxu1 %v4744_v53  ;;  %v3177_v24 = vmax.f32 %v2694_v48, 0.0 }
 0x2e4   : > { %v3190_v12 = vmax.f32 %v2441_v43, 0.0  ;;  %v2698_v30 = vadd.f32 %v2697_v6, %v7678_v5  ;;  %v2699_v22 = vpop.f32.mrb[251].mxu1  ;;  %4747 = vmatpush1.bf16.msra.mxu1 %v4746_v8 }
 0x2e5   : > { %v3191_v46 = vmax.f32 %v2443_v47, 0.0  ;;  %v2700_v26 = vadd.f32 %v2699_v22, %v7678_v5  ;;  %v2446_v20 = vpop.f32.mrb[252].mxu0 }
 0x2e6   : > { %v4686_v41 = vpack.c.bf16 %v3190_v12, %v3174_v33  ;;  %v3192_v7 = vmax.f32 %v2698_v30, 0.0  ;;  %v2448_v21 = vpop.f32.mrb[253].mxu0  ;;  %v2447_v3 = vadd.f32 %v2446_v20, %v7679_v2 }
 0x2e7   : > { %v4684_v34 = vpack.c.bf16 %v3191_v46, %v3175_v45  ;;  %v3193_v38 = vmax.f32 %v2700_v26, 0.0  ;;  %v2703_v36 = vpop.f32.mrb[252].mxu1  ;;  %v2449_v49 = vadd.f32 %v2448_v21, %v7679_v2 }
 0x2e8   : > { %v4750_v37 = vpack.c.bf16 %v3192_v7, %v3176_v16  ;;  %v2705_v58 = vpop.f32.mrb[253].mxu1  ;;  %v2704_v51 = vadd.f32 %v2703_v36, %v7679_v2  ;;  %v3206_v28 = vmax.f32 %v2447_v3, 0.0 }
 0x2e9   : > { %v4748_v63 = vpack.c.bf16 %v3193_v38, %v3177_v24  ;;  %v2452_v10 = vpop.f32.mrb[254].mxu0  ;;  %4685 = vmatprep.subr.bf16.mxu0 %v4684_v34  ;;  %v2706_v62 = vadd.f32 %v2705_v58, %v7679_v2  ;;  %v3207_v52 = vmax.f32 %v2449_v49, 0.0 }
 0x2ea   : > { %v2453_v54 = vadd.f32 %v2452_v10, %v7680_v27  ;;  %v2454_v35 = vpop.f32.mrb[255].mxu0  ;;  %4687 = vmatpush1.bf16.msra.mxu0 %v4686_v41  ;;  %v3208_v39 = vmax.f32 %v2704_v51, 0.0 }
 0x2eb   : > { %v2455_v11 = vadd.f32 %v2454_v35, %v7680_v27  ;;  %v2709_v9 = vpop.f32.mrb[254].mxu1  ;;  %4749 = vmatprep.subr.bf16.mxu1 %v4748_v63  ;;  %v3209_v17 = vmax.f32 %v2706_v62, 0.0 }
 0x2ec   : > { %v3222_v19 = vmax.f32 %v2453_v54, 0.0  ;;  %v2710_v60 = vadd.f32 %v2709_v9, %v7680_v27  ;;  %v2711_v29 = vpop.f32.mrb[255].mxu1  ;;  %4751 = vmatpush1.bf16.msra.mxu1 %v4750_v37 }
 0x2ed   : > { %v3223_v14 = vmax.f32 %v2455_v11, 0.0  ;;  %v2712_v42 = vadd.f32 %v2711_v29, %v7680_v27  ;;  %v3310_v32 = vpop.f32.mrb[0].mxu0 }
 0x2ee   : > { %v4690_v31 = vpack.c.bf16 %v3222_v19, %v3206_v28  ;;  %v3224_v23 = vmax.f32 %v2710_v60, 0.0  ;;  %v3311_v44 = vadd.f32 %v3310_v32, %v7283_v18  ;;  %v3312_v4 = vpop.f32.mrb[1].mxu0 }
 0x2ef   : > { %v4688_v57 = vpack.c.bf16 %v3223_v14, %v3207_v52  ;;  %v3225_v15 = vmax.f32 %v2712_v42, 0.0  ;;  %v3313_v59 = vadd.f32 %v3312_v4, %v7283_v18  ;;  %v3381_v40 = vpop.f32.mrb[0].mxu1 }
 0x2f0   : > { %v4754_v8 = vpack.c.bf16 %v3224_v23, %v3208_v39  ;;  %v3382_v0 = vadd.f32 %v3381_v40, %v7283_v18  ;;  %v3383_v56 = vpop.f32.mrb[1].mxu1 }
 0x2f1   : > { %v4752_v25 = vpack.c.bf16 %v3225_v15, %v3209_v17  ;;  %v3828_v53 = vcombine.low %v3311_v44, %v3313_v59  ;;  %v3384_v61 = vadd.f32 %v3383_v56, %v7283_v18  ;;  %4689 = vmatprep.subr.bf16.mxu0 %v4688_v57 }
 0x2f2   : > { %4691 = vmatpush1.bf16.msra.mxu0 %v4690_v31 }
 0x2f3   : > { %v3829_v50 = vcombine.low %v3382_v0, %v3384_v61  ;;  %4753 = vmatprep.subr.bf16.mxu1 %v4752_v25  ;;  %v3836_v5 = vrot.slane %v3828_v53, %v7681_v13 }
 0x2f4   : > { %4755 = vmatpush1.bf16.msra.mxu1 %v4754_v8 }
 0x2f5   : > { %v3843_v43 = vrot.slane %v3829_v50, %v7681_v13  ;;  %3735 = vmatmul.mubr.f32.vlgmr.msra.gmra.mrb[6].mxu0 %v7169_v1 }
 0x2f7   : > { %v3844_v55 = vcombine.low %v3836_v5, %v3843_v43  ;;  %3806 = vmatmul.mubr.f32.vlgmr.msra.gmra.mrb[6].mxu1 %v7169_v1 }
 0x2f9   : > { %3900 = vst [vmem:[%s7298_s30] sm:$0xff] %v3844_v55 }
 0x32d   : > { %v3452_v48 = vpop.f32.mrb[2].mxu0 }
 0x32e   : > { %v3453_v47 = vadd.f32 %v3452_v48, %v7283_v18  ;;  %v3454_v6 = vpop.f32.mrb[3].mxu0 }
 0x32f   : > { %v3455_v33 = vadd.f32 %v3454_v6, %v7283_v18  ;;  %v3523_v12 = vpop.f32.mrb[2].mxu1 }
 0x330   : > { %v3524_v30 = vadd.f32 %v3523_v12, %v7283_v18  ;;  %v3525_v22 = vpop.f32.mrb[3].mxu1 }
 0x331   : > { %v3845_v45 = vcombine.low %v3453_v47, %v3455_v33  ;;  %v3526_v46 = vadd.f32 %v3525_v22, %v7283_v18 }
 0x333   : > { %v3846_v26 = vcombine.low %v3524_v30, %v3526_v46  ;;  %v3853_v20 = vrot.slane %v3845_v45, %v7681_v13 }
 0x335   : > { %v3860_v16 = vrot.slane %v3846_v26, %v7681_v13 }
 0x337   : > { %v3861_v1 = vcombine.low %v3853_v20, %v3860_v16 }
 0x339   : > { %3901 = vst [vmem:[%s7298_s30 + $0x8] sm:$0xff] %v3861_v1 }
 0x36d   : > { %v3594_v41 = vpop.f32.mrb[4].mxu0 }
 0x36e   : > { %v3595_v7 = vadd.f32 %v3594_v41, %v7283_v18  ;;  %v3596_v21 = vpop.f32.mrb[5].mxu0 }
 0x36f   : > { %v3597_v24 = vadd.f32 %v3596_v21, %v7283_v18  ;;  %v3665_v34 = vpop.f32.mrb[4].mxu1 }
 0x370   : > { %v3666_v38 = vadd.f32 %v3665_v34, %v7283_v18  ;;  %v3667_v36 = vpop.f32.mrb[5].mxu1 }
 0x371   : > { %v3862_v37 = vcombine.low %v3595_v7, %v3597_v24  ;;  %v3668_v2 = vadd.f32 %v3667_v36, %v7283_v18 }
 0x373   : > { %v3863_v3 = vcombine.low %v3666_v38, %v3668_v2  ;;  %v3870_v58 = vrot.slane %v3862_v37, %v7681_v13 }
 0x375   : > { %v3877_v63 = vrot.slane %v3863_v3, %v7681_v13 }
 0x377   : > { %v3878_v49 = vcombine.low %v3870_v58, %v3877_v63 }
 0x379   : > { %3902 = vst [vmem:[%s7298_s30 + $0x10] sm:$0xff] %v3878_v49 }
 0x3c8   : > { %v3736_v10 = vpop.f32.mrb[6].mxu0 }
 0x3c9   : > { %v3737_v51 = vadd.f32 %v3736_v10, %v7283_v18  ;;  %v3738_v27 = vpop.f32.mrb[7].mxu0 }
 0x3ca   : > { %v3739_v54 = vadd.f32 %v3738_v27, %v7283_v18  ;;  %v3807_v35 = vpop.f32.mrb[6].mxu1 }
 0x3cb   : > { %v3808_v62 = vadd.f32 %v3807_v35, %v7283_v18  ;;  %v3809_v11 = vpop.f32.mrb[7].mxu1 }
 0x3cc   : > { %v3879_v9 = vcombine.low %v3737_v51, %v3739_v54  ;;  %v3810_v28 = vadd.f32 %v3809_v11, %v7283_v18 }
 0x3ce   : > { %v3880_v19 = vcombine.low %v3808_v62, %v3810_v28  ;;  %v3887_v60 = vrot.slane %v3879_v9, %v7681_v13 }
 0x3d0   : > { %v3894_v29 = vrot.slane %v3880_v19, %v7681_v13 }
 0x3d2   : > { %v3895_v52 = vcombine.low %v3887_v60, %v3894_v29 }
 0x3d4   : > { %3903 = vst [vmem:[%s7298_s30 + $0x18] sm:$0xff] %v3895_v52 }
 0x3d5 PF: > { %s15_s18 = sadd.s32 1, %s4844_s18  }
 0x3d6   : > { %p12_p4 = scmp.ge.s32.totalorder %s15_s18, 4  }
 0x3d8   :  { %14 = sbr.rel (!%p12_p4) target bundleno = 1 (0x1), region = 70 }

</bundles_post_ra>
